<compile_context>
chip_gen: v5e
topology: v5e:2x2
jax: 0.10.0
libtpu: 0.0.40
codegen_flags: <defaults>
</compile_context>

<pallas_src>
import functools

import jax
import jax.numpy as jnp
import numpy as np
from jax.experimental import pallas as pl
from jax.experimental.pallas import tpu as pltpu

_SHIFT = 8.0  # recurrence shift so the Stirling / asymptotic series is f32-accurate


def _round_up(x, m):
    return (x + m - 1) // m * m


# ---------------------------------------------------------------------------
# In-kernel special functions.
#
# TODO(synk): lax.lgamma / lax.digamma have no Mosaic lowering, so they are
# implemented via an 8-step recurrence + asymptotic series.  The recurrence is
# algebraically restructured so the shift costs VALU muls/adds instead of EUP
# logs/divides (this kernel has no matmul and is bound by the single EUP slot):
#   lgamma(x)  = stirling(x+8) - log( prod_{k<8}(x+k) )   -> 7 muls + shared logs
#   digamma(x) = psi_asym(x+8) - N(x)/P(x)                -> 1 divide (tree-fused)
# and the six lgamma shift-logs of log B(a2,b2) - log B(a1,b1) collapse into a
# single log of a product ratio.  Valid for Beta parameters in (0, ~3e4): beyond
# that the 8-term shift product P(x) overflows f32 (typical BetaE params ~0.05-10).
# ---------------------------------------------------------------------------


def _prod8(x):
    """prod_{k=0..7} (x + k), balanced tree (7 VALU muls, no EUP)."""
    return ((x * (x + 1.0)) * ((x + 2.0) * (x + 3.0))) * (
        ((x + 4.0) * (x + 5.0)) * ((x + 6.0) * (x + 7.0)))


def _prod8_and_recip_num(x):
    """Returns (P, N) with P = prod_{k<8}(x+k) and sum_{k<8} 1/(x+k) = N / P."""
    p0, p1, p2, p3 = x, x + 1.0, x + 2.0, x + 3.0
    p4, p5, p6, p7 = x + 4.0, x + 5.0, x + 6.0, x + 7.0
    d01, n01 = p0 * p1, p0 + p1
    d23, n23 = p2 * p3, p2 + p3
    d45, n45 = p4 * p5, p4 + p5
    d67, n67 = p6 * p7, p6 + p7
    d03, n03 = d01 * d23, n01 * d23 + n23 * d01
    d47, n47 = d45 * d67, n45 * d67 + n67 * d45
    return d03 * d47, n03 * d47 + n47 * d03


def _stirling_pieces(x):
    """Shifted-argument Stirling pieces, z = x + 8.

    Returns (st, logz, zinv, zinv2) with
      st = (z - 0.5)*log(z) + 1/(12 z) - 1/(360 z^3) + 1/(1260 z^5)
    so lgamma(x) = st - z + 0.5*log(2*pi) - log(prod8(x)).  The `-z` and constant
    terms cancel identically in the Beta-KL combination and are dropped there.
    logz / zinv are shared with the digamma evaluation at the same argument.
    """
    z = x + _SHIFT
    zinv = 1.0 / z
    logz = jnp.log(z)
    zinv2 = zinv * zinv
    st = (z - 0.5) * logz + zinv * (
        1.0 / 12.0 - zinv2 * (1.0 / 360.0 - zinv2 * (1.0 / 1260.0)))
    return st, logz, zinv, zinv2


def _digamma_tail(logz, zinv, zinv2):
    """digamma(x) + sum_{k<8} 1/(x+k), from the shared shifted pieces (z = x+8)."""
    return logz - 0.5 * zinv - zinv2 * (
        1.0 / 12.0 - zinv2 * (1.0 / 120.0 - zinv2 * (1.0 / 252.0)))


# ---------------------------------------------------------------------------
# Kernel: per-row  softplus(sign * (dist_BetaE - margin))
# ---------------------------------------------------------------------------
def _row_loss_kernel(pa_ref, pb_ref, qa_ref, qb_ref, out_ref, *, margin, sign):
    # p* = first KL argument (answer side), q* = second KL argument (query side).
    # alpha/beta are pre-split wrapper-side: each ref is a lane-dense (tile, d) block.
    a1 = pa_ref[...].astype(jnp.float32)
    b1 = pb_ref[...].astype(jnp.float32)
    a2 = qa_ref[...].astype(jnp.float32)
    b2 = qb_ref[...].astype(jnp.float32)
    s1 = a1 + b1
    s2 = a2 + b2

    # KL( Beta(a1,b1) || Beta(a2,b2) )
    #   = log B(a2,b2) - log B(a1,b1)
    #     + (a1-a2) psi(a1) + (b1-b2) psi(b1) + (a2-a1+b2-b1) psi(s1)
    st_a1, lz_a1, iv_a1, iv2_a1 = _stirling_pieces(a1)
    st_b1, lz_b1, iv_b1, iv2_b1 = _stirling_pieces(b1)
    st_s1, lz_s1, iv_s1, iv2_s1 = _stirling_pieces(s1)
    st_a2, _, _, _ = _stirling_pieces(a2)
    st_b2, _, _, _ = _stirling_pieces(b2)
    st_s2, _, _, _ = _stirling_pieces(s2)

    P_a1, N_a1 = _prod8_and_recip_num(a1)
    P_b1, N_b1 = _prod8_and_recip_num(b1)
    P_s1, N_s1 = _prod8_and_recip_num(s1)
    P_a2 = _prod8(a2)
    P_b2 = _prod8(b2)
    P_s2 = _prod8(s2)

    dg_a1 = _digamma_tail(lz_a1, iv_a1, iv2_a1) - N_a1 / P_a1
    dg_b1 = _digamma_tail(lz_b1, iv_b1, iv2_b1) - N_b1 / P_b1
    dg_s1 = _digamma_tail(lz_s1, iv_s1, iv2_s1) - N_s1 / P_s1

    # log B(a2,b2) - log B(a1,b1): Stirling parts (the -z and log(2*pi) terms cancel
    # exactly because s_i = a_i + b_i) plus ONE fused shift-log of a product ratio.
    st_diff = (st_a2 + st_b2 - st_s2) - (st_a1 + st_b1 - st_s1)
    q1 = (P_a1 / P_s1) * P_b1      # balanced order keeps the ratio in f32 range
    q2 = (P_a2 / P_s2) * P_b2
    log_beta_diff = st_diff + jnp.log(q1 / q2)

    kl = (log_beta_diff
          + (a1 - a2) * dg_a1
          + (b1 - b2) * dg_b1
          + ((a2 - a1) + (b2 - b1)) * dg_s1)

    dist = jnp.sum(jnp.abs(kl), axis=-1, keepdims=True)             # (tile, 1)

    # softplus(sign * (dist - margin)) == -logsigmoid(-sign * (dist - margin))
    y = sign * (dist - margin)
    out_ref[...] = jnp.maximum(y, 0.0) + jnp.log(1.0 + jnp.exp(-jnp.abs(y)))


# ---------------------------------------------------------------------------
# Wrappers
# ---------------------------------------------------------------------------
def _choose_tile(rows, d):
    # 4 f32 inputs x 2 pipeline buffers per tile; stay comfortably inside the
    # 32 MiB scoped-VMEM budget used on all generations (v7x only has 64 MiB phys).
    budget_rows = (4 * 1024 * 1024) // (4 * 2 * 4 * max(d, 1))
    budget_rows = max(8, (budget_rows // 8) * 8)
    return int(max(8, min(256, budget_rows, _round_up(rows, 8))))


def _pad_rows(x, rows_padded):
    pad = rows_padded - x.shape[0]
    if pad == 0:
        return x
    # Pad with 1.0 (a valid Beta parameter) so padded rows stay finite; their
    # contribution is sliced off before the final reduction.
    return jnp.pad(x, ((0, pad), (0, 0)), constant_values=1.0)


def _rowwise_loss_sum(p_emb, q_emb, margin, sign):
    """sum_rows softplus(sign * (||KL(Beta(p_row) || Beta(q_row))||_1 - margin))."""
    rows, d2 = p_emb.shape
    d = d2 // 2
    tile = _choose_tile(rows, d)
    rows_p = _round_up(rows, tile)
    grid = rows_p // tile

    # Split alpha/beta wrapper-side (pure layout plumbing) -> lane-dense kernel blocks.
    pa, pb = p_emb[:, :d], p_emb[:, d:]
    qa, qb = q_emb[:, :d], q_emb[:, d:]
    pa, pb, qa, qb = (_pad_rows(t, rows_p) for t in (pa, pb, qa, qb))

    kernel = functools.partial(_row_loss_kernel, margin=float(margin),
                               sign=float(sign))
    row_losses = pl.pallas_call(
        kernel,
        out_shape=jax.ShapeDtypeStruct((rows_p, 1), jnp.float32),
        grid=(grid,),
        in_specs=[pl.BlockSpec((tile, d), lambda i: (i, 0))] * 4,
        out_specs=pl.BlockSpec((tile, 1), lambda i: (i, 0)),
        compiler_params=pltpu.CompilerParams(
            dimension_semantics=("parallel",),
            vmem_limit_bytes=32 << 20),
    )(pa, pb, qa, qb)
    return jnp.sum(row_losses[:rows, 0])


def embedding_loss_betae(query_emb, query_emb_neg, answer_emb, answer_emb_neg,
                         margin):
    b, n, d2 = query_emb_neg.shape
    # positive term: softplus(dist(q, a) - margin), summed over B
    pos_sum = _rowwise_loss_sum(answer_emb, query_emb, margin, sign=+1.0)
    # negative term: softplus(margin - dist(q_neg, a_neg)); mean_B(mean_N(.)) is a
    # flat mean over B*N rows, so negatives are flattened to a dense (B*N, 2d) slab.
    neg_sum = _rowwise_loss_sum(answer_emb_neg.reshape(b * n, d2),
                                query_emb_neg.reshape(b * n, d2),
                                margin, sign=-1.0)
    return 0.5 * (pos_sum / b + neg_sum / (b * n))


def _reference(query_emb, query_emb_neg, answer_emb, answer_emb_neg, margin):
    """Pure-JAX reference (mirrors the PyTorch module) for a correctness check."""
    from jax.scipy.special import digamma, gammaln

    def kl(p, q):
        d = p.shape[-1] // 2
        a1, b1 = p[..., :d], p[..., d:]
        a2, b2 = q[..., :d], q[..., d:]
        lb1 = gammaln(a1) + gammaln(b1) - gammaln(a1 + b1)
        lb2 = gammaln(a2) + gammaln(b2) - gammaln(a2 + b2)
        return (lb2 - lb1 + (a1 - a2) * digamma(a1) + (b1 - b2) * digamma(b1)
                + (a2 - a1 + b2 - b1) * digamma(a1 + b1))

    def dist(x, y):
        return jnp.sum(jnp.abs(kl(y, x)), axis=-1)

    logsig = jax.nn.log_sigmoid
    loss_pos = -logsig(margin - dist(query_emb, answer_emb))
    loss_neg = jnp.mean(-logsig(dist(query_emb_neg, answer_emb_neg) - margin), axis=1)
    return jnp.mean(0.5 * (loss_pos + loss_neg))


if __name__ == "__main__":
    B, N, D = 4, 8, 64  # batch, num negatives, embedding dim (2 * 32 Beta params)
    margin = 2.0        # module hyperparameter (deterministic, in-script)

    key = jax.random.PRNGKey(0)
    k1, k2, k3, k4 = jax.random.split(key, 4)
    # Beta-distribution parameters must be > 0.
    query_emb = jax.random.uniform(k1, (B, D), jnp.float32, 0.1, 3.0)
    query_emb_neg = jax.random.uniform(k2, (B, N, D), jnp.float32, 0.1, 3.0)
    answer_emb = jax.random.uniform(k3, (B, D), jnp.float32, 0.1, 3.0)
    answer_emb_neg = jax.random.uniform(k4, (B, N, D), jnp.float32, 0.1, 3.0)

    loss = jax.jit(embedding_loss_betae, static_argnums=4)(
        query_emb, query_emb_neg, answer_emb, answer_emb_neg, margin)
    loss = jax.block_until_ready(loss)

    ref = _reference(query_emb, query_emb_neg, answer_emb, answer_emb_neg, margin)
    np.testing.assert_allclose(np.asarray(loss), np.asarray(ref), rtol=1e-2, atol=1e-2)

    print("KERNEL_OK")
</pallas_src>

<mosaic_0001>
module attributes {stable_mosaic.version = 11 : i64} {
  func.func @_row_loss_kernel(%arg0: i32, %arg1: memref<32x32xf32, #tpu.memory_space<vmem>>, %arg2: memref<32x32xf32, #tpu.memory_space<vmem>>, %arg3: memref<32x32xf32, #tpu.memory_space<vmem>>, %arg4: memref<32x32xf32, #tpu.memory_space<vmem>>, %arg5: memref<32x1xf32, #tpu.memory_space<vmem>>) attributes {dimension_semantics = [#tpu.dimension_semantics<parallel>], iteration_bounds = array<i64: 1>, scalar_prefetch = 0 : i64, scratch_operands = 0 : i64, tpu.core_type = #tpu.core_type<tc>, window_params = [{transform_indices = @transform_0, window_bounds = array<i64: 32, 32>}, {transform_indices = @transform_1, window_bounds = array<i64: 32, 32>}, {transform_indices = @transform_2, window_bounds = array<i64: 32, 32>}, {transform_indices = @transform_3, window_bounds = array<i64: 32, 32>}, {transform_indices = @transform_4, window_bounds = array<i64: 32, 1>}]} {
    %c0 = arith.constant 0 : index
    %c0_0 = arith.constant 0 : index
    %0 = vector.load %arg1[%c0, %c0_0] : memref<32x32xf32, #tpu.memory_space<vmem>>, vector<32x32xf32>
    %c0_1 = arith.constant 0 : index
    %c0_2 = arith.constant 0 : index
    %1 = vector.load %arg2[%c0_1, %c0_2] : memref<32x32xf32, #tpu.memory_space<vmem>>, vector<32x32xf32>
    %c0_3 = arith.constant 0 : index
    %c0_4 = arith.constant 0 : index
    %2 = vector.load %arg3[%c0_3, %c0_4] : memref<32x32xf32, #tpu.memory_space<vmem>>, vector<32x32xf32>
    %c0_5 = arith.constant 0 : index
    %c0_6 = arith.constant 0 : index
    %3 = vector.load %arg4[%c0_5, %c0_6] : memref<32x32xf32, #tpu.memory_space<vmem>>, vector<32x32xf32>
    %4 = arith.addf %0, %1 : vector<32x32xf32>
    %5 = arith.addf %2, %3 : vector<32x32xf32>
    %cst = arith.constant 8.000000e+00 : f32
    %6 = vector.broadcast %cst : f32 to vector<32x32xf32>
    %7 = arith.addf %0, %6 : vector<32x32xf32>
    %cst_7 = arith.constant 1.000000e+00 : f32
    %8 = vector.broadcast %cst_7 : f32 to vector<32x32xf32>
    %9 = arith.divf %8, %7 : vector<32x32xf32>
    %10 = math.log %7 : vector<32x32xf32>
    %11 = arith.mulf %9, %9 : vector<32x32xf32>
    %cst_8 = arith.constant 5.000000e-01 : f32
    %12 = vector.broadcast %cst_8 : f32 to vector<32x32xf32>
    %13 = arith.subf %7, %12 : vector<32x32xf32>
    %14 = arith.mulf %13, %10 : vector<32x32xf32>
    %cst_9 = arith.constant 7.93650805E-4 : f32
    %15 = vector.broadcast %cst_9 : f32 to vector<32x32xf32>
    %16 = arith.mulf %11, %15 : vector<32x32xf32>
    %cst_10 = arith.constant 0.00277777785 : f32
    %17 = vector.broadcast %cst_10 : f32 to vector<32x32xf32>
    %18 = arith.subf %17, %16 : vector<32x32xf32>
    %19 = arith.mulf %11, %18 : vector<32x32xf32>
    %cst_11 = arith.constant 0.0833333358 : f32
    %20 = vector.broadcast %cst_11 : f32 to vector<32x32xf32>
    %21 = arith.subf %20, %19 : vector<32x32xf32>
    %22 = arith.mulf %9, %21 : vector<32x32xf32>
    %23 = arith.addf %14, %22 : vector<32x32xf32>
    %cst_12 = arith.constant 8.000000e+00 : f32
    %24 = vector.broadcast %cst_12 : f32 to vector<32x32xf32>
    %25 = arith.addf %1, %24 : vector<32x32xf32>
    %cst_13 = arith.constant 1.000000e+00 : f32
    %26 = vector.broadcast %cst_13 : f32 to vector<32x32xf32>
    %27 = arith.divf %26, %25 : vector<32x32xf32>
    %28 = math.log %25 : vector<32x32xf32>
    %29 = arith.mulf %27, %27 : vector<32x32xf32>
    %cst_14 = arith.constant 5.000000e-01 : f32
    %30 = vector.broadcast %cst_14 : f32 to vector<32x32xf32>
    %31 = arith.subf %25, %30 : vector<32x32xf32>
    %32 = arith.mulf %31, %28 : vector<32x32xf32>
    %cst_15 = arith.constant 7.93650805E-4 : f32
    %33 = vector.broadcast %cst_15 : f32 to vector<32x32xf32>
    %34 = arith.mulf %29, %33 : vector<32x32xf32>
    %cst_16 = arith.constant 0.00277777785 : f32
    %35 = vector.broadcast %cst_16 : f32 to vector<32x32xf32>
    %36 = arith.subf %35, %34 : vector<32x32xf32>
    %37 = arith.mulf %29, %36 : vector<32x32xf32>
    %cst_17 = arith.constant 0.0833333358 : f32
    %38 = vector.broadcast %cst_17 : f32 to vector<32x32xf32>
    %39 = arith.subf %38, %37 : vector<32x32xf32>
    %40 = arith.mulf %27, %39 : vector<32x32xf32>
    %41 = arith.addf %32, %40 : vector<32x32xf32>
    %cst_18 = arith.constant 8.000000e+00 : f32
    %42 = vector.broadcast %cst_18 : f32 to vector<32x32xf32>
    %43 = arith.addf %4, %42 : vector<32x32xf32>
    %cst_19 = arith.constant 1.000000e+00 : f32
    %44 = vector.broadcast %cst_19 : f32 to vector<32x32xf32>
    %45 = arith.divf %44, %43 : vector<32x32xf32>
    %46 = math.log %43 : vector<32x32xf32>
    %47 = arith.mulf %45, %45 : vector<32x32xf32>
    %cst_20 = arith.constant 5.000000e-01 : f32
    %48 = vector.broadcast %cst_20 : f32 to vector<32x32xf32>
    %49 = arith.subf %43, %48 : vector<32x32xf32>
    %50 = arith.mulf %49, %46 : vector<32x32xf32>
    %cst_21 = arith.constant 7.93650805E-4 : f32
    %51 = vector.broadcast %cst_21 : f32 to vector<32x32xf32>
    %52 = arith.mulf %47, %51 : vector<32x32xf32>
    %cst_22 = arith.constant 0.00277777785 : f32
    %53 = vector.broadcast %cst_22 : f32 to vector<32x32xf32>
    %54 = arith.subf %53, %52 : vector<32x32xf32>
    %55 = arith.mulf %47, %54 : vector<32x32xf32>
    %cst_23 = arith.constant 0.0833333358 : f32
    %56 = vector.broadcast %cst_23 : f32 to vector<32x32xf32>
    %57 = arith.subf %56, %55 : vector<32x32xf32>
    %58 = arith.mulf %45, %57 : vector<32x32xf32>
    %59 = arith.addf %50, %58 : vector<32x32xf32>
    %cst_24 = arith.constant 8.000000e+00 : f32
    %60 = vector.broadcast %cst_24 : f32 to vector<32x32xf32>
    %61 = arith.addf %2, %60 : vector<32x32xf32>
    %cst_25 = arith.constant 1.000000e+00 : f32
    %62 = vector.broadcast %cst_25 : f32 to vector<32x32xf32>
    %63 = arith.divf %62, %61 : vector<32x32xf32>
    %64 = math.log %61 : vector<32x32xf32>
    %65 = arith.mulf %63, %63 : vector<32x32xf32>
    %cst_26 = arith.constant 5.000000e-01 : f32
    %66 = vector.broadcast %cst_26 : f32 to vector<32x32xf32>
    %67 = arith.subf %61, %66 : vector<32x32xf32>
    %68 = arith.mulf %67, %64 : vector<32x32xf32>
    %cst_27 = arith.constant 7.93650805E-4 : f32
    %69 = vector.broadcast %cst_27 : f32 to vector<32x32xf32>
    %70 = arith.mulf %65, %69 : vector<32x32xf32>
    %cst_28 = arith.constant 0.00277777785 : f32
    %71 = vector.broadcast %cst_28 : f32 to vector<32x32xf32>
    %72 = arith.subf %71, %70 : vector<32x32xf32>
    %73 = arith.mulf %65, %72 : vector<32x32xf32>
    %cst_29 = arith.constant 0.0833333358 : f32
    %74 = vector.broadcast %cst_29 : f32 to vector<32x32xf32>
    %75 = arith.subf %74, %73 : vector<32x32xf32>
    %76 = arith.mulf %63, %75 : vector<32x32xf32>
    %77 = arith.addf %68, %76 : vector<32x32xf32>
    %cst_30 = arith.constant 8.000000e+00 : f32
    %78 = vector.broadcast %cst_30 : f32 to vector<32x32xf32>
    %79 = arith.addf %3, %78 : vector<32x32xf32>
    %cst_31 = arith.constant 1.000000e+00 : f32
    %80 = vector.broadcast %cst_31 : f32 to vector<32x32xf32>
    %81 = arith.divf %80, %79 : vector<32x32xf32>
    %82 = math.log %79 : vector<32x32xf32>
    %83 = arith.mulf %81, %81 : vector<32x32xf32>
    %cst_32 = arith.constant 5.000000e-01 : f32
    %84 = vector.broadcast %cst_32 : f32 to vector<32x32xf32>
    %85 = arith.subf %79, %84 : vector<32x32xf32>
    %86 = arith.mulf %85, %82 : vector<32x32xf32>
    %cst_33 = arith.constant 7.93650805E-4 : f32
    %87 = vector.broadcast %cst_33 : f32 to vector<32x32xf32>
    %88 = arith.mulf %83, %87 : vector<32x32xf32>
    %cst_34 = arith.constant 0.00277777785 : f32
    %89 = vector.broadcast %cst_34 : f32 to vector<32x32xf32>
    %90 = arith.subf %89, %88 : vector<32x32xf32>
    %91 = arith.mulf %83, %90 : vector<32x32xf32>
    %cst_35 = arith.constant 0.0833333358 : f32
    %92 = vector.broadcast %cst_35 : f32 to vector<32x32xf32>
    %93 = arith.subf %92, %91 : vector<32x32xf32>
    %94 = arith.mulf %81, %93 : vector<32x32xf32>
    %95 = arith.addf %86, %94 : vector<32x32xf32>
    %cst_36 = arith.constant 8.000000e+00 : f32
    %96 = vector.broadcast %cst_36 : f32 to vector<32x32xf32>
    %97 = arith.addf %5, %96 : vector<32x32xf32>
    %cst_37 = arith.constant 1.000000e+00 : f32
    %98 = vector.broadcast %cst_37 : f32 to vector<32x32xf32>
    %99 = arith.divf %98, %97 : vector<32x32xf32>
    %100 = math.log %97 : vector<32x32xf32>
    %101 = arith.mulf %99, %99 : vector<32x32xf32>
    %cst_38 = arith.constant 5.000000e-01 : f32
    %102 = vector.broadcast %cst_38 : f32 to vector<32x32xf32>
    %103 = arith.subf %97, %102 : vector<32x32xf32>
    %104 = arith.mulf %103, %100 : vector<32x32xf32>
    %cst_39 = arith.constant 7.93650805E-4 : f32
    %105 = vector.broadcast %cst_39 : f32 to vector<32x32xf32>
    %106 = arith.mulf %101, %105 : vector<32x32xf32>
    %cst_40 = arith.constant 0.00277777785 : f32
    %107 = vector.broadcast %cst_40 : f32 to vector<32x32xf32>
    %108 = arith.subf %107, %106 : vector<32x32xf32>
    %109 = arith.mulf %101, %108 : vector<32x32xf32>
    %cst_41 = arith.constant 0.0833333358 : f32
    %110 = vector.broadcast %cst_41 : f32 to vector<32x32xf32>
    %111 = arith.subf %110, %109 : vector<32x32xf32>
    %112 = arith.mulf %99, %111 : vector<32x32xf32>
    %113 = arith.addf %104, %112 : vector<32x32xf32>
    %cst_42 = arith.constant 1.000000e+00 : f32
    %114 = vector.broadcast %cst_42 : f32 to vector<32x32xf32>
    %115 = arith.addf %0, %114 : vector<32x32xf32>
    %cst_43 = arith.constant 2.000000e+00 : f32
    %116 = vector.broadcast %cst_43 : f32 to vector<32x32xf32>
    %117 = arith.addf %0, %116 : vector<32x32xf32>
    %cst_44 = arith.constant 3.000000e+00 : f32
    %118 = vector.broadcast %cst_44 : f32 to vector<32x32xf32>
    %119 = arith.addf %0, %118 : vector<32x32xf32>
    %cst_45 = arith.constant 4.000000e+00 : f32
    %120 = vector.broadcast %cst_45 : f32 to vector<32x32xf32>
    %121 = arith.addf %0, %120 : vector<32x32xf32>
    %cst_46 = arith.constant 5.000000e+00 : f32
    %122 = vector.broadcast %cst_46 : f32 to vector<32x32xf32>
    %123 = arith.addf %0, %122 : vector<32x32xf32>
    %cst_47 = arith.constant 6.000000e+00 : f32
    %124 = vector.broadcast %cst_47 : f32 to vector<32x32xf32>
    %125 = arith.addf %0, %124 : vector<32x32xf32>
    %cst_48 = arith.constant 7.000000e+00 : f32
    %126 = vector.broadcast %cst_48 : f32 to vector<32x32xf32>
    %127 = arith.addf %0, %126 : vector<32x32xf32>
    %128 = arith.mulf %0, %115 : vector<32x32xf32>
    %129 = arith.addf %0, %115 : vector<32x32xf32>
    %130 = arith.mulf %117, %119 : vector<32x32xf32>
    %131 = arith.addf %117, %119 : vector<32x32xf32>
    %132 = arith.mulf %121, %123 : vector<32x32xf32>
    %133 = arith.addf %121, %123 : vector<32x32xf32>
    %134 = arith.mulf %125, %127 : vector<32x32xf32>
    %135 = arith.addf %125, %127 : vector<32x32xf32>
    %136 = arith.mulf %128, %130 : vector<32x32xf32>
    %137 = arith.mulf %129, %130 : vector<32x32xf32>
    %138 = arith.mulf %131, %128 : vector<32x32xf32>
    %139 = arith.addf %137, %138 : vector<32x32xf32>
    %140 = arith.mulf %132, %134 : vector<32x32xf32>
    %141 = arith.mulf %133, %134 : vector<32x32xf32>
    %142 = arith.mulf %135, %132 : vector<32x32xf32>
    %143 = arith.addf %141, %142 : vector<32x32xf32>
    %144 = arith.mulf %136, %140 : vector<32x32xf32>
    %145 = arith.mulf %139, %140 : vector<32x32xf32>
    %146 = arith.mulf %143, %136 : vector<32x32xf32>
    %147 = arith.addf %145, %146 : vector<32x32xf32>
    %cst_49 = arith.constant 1.000000e+00 : f32
    %148 = vector.broadcast %cst_49 : f32 to vector<32x32xf32>
    %149 = arith.addf %1, %148 : vector<32x32xf32>
    %cst_50 = arith.constant 2.000000e+00 : f32
    %150 = vector.broadcast %cst_50 : f32 to vector<32x32xf32>
    %151 = arith.addf %1, %150 : vector<32x32xf32>
    %cst_51 = arith.constant 3.000000e+00 : f32
    %152 = vector.broadcast %cst_51 : f32 to vector<32x32xf32>
    %153 = arith.addf %1, %152 : vector<32x32xf32>
    %cst_52 = arith.constant 4.000000e+00 : f32
    %154 = vector.broadcast %cst_52 : f32 to vector<32x32xf32>
    %155 = arith.addf %1, %154 : vector<32x32xf32>
    %cst_53 = arith.constant 5.000000e+00 : f32
    %156 = vector.broadcast %cst_53 : f32 to vector<32x32xf32>
    %157 = arith.addf %1, %156 : vector<32x32xf32>
    %cst_54 = arith.constant 6.000000e+00 : f32
    %158 = vector.broadcast %cst_54 : f32 to vector<32x32xf32>
    %159 = arith.addf %1, %158 : vector<32x32xf32>
    %cst_55 = arith.constant 7.000000e+00 : f32
    %160 = vector.broadcast %cst_55 : f32 to vector<32x32xf32>
    %161 = arith.addf %1, %160 : vector<32x32xf32>
    %162 = arith.mulf %1, %149 : vector<32x32xf32>
    %163 = arith.addf %1, %149 : vector<32x32xf32>
    %164 = arith.mulf %151, %153 : vector<32x32xf32>
    %165 = arith.addf %151, %153 : vector<32x32xf32>
    %166 = arith.mulf %155, %157 : vector<32x32xf32>
    %167 = arith.addf %155, %157 : vector<32x32xf32>
    %168 = arith.mulf %159, %161 : vector<32x32xf32>
    %169 = arith.addf %159, %161 : vector<32x32xf32>
    %170 = arith.mulf %162, %164 : vector<32x32xf32>
    %171 = arith.mulf %163, %164 : vector<32x32xf32>
    %172 = arith.mulf %165, %162 : vector<32x32xf32>
    %173 = arith.addf %171, %172 : vector<32x32xf32>
    %174 = arith.mulf %166, %168 : vector<32x32xf32>
    %175 = arith.mulf %167, %168 : vector<32x32xf32>
    %176 = arith.mulf %169, %166 : vector<32x32xf32>
    %177 = arith.addf %175, %176 : vector<32x32xf32>
    %178 = arith.mulf %170, %174 : vector<32x32xf32>
    %179 = arith.mulf %173, %174 : vector<32x32xf32>
    %180 = arith.mulf %177, %170 : vector<32x32xf32>
    %181 = arith.addf %179, %180 : vector<32x32xf32>
    %cst_56 = arith.constant 1.000000e+00 : f32
    %182 = vector.broadcast %cst_56 : f32 to vector<32x32xf32>
    %183 = arith.addf %4, %182 : vector<32x32xf32>
    %cst_57 = arith.constant 2.000000e+00 : f32
    %184 = vector.broadcast %cst_57 : f32 to vector<32x32xf32>
    %185 = arith.addf %4, %184 : vector<32x32xf32>
    %cst_58 = arith.constant 3.000000e+00 : f32
    %186 = vector.broadcast %cst_58 : f32 to vector<32x32xf32>
    %187 = arith.addf %4, %186 : vector<32x32xf32>
    %cst_59 = arith.constant 4.000000e+00 : f32
    %188 = vector.broadcast %cst_59 : f32 to vector<32x32xf32>
    %189 = arith.addf %4, %188 : vector<32x32xf32>
    %cst_60 = arith.constant 5.000000e+00 : f32
    %190 = vector.broadcast %cst_60 : f32 to vector<32x32xf32>
    %191 = arith.addf %4, %190 : vector<32x32xf32>
    %cst_61 = arith.constant 6.000000e+00 : f32
    %192 = vector.broadcast %cst_61 : f32 to vector<32x32xf32>
    %193 = arith.addf %4, %192 : vector<32x32xf32>
    %cst_62 = arith.constant 7.000000e+00 : f32
    %194 = vector.broadcast %cst_62 : f32 to vector<32x32xf32>
    %195 = arith.addf %4, %194 : vector<32x32xf32>
    %196 = arith.mulf %4, %183 : vector<32x32xf32>
    %197 = arith.addf %4, %183 : vector<32x32xf32>
    %198 = arith.mulf %185, %187 : vector<32x32xf32>
    %199 = arith.addf %185, %187 : vector<32x32xf32>
    %200 = arith.mulf %189, %191 : vector<32x32xf32>
    %201 = arith.addf %189, %191 : vector<32x32xf32>
    %202 = arith.mulf %193, %195 : vector<32x32xf32>
    %203 = arith.addf %193, %195 : vector<32x32xf32>
    %204 = arith.mulf %196, %198 : vector<32x32xf32>
    %205 = arith.mulf %197, %198 : vector<32x32xf32>
    %206 = arith.mulf %199, %196 : vector<32x32xf32>
    %207 = arith.addf %205, %206 : vector<32x32xf32>
    %208 = arith.mulf %200, %202 : vector<32x32xf32>
    %209 = arith.mulf %201, %202 : vector<32x32xf32>
    %210 = arith.mulf %203, %200 : vector<32x32xf32>
    %211 = arith.addf %209, %210 : vector<32x32xf32>
    %212 = arith.mulf %204, %208 : vector<32x32xf32>
    %213 = arith.mulf %207, %208 : vector<32x32xf32>
    %214 = arith.mulf %211, %204 : vector<32x32xf32>
    %215 = arith.addf %213, %214 : vector<32x32xf32>
    %cst_63 = arith.constant 1.000000e+00 : f32
    %216 = vector.broadcast %cst_63 : f32 to vector<32x32xf32>
    %217 = arith.addf %2, %216 : vector<32x32xf32>
    %218 = arith.mulf %2, %217 : vector<32x32xf32>
    %cst_64 = arith.constant 2.000000e+00 : f32
    %219 = vector.broadcast %cst_64 : f32 to vector<32x32xf32>
    %220 = arith.addf %2, %219 : vector<32x32xf32>
    %cst_65 = arith.constant 3.000000e+00 : f32
    %221 = vector.broadcast %cst_65 : f32 to vector<32x32xf32>
    %222 = arith.addf %2, %221 : vector<32x32xf32>
    %223 = arith.mulf %220, %222 : vector<32x32xf32>
    %224 = arith.mulf %218, %223 : vector<32x32xf32>
    %cst_66 = arith.constant 4.000000e+00 : f32
    %225 = vector.broadcast %cst_66 : f32 to vector<32x32xf32>
    %226 = arith.addf %2, %225 : vector<32x32xf32>
    %cst_67 = arith.constant 5.000000e+00 : f32
    %227 = vector.broadcast %cst_67 : f32 to vector<32x32xf32>
    %228 = arith.addf %2, %227 : vector<32x32xf32>
    %229 = arith.mulf %226, %228 : vector<32x32xf32>
    %cst_68 = arith.constant 6.000000e+00 : f32
    %230 = vector.broadcast %cst_68 : f32 to vector<32x32xf32>
    %231 = arith.addf %2, %230 : vector<32x32xf32>
    %cst_69 = arith.constant 7.000000e+00 : f32
    %232 = vector.broadcast %cst_69 : f32 to vector<32x32xf32>
    %233 = arith.addf %2, %232 : vector<32x32xf32>
    %234 = arith.mulf %231, %233 : vector<32x32xf32>
    %235 = arith.mulf %229, %234 : vector<32x32xf32>
    %236 = arith.mulf %224, %235 : vector<32x32xf32>
    %cst_70 = arith.constant 1.000000e+00 : f32
    %237 = vector.broadcast %cst_70 : f32 to vector<32x32xf32>
    %238 = arith.addf %3, %237 : vector<32x32xf32>
    %239 = arith.mulf %3, %238 : vector<32x32xf32>
    %cst_71 = arith.constant 2.000000e+00 : f32
    %240 = vector.broadcast %cst_71 : f32 to vector<32x32xf32>
    %241 = arith.addf %3, %240 : vector<32x32xf32>
    %cst_72 = arith.constant 3.000000e+00 : f32
    %242 = vector.broadcast %cst_72 : f32 to vector<32x32xf32>
    %243 = arith.addf %3, %242 : vector<32x32xf32>
    %244 = arith.mulf %241, %243 : vector<32x32xf32>
    %245 = arith.mulf %239, %244 : vector<32x32xf32>
    %cst_73 = arith.constant 4.000000e+00 : f32
    %246 = vector.broadcast %cst_73 : f32 to vector<32x32xf32>
    %247 = arith.addf %3, %246 : vector<32x32xf32>
    %cst_74 = arith.constant 5.000000e+00 : f32
    %248 = vector.broadcast %cst_74 : f32 to vector<32x32xf32>
    %249 = arith.addf %3, %248 : vector<32x32xf32>
    %250 = arith.mulf %247, %249 : vector<32x32xf32>
    %cst_75 = arith.constant 6.000000e+00 : f32
    %251 = vector.broadcast %cst_75 : f32 to vector<32x32xf32>
    %252 = arith.addf %3, %251 : vector<32x32xf32>
    %cst_76 = arith.constant 7.000000e+00 : f32
    %253 = vector.broadcast %cst_76 : f32 to vector<32x32xf32>
    %254 = arith.addf %3, %253 : vector<32x32xf32>
    %255 = arith.mulf %252, %254 : vector<32x32xf32>
    %256 = arith.mulf %250, %255 : vector<32x32xf32>
    %257 = arith.mulf %245, %256 : vector<32x32xf32>
    %cst_77 = arith.constant 1.000000e+00 : f32
    %258 = vector.broadcast %cst_77 : f32 to vector<32x32xf32>
    %259 = arith.addf %5, %258 : vector<32x32xf32>
    %260 = arith.mulf %5, %259 : vector<32x32xf32>
    %cst_78 = arith.constant 2.000000e+00 : f32
    %261 = vector.broadcast %cst_78 : f32 to vector<32x32xf32>
    %262 = arith.addf %5, %261 : vector<32x32xf32>
    %cst_79 = arith.constant 3.000000e+00 : f32
    %263 = vector.broadcast %cst_79 : f32 to vector<32x32xf32>
    %264 = arith.addf %5, %263 : vector<32x32xf32>
    %265 = arith.mulf %262, %264 : vector<32x32xf32>
    %266 = arith.mulf %260, %265 : vector<32x32xf32>
    %cst_80 = arith.constant 4.000000e+00 : f32
    %267 = vector.broadcast %cst_80 : f32 to vector<32x32xf32>
    %268 = arith.addf %5, %267 : vector<32x32xf32>
    %cst_81 = arith.constant 5.000000e+00 : f32
    %269 = vector.broadcast %cst_81 : f32 to vector<32x32xf32>
    %270 = arith.addf %5, %269 : vector<32x32xf32>
    %271 = arith.mulf %268, %270 : vector<32x32xf32>
    %cst_82 = arith.constant 6.000000e+00 : f32
    %272 = vector.broadcast %cst_82 : f32 to vector<32x32xf32>
    %273 = arith.addf %5, %272 : vector<32x32xf32>
    %cst_83 = arith.constant 7.000000e+00 : f32
    %274 = vector.broadcast %cst_83 : f32 to vector<32x32xf32>
    %275 = arith.addf %5, %274 : vector<32x32xf32>
    %276 = arith.mulf %273, %275 : vector<32x32xf32>
    %277 = arith.mulf %271, %276 : vector<32x32xf32>
    %278 = arith.mulf %266, %277 : vector<32x32xf32>
    %cst_84 = arith.constant 5.000000e-01 : f32
    %279 = vector.broadcast %cst_84 : f32 to vector<32x32xf32>
    %280 = arith.mulf %279, %9 : vector<32x32xf32>
    %281 = arith.subf %10, %280 : vector<32x32xf32>
    %cst_85 = arith.constant 0.0039682542 : f32
    %282 = vector.broadcast %cst_85 : f32 to vector<32x32xf32>
    %283 = arith.mulf %11, %282 : vector<32x32xf32>
    %cst_86 = arith.constant 0.00833333377 : f32
    %284 = vector.broadcast %cst_86 : f32 to vector<32x32xf32>
    %285 = arith.subf %284, %283 : vector<32x32xf32>
    %286 = arith.mulf %11, %285 : vector<32x32xf32>
    %cst_87 = arith.constant 0.0833333358 : f32
    %287 = vector.broadcast %cst_87 : f32 to vector<32x32xf32>
    %288 = arith.subf %287, %286 : vector<32x32xf32>
    %289 = arith.mulf %11, %288 : vector<32x32xf32>
    %290 = arith.subf %281, %289 : vector<32x32xf32>
    %291 = arith.divf %147, %144 : vector<32x32xf32>
    %292 = arith.subf %290, %291 : vector<32x32xf32>
    %cst_88 = arith.constant 5.000000e-01 : f32
    %293 = vector.broadcast %cst_88 : f32 to vector<32x32xf32>
    %294 = arith.mulf %293, %27 : vector<32x32xf32>
    %295 = arith.subf %28, %294 : vector<32x32xf32>
    %cst_89 = arith.constant 0.0039682542 : f32
    %296 = vector.broadcast %cst_89 : f32 to vector<32x32xf32>
    %297 = arith.mulf %29, %296 : vector<32x32xf32>
    %cst_90 = arith.constant 0.00833333377 : f32
    %298 = vector.broadcast %cst_90 : f32 to vector<32x32xf32>
    %299 = arith.subf %298, %297 : vector<32x32xf32>
    %300 = arith.mulf %29, %299 : vector<32x32xf32>
    %cst_91 = arith.constant 0.0833333358 : f32
    %301 = vector.broadcast %cst_91 : f32 to vector<32x32xf32>
    %302 = arith.subf %301, %300 : vector<32x32xf32>
    %303 = arith.mulf %29, %302 : vector<32x32xf32>
    %304 = arith.subf %295, %303 : vector<32x32xf32>
    %305 = arith.divf %181, %178 : vector<32x32xf32>
    %306 = arith.subf %304, %305 : vector<32x32xf32>
    %cst_92 = arith.constant 5.000000e-01 : f32
    %307 = vector.broadcast %cst_92 : f32 to vector<32x32xf32>
    %308 = arith.mulf %307, %45 : vector<32x32xf32>
    %309 = arith.subf %46, %308 : vector<32x32xf32>
    %cst_93 = arith.constant 0.0039682542 : f32
    %310 = vector.broadcast %cst_93 : f32 to vector<32x32xf32>
    %311 = arith.mulf %47, %310 : vector<32x32xf32>
    %cst_94 = arith.constant 0.00833333377 : f32
    %312 = vector.broadcast %cst_94 : f32 to vector<32x32xf32>
    %313 = arith.subf %312, %311 : vector<32x32xf32>
    %314 = arith.mulf %47, %313 : vector<32x32xf32>
    %cst_95 = arith.constant 0.0833333358 : f32
    %315 = vector.broadcast %cst_95 : f32 to vector<32x32xf32>
    %316 = arith.subf %315, %314 : vector<32x32xf32>
    %317 = arith.mulf %47, %316 : vector<32x32xf32>
    %318 = arith.subf %309, %317 : vector<32x32xf32>
    %319 = arith.divf %215, %212 : vector<32x32xf32>
    %320 = arith.subf %318, %319 : vector<32x32xf32>
    %321 = arith.addf %77, %95 : vector<32x32xf32>
    %322 = arith.subf %321, %113 : vector<32x32xf32>
    %323 = arith.addf %23, %41 : vector<32x32xf32>
    %324 = arith.subf %323, %59 : vector<32x32xf32>
    %325 = arith.subf %322, %324 : vector<32x32xf32>
    %326 = arith.divf %144, %212 : vector<32x32xf32>
    %327 = arith.mulf %326, %178 : vector<32x32xf32>
    %328 = arith.divf %236, %278 : vector<32x32xf32>
    %329 = arith.mulf %328, %257 : vector<32x32xf32>
    %330 = arith.divf %327, %329 : vector<32x32xf32>
    %331 = math.log %330 : vector<32x32xf32>
    %332 = arith.addf %325, %331 : vector<32x32xf32>
    %333 = arith.subf %0, %2 : vector<32x32xf32>
    %334 = arith.mulf %333, %292 : vector<32x32xf32>
    %335 = arith.addf %332, %334 : vector<32x32xf32>
    %336 = arith.subf %1, %3 : vector<32x32xf32>
    %337 = arith.mulf %336, %306 : vector<32x32xf32>
    %338 = arith.addf %335, %337 : vector<32x32xf32>
    %339 = arith.subf %2, %0 : vector<32x32xf32>
    %340 = arith.subf %3, %1 : vector<32x32xf32>
    %341 = arith.addf %339, %340 : vector<32x32xf32>
    %342 = arith.mulf %341, %320 : vector<32x32xf32>
    %343 = arith.addf %338, %342 : vector<32x32xf32>
    %344 = math.absf %343 : vector<32x32xf32>
    %cst_96 = arith.constant dense<0.000000e+00> : vector<32xf32>
    %345 = vector.multi_reduction <add>, %344, %cst_96 [1] : vector<32x32xf32> to vector<32xf32>
    %346 = vector.shape_cast %345 : vector<32xf32> to vector<32x1xf32>
    %cst_97 = arith.constant 2.000000e+00 : f32
    %347 = vector.broadcast %cst_97 : f32 to vector<32x1xf32>
    %348 = arith.subf %346, %347 : vector<32x1xf32>
    %cst_98 = arith.constant -1.000000e+00 : f32
    %349 = vector.broadcast %cst_98 : f32 to vector<32x1xf32>
    %350 = arith.mulf %349, %348 : vector<32x1xf32>
    %cst_99 = arith.constant 0.000000e+00 : f32
    %351 = vector.broadcast %cst_99 : f32 to vector<32x1xf32>
    %352 = arith.maximumf %350, %351 : vector<32x1xf32>
    %353 = math.absf %350 : vector<32x1xf32>
    %cst_100 = arith.constant 0.000000e+00 : f32
    %354 = vector.broadcast %cst_100 : f32 to vector<32x1xf32>
    %355 = arith.subf %354, %353 : vector<32x1xf32>
    %356 = math.exp %355 : vector<32x1xf32>
    %cst_101 = arith.constant 1.000000e+00 : f32
    %357 = vector.broadcast %cst_101 : f32 to vector<32x1xf32>
    %358 = arith.addf %357, %356 : vector<32x1xf32>
    %359 = math.log %358 : vector<32x1xf32>
    %360 = arith.addf %352, %359 : vector<32x1xf32>
    %c0_102 = arith.constant 0 : index
    %c0_103 = arith.constant 0 : index
    %361 = vector.load %arg5[%c0_102, %c0_103] : memref<32x1xf32, #tpu.memory_space<vmem>>, vector<32x1xf32>
    tpu.vector_store %arg5[%c0_102, %c0_103], %360 {strides = array<i32>} : memref<32x1xf32, #tpu.memory_space<vmem>>, vector<32x1xf32>,
    return
  }
  func.func @transform_0(%arg0: i32) -> (i32, i32) {
    %c0_i32 = arith.constant 0 : i32
    %c0_i32_0 = arith.constant 0 : i32
    return %arg0, %c0_i32 : i32, i32
  }
  func.func @transform_1(%arg0: i32) -> (i32, i32) {
    %c0_i32 = arith.constant 0 : i32
    %c0_i32_0 = arith.constant 0 : i32
    return %arg0, %c0_i32 : i32, i32
  }
  func.func @transform_2(%arg0: i32) -> (i32, i32) {
    %c0_i32 = arith.constant 0 : i32
    %c0_i32_0 = arith.constant 0 : i32
    return %arg0, %c0_i32 : i32, i32
  }
  func.func @transform_3(%arg0: i32) -> (i32, i32) {
    %c0_i32 = arith.constant 0 : i32
    %c0_i32_0 = arith.constant 0 : i32
    return %arg0, %c0_i32 : i32, i32
  }
  func.func @transform_4(%arg0: i32) -> (i32, i32) {
    %c0_i32 = arith.constant 0 : i32
    %c0_i32_0 = arith.constant 0 : i32
    return %arg0, %c0_i32 : i32, i32
  }
}

module attributes {stable_mosaic.version = 11 : i64} {
  func.func @_row_loss_kernel(%arg0: i32, %arg1: memref<8x32xf32, #tpu.memory_space<vmem>>, %arg2: memref<8x32xf32, #tpu.memory_space<vmem>>, %arg3: memref<8x32xf32, #tpu.memory_space<vmem>>, %arg4: memref<8x32xf32, #tpu.memory_space<vmem>>, %arg5: memref<8x1xf32, #tpu.memory_space<vmem>>) attributes {dimension_semantics = [#tpu.dimension_semantics<parallel>], iteration_bounds = array<i64: 1>, scalar_prefetch = 0 : i64, scratch_operands = 0 : i64, tpu.core_type = #tpu.core_type<tc>, window_params = [{transform_indices = @transform_0, window_bounds = array<i64: 8, 32>}, {transform_indices = @transform_1, window_bounds = array<i64: 8, 32>}, {transform_indices = @transform_2, window_bounds = array<i64: 8, 32>}, {transform_indices = @transform_3, window_bounds = array<i64: 8, 32>}, {transform_indices = @transform_4, window_bounds = array<i64: 8, 1>}]} {
    %c0 = arith.constant 0 : index
    %c0_0 = arith.constant 0 : index
    %0 = vector.load %arg1[%c0, %c0_0] : memref<8x32xf32, #tpu.memory_space<vmem>>, vector<8x32xf32>
    %c0_1 = arith.constant 0 : index
    %c0_2 = arith.constant 0 : index
    %1 = vector.load %arg2[%c0_1, %c0_2] : memref<8x32xf32, #tpu.memory_space<vmem>>, vector<8x32xf32>
    %c0_3 = arith.constant 0 : index
    %c0_4 = arith.constant 0 : index
    %2 = vector.load %arg3[%c0_3, %c0_4] : memref<8x32xf32, #tpu.memory_space<vmem>>, vector<8x32xf32>
    %c0_5 = arith.constant 0 : index
    %c0_6 = arith.constant 0 : index
    %3 = vector.load %arg4[%c0_5, %c0_6] : memref<8x32xf32, #tpu.memory_space<vmem>>, vector<8x32xf32>
    %4 = arith.addf %0, %1 : vector<8x32xf32>
    %5 = arith.addf %2, %3 : vector<8x32xf32>
    %cst = arith.constant 8.000000e+00 : f32
    %6 = vector.broadcast %cst : f32 to vector<8x32xf32>
    %7 = arith.addf %0, %6 : vector<8x32xf32>
    %cst_7 = arith.constant 1.000000e+00 : f32
    %8 = vector.broadcast %cst_7 : f32 to vector<8x32xf32>
    %9 = arith.divf %8, %7 : vector<8x32xf32>
    %10 = math.log %7 : vector<8x32xf32>
    %11 = arith.mulf %9, %9 : vector<8x32xf32>
    %cst_8 = arith.constant 5.000000e-01 : f32
    %12 = vector.broadcast %cst_8 : f32 to vector<8x32xf32>
    %13 = arith.subf %7, %12 : vector<8x32xf32>
    %14 = arith.mulf %13, %10 : vector<8x32xf32>
    %cst_9 = arith.constant 7.93650805E-4 : f32
    %15 = vector.broadcast %cst_9 : f32 to vector<8x32xf32>
    %16 = arith.mulf %11, %15 : vector<8x32xf32>
    %cst_10 = arith.constant 0.00277777785 : f32
    %17 = vector.broadcast %cst_10 : f32 to vector<8x32xf32>
    %18 = arith.subf %17, %16 : vector<8x32xf32>
    %19 = arith.mulf %11, %18 : vector<8x32xf32>
    %cst_11 = arith.constant 0.0833333358 : f32
    %20 = vector.broadcast %cst_11 : f32 to vector<8x32xf32>
    %21 = arith.subf %20, %19 : vector<8x32xf32>
    %22 = arith.mulf %9, %21 : vector<8x32xf32>
    %23 = arith.addf %14, %22 : vector<8x32xf32>
    %cst_12 = arith.constant 8.000000e+00 : f32
    %24 = vector.broadcast %cst_12 : f32 to vector<8x32xf32>
    %25 = arith.addf %1, %24 : vector<8x32xf32>
    %cst_13 = arith.constant 1.000000e+00 : f32
    %26 = vector.broadcast %cst_13 : f32 to vector<8x32xf32>
    %27 = arith.divf %26, %25 : vector<8x32xf32>
    %28 = math.log %25 : vector<8x32xf32>
    %29 = arith.mulf %27, %27 : vector<8x32xf32>
    %cst_14 = arith.constant 5.000000e-01 : f32
    %30 = vector.broadcast %cst_14 : f32 to vector<8x32xf32>
    %31 = arith.subf %25, %30 : vector<8x32xf32>
    %32 = arith.mulf %31, %28 : vector<8x32xf32>
    %cst_15 = arith.constant 7.93650805E-4 : f32
    %33 = vector.broadcast %cst_15 : f32 to vector<8x32xf32>
    %34 = arith.mulf %29, %33 : vector<8x32xf32>
    %cst_16 = arith.constant 0.00277777785 : f32
    %35 = vector.broadcast %cst_16 : f32 to vector<8x32xf32>
    %36 = arith.subf %35, %34 : vector<8x32xf32>
    %37 = arith.mulf %29, %36 : vector<8x32xf32>
    %cst_17 = arith.constant 0.0833333358 : f32
    %38 = vector.broadcast %cst_17 : f32 to vector<8x32xf32>
    %39 = arith.subf %38, %37 : vector<8x32xf32>
    %40 = arith.mulf %27, %39 : vector<8x32xf32>
    %41 = arith.addf %32, %40 : vector<8x32xf32>
    %cst_18 = arith.constant 8.000000e+00 : f32
    %42 = vector.broadcast %cst_18 : f32 to vector<8x32xf32>
    %43 = arith.addf %4, %42 : vector<8x32xf32>
    %cst_19 = arith.constant 1.000000e+00 : f32
    %44 = vector.broadcast %cst_19 : f32 to vector<8x32xf32>
    %45 = arith.divf %44, %43 : vector<8x32xf32>
    %46 = math.log %43 : vector<8x32xf32>
    %47 = arith.mulf %45, %45 : vector<8x32xf32>
    %cst_20 = arith.constant 5.000000e-01 : f32
    %48 = vector.broadcast %cst_20 : f32 to vector<8x32xf32>
    %49 = arith.subf %43, %48 : vector<8x32xf32>
    %50 = arith.mulf %49, %46 : vector<8x32xf32>
    %cst_21 = arith.constant 7.93650805E-4 : f32
    %51 = vector.broadcast %cst_21 : f32 to vector<8x32xf32>
    %52 = arith.mulf %47, %51 : vector<8x32xf32>
    %cst_22 = arith.constant 0.00277777785 : f32
    %53 = vector.broadcast %cst_22 : f32 to vector<8x32xf32>
    %54 = arith.subf %53, %52 : vector<8x32xf32>
    %55 = arith.mulf %47, %54 : vector<8x32xf32>
    %cst_23 = arith.constant 0.0833333358 : f32
    %56 = vector.broadcast %cst_23 : f32 to vector<8x32xf32>
    %57 = arith.subf %56, %55 : vector<8x32xf32>
    %58 = arith.mulf %45, %57 : vector<8x32xf32>
    %59 = arith.addf %50, %58 : vector<8x32xf32>
    %cst_24 = arith.constant 8.000000e+00 : f32
    %60 = vector.broadcast %cst_24 : f32 to vector<8x32xf32>
    %61 = arith.addf %2, %60 : vector<8x32xf32>
    %cst_25 = arith.constant 1.000000e+00 : f32
    %62 = vector.broadcast %cst_25 : f32 to vector<8x32xf32>
    %63 = arith.divf %62, %61 : vector<8x32xf32>
    %64 = math.log %61 : vector<8x32xf32>
    %65 = arith.mulf %63, %63 : vector<8x32xf32>
    %cst_26 = arith.constant 5.000000e-01 : f32
    %66 = vector.broadcast %cst_26 : f32 to vector<8x32xf32>
    %67 = arith.subf %61, %66 : vector<8x32xf32>
    %68 = arith.mulf %67, %64 : vector<8x32xf32>
    %cst_27 = arith.constant 7.93650805E-4 : f32
    %69 = vector.broadcast %cst_27 : f32 to vector<8x32xf32>
    %70 = arith.mulf %65, %69 : vector<8x32xf32>
    %cst_28 = arith.constant 0.00277777785 : f32
    %71 = vector.broadcast %cst_28 : f32 to vector<8x32xf32>
    %72 = arith.subf %71, %70 : vector<8x32xf32>
    %73 = arith.mulf %65, %72 : vector<8x32xf32>
    %cst_29 = arith.constant 0.0833333358 : f32
    %74 = vector.broadcast %cst_29 : f32 to vector<8x32xf32>
    %75 = arith.subf %74, %73 : vector<8x32xf32>
    %76 = arith.mulf %63, %75 : vector<8x32xf32>
    %77 = arith.addf %68, %76 : vector<8x32xf32>
    %cst_30 = arith.constant 8.000000e+00 : f32
    %78 = vector.broadcast %cst_30 : f32 to vector<8x32xf32>
    %79 = arith.addf %3, %78 : vector<8x32xf32>
    %cst_31 = arith.constant 1.000000e+00 : f32
    %80 = vector.broadcast %cst_31 : f32 to vector<8x32xf32>
    %81 = arith.divf %80, %79 : vector<8x32xf32>
    %82 = math.log %79 : vector<8x32xf32>
    %83 = arith.mulf %81, %81 : vector<8x32xf32>
    %cst_32 = arith.constant 5.000000e-01 : f32
    %84 = vector.broadcast %cst_32 : f32 to vector<8x32xf32>
    %85 = arith.subf %79, %84 : vector<8x32xf32>
    %86 = arith.mulf %85, %82 : vector<8x32xf32>
    %cst_33 = arith.constant 7.93650805E-4 : f32
    %87 = vector.broadcast %cst_33 : f32 to vector<8x32xf32>
    %88 = arith.mulf %83, %87 : vector<8x32xf32>
    %cst_34 = arith.constant 0.00277777785 : f32
    %89 = vector.broadcast %cst_34 : f32 to vector<8x32xf32>
    %90 = arith.subf %89, %88 : vector<8x32xf32>
    %91 = arith.mulf %83, %90 : vector<8x32xf32>
    %cst_35 = arith.constant 0.0833333358 : f32
    %92 = vector.broadcast %cst_35 : f32 to vector<8x32xf32>
    %93 = arith.subf %92, %91 : vector<8x32xf32>
    %94 = arith.mulf %81, %93 : vector<8x32xf32>
    %95 = arith.addf %86, %94 : vector<8x32xf32>
    %cst_36 = arith.constant 8.000000e+00 : f32
    %96 = vector.broadcast %cst_36 : f32 to vector<8x32xf32>
    %97 = arith.addf %5, %96 : vector<8x32xf32>
    %cst_37 = arith.constant 1.000000e+00 : f32
    %98 = vector.broadcast %cst_37 : f32 to vector<8x32xf32>
    %99 = arith.divf %98, %97 : vector<8x32xf32>
    %100 = math.log %97 : vector<8x32xf32>
    %101 = arith.mulf %99, %99 : vector<8x32xf32>
    %cst_38 = arith.constant 5.000000e-01 : f32
    %102 = vector.broadcast %cst_38 : f32 to vector<8x32xf32>
    %103 = arith.subf %97, %102 : vector<8x32xf32>
    %104 = arith.mulf %103, %100 : vector<8x32xf32>
    %cst_39 = arith.constant 7.93650805E-4 : f32
    %105 = vector.broadcast %cst_39 : f32 to vector<8x32xf32>
    %106 = arith.mulf %101, %105 : vector<8x32xf32>
    %cst_40 = arith.constant 0.00277777785 : f32
    %107 = vector.broadcast %cst_40 : f32 to vector<8x32xf32>
    %108 = arith.subf %107, %106 : vector<8x32xf32>
    %109 = arith.mulf %101, %108 : vector<8x32xf32>
    %cst_41 = arith.constant 0.0833333358 : f32
    %110 = vector.broadcast %cst_41 : f32 to vector<8x32xf32>
    %111 = arith.subf %110, %109 : vector<8x32xf32>
    %112 = arith.mulf %99, %111 : vector<8x32xf32>
    %113 = arith.addf %104, %112 : vector<8x32xf32>
    %cst_42 = arith.constant 1.000000e+00 : f32
    %114 = vector.broadcast %cst_42 : f32 to vector<8x32xf32>
    %115 = arith.addf %0, %114 : vector<8x32xf32>
    %cst_43 = arith.constant 2.000000e+00 : f32
    %116 = vector.broadcast %cst_43 : f32 to vector<8x32xf32>
    %117 = arith.addf %0, %116 : vector<8x32xf32>
    %cst_44 = arith.constant 3.000000e+00 : f32
    %118 = vector.broadcast %cst_44 : f32 to vector<8x32xf32>
    %119 = arith.addf %0, %118 : vector<8x32xf32>
    %cst_45 = arith.constant 4.000000e+00 : f32
    %120 = vector.broadcast %cst_45 : f32 to vector<8x32xf32>
    %121 = arith.addf %0, %120 : vector<8x32xf32>
    %cst_46 = arith.constant 5.000000e+00 : f32
    %122 = vector.broadcast %cst_46 : f32 to vector<8x32xf32>
    %123 = arith.addf %0, %122 : vector<8x32xf32>
    %cst_47 = arith.constant 6.000000e+00 : f32
    %124 = vector.broadcast %cst_47 : f32 to vector<8x32xf32>
    %125 = arith.addf %0, %124 : vector<8x32xf32>
    %cst_48 = arith.constant 7.000000e+00 : f32
    %126 = vector.broadcast %cst_48 : f32 to vector<8x32xf32>
    %127 = arith.addf %0, %126 : vector<8x32xf32>
    %128 = arith.mulf %0, %115 : vector<8x32xf32>
    %129 = arith.addf %0, %115 : vector<8x32xf32>
    %130 = arith.mulf %117, %119 : vector<8x32xf32>
    %131 = arith.addf %117, %119 : vector<8x32xf32>
    %132 = arith.mulf %121, %123 : vector<8x32xf32>
    %133 = arith.addf %121, %123 : vector<8x32xf32>
    %134 = arith.mulf %125, %127 : vector<8x32xf32>
    %135 = arith.addf %125, %127 : vector<8x32xf32>
    %136 = arith.mulf %128, %130 : vector<8x32xf32>
    %137 = arith.mulf %129, %130 : vector<8x32xf32>
    %138 = arith.mulf %131, %128 : vector<8x32xf32>
    %139 = arith.addf %137, %138 : vector<8x32xf32>
    %140 = arith.mulf %132, %134 : vector<8x32xf32>
    %141 = arith.mulf %133, %134 : vector<8x32xf32>
    %142 = arith.mulf %135, %132 : vector<8x32xf32>
    %143 = arith.addf %141, %142 : vector<8x32xf32>
    %144 = arith.mulf %136, %140 : vector<8x32xf32>
    %145 = arith.mulf %139, %140 : vector<8x32xf32>
    %146 = arith.mulf %143, %136 : vector<8x32xf32>
    %147 = arith.addf %145, %146 : vector<8x32xf32>
    %cst_49 = arith.constant 1.000000e+00 : f32
    %148 = vector.broadcast %cst_49 : f32 to vector<8x32xf32>
    %149 = arith.addf %1, %148 : vector<8x32xf32>
    %cst_50 = arith.constant 2.000000e+00 : f32
    %150 = vector.broadcast %cst_50 : f32 to vector<8x32xf32>
    %151 = arith.addf %1, %150 : vector<8x32xf32>
    %cst_51 = arith.constant 3.000000e+00 : f32
    %152 = vector.broadcast %cst_51 : f32 to vector<8x32xf32>
    %153 = arith.addf %1, %152 : vector<8x32xf32>
    %cst_52 = arith.constant 4.000000e+00 : f32
    %154 = vector.broadcast %cst_52 : f32 to vector<8x32xf32>
    %155 = arith.addf %1, %154 : vector<8x32xf32>
    %cst_53 = arith.constant 5.000000e+00 : f32
    %156 = vector.broadcast %cst_53 : f32 to vector<8x32xf32>
    %157 = arith.addf %1, %156 : vector<8x32xf32>
    %cst_54 = arith.constant 6.000000e+00 : f32
    %158 = vector.broadcast %cst_54 : f32 to vector<8x32xf32>
    %159 = arith.addf %1, %158 : vector<8x32xf32>
    %cst_55 = arith.constant 7.000000e+00 : f32
    %160 = vector.broadcast %cst_55 : f32 to vector<8x32xf32>
    %161 = arith.addf %1, %160 : vector<8x32xf32>
    %162 = arith.mulf %1, %149 : vector<8x32xf32>
    %163 = arith.addf %1, %149 : vector<8x32xf32>
    %164 = arith.mulf %151, %153 : vector<8x32xf32>
    %165 = arith.addf %151, %153 : vector<8x32xf32>
    %166 = arith.mulf %155, %157 : vector<8x32xf32>
    %167 = arith.addf %155, %157 : vector<8x32xf32>
    %168 = arith.mulf %159, %161 : vector<8x32xf32>
    %169 = arith.addf %159, %161 : vector<8x32xf32>
    %170 = arith.mulf %162, %164 : vector<8x32xf32>
    %171 = arith.mulf %163, %164 : vector<8x32xf32>
    %172 = arith.mulf %165, %162 : vector<8x32xf32>
    %173 = arith.addf %171, %172 : vector<8x32xf32>
    %174 = arith.mulf %166, %168 : vector<8x32xf32>
    %175 = arith.mulf %167, %168 : vector<8x32xf32>
    %176 = arith.mulf %169, %166 : vector<8x32xf32>
    %177 = arith.addf %175, %176 : vector<8x32xf32>
    %178 = arith.mulf %170, %174 : vector<8x32xf32>
    %179 = arith.mulf %173, %174 : vector<8x32xf32>
    %180 = arith.mulf %177, %170 : vector<8x32xf32>
    %181 = arith.addf %179, %180 : vector<8x32xf32>
    %cst_56 = arith.constant 1.000000e+00 : f32
    %182 = vector.broadcast %cst_56 : f32 to vector<8x32xf32>
    %183 = arith.addf %4, %182 : vector<8x32xf32>
    %cst_57 = arith.constant 2.000000e+00 : f32
    %184 = vector.broadcast %cst_57 : f32 to vector<8x32xf32>
    %185 = arith.addf %4, %184 : vector<8x32xf32>
    %cst_58 = arith.constant 3.000000e+00 : f32
    %186 = vector.broadcast %cst_58 : f32 to vector<8x32xf32>
    %187 = arith.addf %4, %186 : vector<8x32xf32>
    %cst_59 = arith.constant 4.000000e+00 : f32
    %188 = vector.broadcast %cst_59 : f32 to vector<8x32xf32>
    %189 = arith.addf %4, %188 : vector<8x32xf32>
    %cst_60 = arith.constant 5.000000e+00 : f32
    %190 = vector.broadcast %cst_60 : f32 to vector<8x32xf32>
    %191 = arith.addf %4, %190 : vector<8x32xf32>
    %cst_61 = arith.constant 6.000000e+00 : f32
    %192 = vector.broadcast %cst_61 : f32 to vector<8x32xf32>
    %193 = arith.addf %4, %192 : vector<8x32xf32>
    %cst_62 = arith.constant 7.000000e+00 : f32
    %194 = vector.broadcast %cst_62 : f32 to vector<8x32xf32>
    %195 = arith.addf %4, %194 : vector<8x32xf32>
    %196 = arith.mulf %4, %183 : vector<8x32xf32>
    %197 = arith.addf %4, %183 : vector<8x32xf32>
    %198 = arith.mulf %185, %187 : vector<8x32xf32>
    %199 = arith.addf %185, %187 : vector<8x32xf32>
    %200 = arith.mulf %189, %191 : vector<8x32xf32>
    %201 = arith.addf %189, %191 : vector<8x32xf32>
    %202 = arith.mulf %193, %195 : vector<8x32xf32>
    %203 = arith.addf %193, %195 : vector<8x32xf32>
    %204 = arith.mulf %196, %198 : vector<8x32xf32>
    %205 = arith.mulf %197, %198 : vector<8x32xf32>
    %206 = arith.mulf %199, %196 : vector<8x32xf32>
    %207 = arith.addf %205, %206 : vector<8x32xf32>
    %208 = arith.mulf %200, %202 : vector<8x32xf32>
    %209 = arith.mulf %201, %202 : vector<8x32xf32>
    %210 = arith.mulf %203, %200 : vector<8x32xf32>
    %211 = arith.addf %209, %210 : vector<8x32xf32>
    %212 = arith.mulf %204, %208 : vector<8x32xf32>
    %213 = arith.mulf %207, %208 : vector<8x32xf32>
    %214 = arith.mulf %211, %204 : vector<8x32xf32>
    %215 = arith.addf %213, %214 : vector<8x32xf32>
    %cst_63 = arith.constant 1.000000e+00 : f32
    %216 = vector.broadcast %cst_63 : f32 to vector<8x32xf32>
    %217 = arith.addf %2, %216 : vector<8x32xf32>
    %218 = arith.mulf %2, %217 : vector<8x32xf32>
    %cst_64 = arith.constant 2.000000e+00 : f32
    %219 = vector.broadcast %cst_64 : f32 to vector<8x32xf32>
    %220 = arith.addf %2, %219 : vector<8x32xf32>
    %cst_65 = arith.constant 3.000000e+00 : f32
    %221 = vector.broadcast %cst_65 : f32 to vector<8x32xf32>
    %222 = arith.addf %2, %221 : vector<8x32xf32>
    %223 = arith.mulf %220, %222 : vector<8x32xf32>
    %224 = arith.mulf %218, %223 : vector<8x32xf32>
    %cst_66 = arith.constant 4.000000e+00 : f32
    %225 = vector.broadcast %cst_66 : f32 to vector<8x32xf32>
    %226 = arith.addf %2, %225 : vector<8x32xf32>
    %cst_67 = arith.constant 5.000000e+00 : f32
    %227 = vector.broadcast %cst_67 : f32 to vector<8x32xf32>
    %228 = arith.addf %2, %227 : vector<8x32xf32>
    %229 = arith.mulf %226, %228 : vector<8x32xf32>
    %cst_68 = arith.constant 6.000000e+00 : f32
    %230 = vector.broadcast %cst_68 : f32 to vector<8x32xf32>
    %231 = arith.addf %2, %230 : vector<8x32xf32>
    %cst_69 = arith.constant 7.000000e+00 : f32
    %232 = vector.broadcast %cst_69 : f32 to vector<8x32xf32>
    %233 = arith.addf %2, %232 : vector<8x32xf32>
    %234 = arith.mulf %231, %233 : vector<8x32xf32>
    %235 = arith.mulf %229, %234 : vector<8x32xf32>
    %236 = arith.mulf %224, %235 : vector<8x32xf32>
    %cst_70 = arith.constant 1.000000e+00 : f32
    %237 = vector.broadcast %cst_70 : f32 to vector<8x32xf32>
    %238 = arith.addf %3, %237 : vector<8x32xf32>
    %239 = arith.mulf %3, %238 : vector<8x32xf32>
    %cst_71 = arith.constant 2.000000e+00 : f32
    %240 = vector.broadcast %cst_71 : f32 to vector<8x32xf32>
    %241 = arith.addf %3, %240 : vector<8x32xf32>
    %cst_72 = arith.constant 3.000000e+00 : f32
    %242 = vector.broadcast %cst_72 : f32 to vector<8x32xf32>
    %243 = arith.addf %3, %242 : vector<8x32xf32>
    %244 = arith.mulf %241, %243 : vector<8x32xf32>
    %245 = arith.mulf %239, %244 : vector<8x32xf32>
    %cst_73 = arith.constant 4.000000e+00 : f32
    %246 = vector.broadcast %cst_73 : f32 to vector<8x32xf32>
    %247 = arith.addf %3, %246 : vector<8x32xf32>
    %cst_74 = arith.constant 5.000000e+00 : f32
    %248 = vector.broadcast %cst_74 : f32 to vector<8x32xf32>
    %249 = arith.addf %3, %248 : vector<8x32xf32>
    %250 = arith.mulf %247, %249 : vector<8x32xf32>
    %cst_75 = arith.constant 6.000000e+00 : f32
    %251 = vector.broadcast %cst_75 : f32 to vector<8x32xf32>
    %252 = arith.addf %3, %251 : vector<8x32xf32>
    %cst_76 = arith.constant 7.000000e+00 : f32
    %253 = vector.broadcast %cst_76 : f32 to vector<8x32xf32>
    %254 = arith.addf %3, %253 : vector<8x32xf32>
    %255 = arith.mulf %252, %254 : vector<8x32xf32>
    %256 = arith.mulf %250, %255 : vector<8x32xf32>
    %257 = arith.mulf %245, %256 : vector<8x32xf32>
    %cst_77 = arith.constant 1.000000e+00 : f32
    %258 = vector.broadcast %cst_77 : f32 to vector<8x32xf32>
    %259 = arith.addf %5, %258 : vector<8x32xf32>
    %260 = arith.mulf %5, %259 : vector<8x32xf32>
    %cst_78 = arith.constant 2.000000e+00 : f32
    %261 = vector.broadcast %cst_78 : f32 to vector<8x32xf32>
    %262 = arith.addf %5, %261 : vector<8x32xf32>
    %cst_79 = arith.constant 3.000000e+00 : f32
    %263 = vector.broadcast %cst_79 : f32 to vector<8x32xf32>
    %264 = arith.addf %5, %263 : vector<8x32xf32>
    %265 = arith.mulf %262, %264 : vector<8x32xf32>
    %266 = arith.mulf %260, %265 : vector<8x32xf32>
    %cst_80 = arith.constant 4.000000e+00 : f32
    %267 = vector.broadcast %cst_80 : f32 to vector<8x32xf32>
    %268 = arith.addf %5, %267 : vector<8x32xf32>
    %cst_81 = arith.constant 5.000000e+00 : f32
    %269 = vector.broadcast %cst_81 : f32 to vector<8x32xf32>
    %270 = arith.addf %5, %269 : vector<8x32xf32>
    %271 = arith.mulf %268, %270 : vector<8x32xf32>
    %cst_82 = arith.constant 6.000000e+00 : f32
    %272 = vector.broadcast %cst_82 : f32 to vector<8x32xf32>
    %273 = arith.addf %5, %272 : vector<8x32xf32>
    %cst_83 = arith.constant 7.000000e+00 : f32
    %274 = vector.broadcast %cst_83 : f32 to vector<8x32xf32>
    %275 = arith.addf %5, %274 : vector<8x32xf32>
    %276 = arith.mulf %273, %275 : vector<8x32xf32>
    %277 = arith.mulf %271, %276 : vector<8x32xf32>
    %278 = arith.mulf %266, %277 : vector<8x32xf32>
    %cst_84 = arith.constant 5.000000e-01 : f32
    %279 = vector.broadcast %cst_84 : f32 to vector<8x32xf32>
    %280 = arith.mulf %279, %9 : vector<8x32xf32>
    %281 = arith.subf %10, %280 : vector<8x32xf32>
    %cst_85 = arith.constant 0.0039682542 : f32
    %282 = vector.broadcast %cst_85 : f32 to vector<8x32xf32>
    %283 = arith.mulf %11, %282 : vector<8x32xf32>
    %cst_86 = arith.constant 0.00833333377 : f32
    %284 = vector.broadcast %cst_86 : f32 to vector<8x32xf32>
    %285 = arith.subf %284, %283 : vector<8x32xf32>
    %286 = arith.mulf %11, %285 : vector<8x32xf32>
    %cst_87 = arith.constant 0.0833333358 : f32
    %287 = vector.broadcast %cst_87 : f32 to vector<8x32xf32>
    %288 = arith.subf %287, %286 : vector<8x32xf32>
    %289 = arith.mulf %11, %288 : vector<8x32xf32>
    %290 = arith.subf %281, %289 : vector<8x32xf32>
    %291 = arith.divf %147, %144 : vector<8x32xf32>
    %292 = arith.subf %290, %291 : vector<8x32xf32>
    %cst_88 = arith.constant 5.000000e-01 : f32
    %293 = vector.broadcast %cst_88 : f32 to vector<8x32xf32>
    %294 = arith.mulf %293, %27 : vector<8x32xf32>
    %295 = arith.subf %28, %294 : vector<8x32xf32>
    %cst_89 = arith.constant 0.0039682542 : f32
    %296 = vector.broadcast %cst_89 : f32 to vector<8x32xf32>
    %297 = arith.mulf %29, %296 : vector<8x32xf32>
    %cst_90 = arith.constant 0.00833333377 : f32
    %298 = vector.broadcast %cst_90 : f32 to vector<8x32xf32>
    %299 = arith.subf %298, %297 : vector<8x32xf32>
    %300 = arith.mulf %29, %299 : vector<8x32xf32>
    %cst_91 = arith.constant 0.0833333358 : f32
    %301 = vector.broadcast %cst_91 : f32 to vector<8x32xf32>
    %302 = arith.subf %301, %300 : vector<8x32xf32>
    %303 = arith.mulf %29, %302 : vector<8x32xf32>
    %304 = arith.subf %295, %303 : vector<8x32xf32>
    %305 = arith.divf %181, %178 : vector<8x32xf32>
    %306 = arith.subf %304, %305 : vector<8x32xf32>
    %cst_92 = arith.constant 5.000000e-01 : f32
    %307 = vector.broadcast %cst_92 : f32 to vector<8x32xf32>
    %308 = arith.mulf %307, %45 : vector<8x32xf32>
    %309 = arith.subf %46, %308 : vector<8x32xf32>
    %cst_93 = arith.constant 0.0039682542 : f32
    %310 = vector.broadcast %cst_93 : f32 to vector<8x32xf32>
    %311 = arith.mulf %47, %310 : vector<8x32xf32>
    %cst_94 = arith.constant 0.00833333377 : f32
    %312 = vector.broadcast %cst_94 : f32 to vector<8x32xf32>
    %313 = arith.subf %312, %311 : vector<8x32xf32>
    %314 = arith.mulf %47, %313 : vector<8x32xf32>
    %cst_95 = arith.constant 0.0833333358 : f32
    %315 = vector.broadcast %cst_95 : f32 to vector<8x32xf32>
    %316 = arith.subf %315, %314 : vector<8x32xf32>
    %317 = arith.mulf %47, %316 : vector<8x32xf32>
    %318 = arith.subf %309, %317 : vector<8x32xf32>
    %319 = arith.divf %215, %212 : vector<8x32xf32>
    %320 = arith.subf %318, %319 : vector<8x32xf32>
    %321 = arith.addf %77, %95 : vector<8x32xf32>
    %322 = arith.subf %321, %113 : vector<8x32xf32>
    %323 = arith.addf %23, %41 : vector<8x32xf32>
    %324 = arith.subf %323, %59 : vector<8x32xf32>
    %325 = arith.subf %322, %324 : vector<8x32xf32>
    %326 = arith.divf %144, %212 : vector<8x32xf32>
    %327 = arith.mulf %326, %178 : vector<8x32xf32>
    %328 = arith.divf %236, %278 : vector<8x32xf32>
    %329 = arith.mulf %328, %257 : vector<8x32xf32>
    %330 = arith.divf %327, %329 : vector<8x32xf32>
    %331 = math.log %330 : vector<8x32xf32>
    %332 = arith.addf %325, %331 : vector<8x32xf32>
    %333 = arith.subf %0, %2 : vector<8x32xf32>
    %334 = arith.mulf %333, %292 : vector<8x32xf32>
    %335 = arith.addf %332, %334 : vector<8x32xf32>
    %336 = arith.subf %1, %3 : vector<8x32xf32>
    %337 = arith.mulf %336, %306 : vector<8x32xf32>
    %338 = arith.addf %335, %337 : vector<8x32xf32>
    %339 = arith.subf %2, %0 : vector<8x32xf32>
    %340 = arith.subf %3, %1 : vector<8x32xf32>
    %341 = arith.addf %339, %340 : vector<8x32xf32>
    %342 = arith.mulf %341, %320 : vector<8x32xf32>
    %343 = arith.addf %338, %342 : vector<8x32xf32>
    %344 = math.absf %343 : vector<8x32xf32>
    %cst_96 = arith.constant dense<0.000000e+00> : vector<8xf32>
    %345 = vector.multi_reduction <add>, %344, %cst_96 [1] : vector<8x32xf32> to vector<8xf32>
    %346 = vector.shape_cast %345 : vector<8xf32> to vector<8x1xf32>
    %cst_97 = arith.constant 2.000000e+00 : f32
    %347 = vector.broadcast %cst_97 : f32 to vector<8x1xf32>
    %348 = arith.subf %346, %347 : vector<8x1xf32>
    %cst_98 = arith.constant 1.000000e+00 : f32
    %349 = vector.broadcast %cst_98 : f32 to vector<8x1xf32>
    %350 = arith.mulf %349, %348 : vector<8x1xf32>
    %cst_99 = arith.constant 0.000000e+00 : f32
    %351 = vector.broadcast %cst_99 : f32 to vector<8x1xf32>
    %352 = arith.maximumf %350, %351 : vector<8x1xf32>
    %353 = math.absf %350 : vector<8x1xf32>
    %cst_100 = arith.constant 0.000000e+00 : f32
    %354 = vector.broadcast %cst_100 : f32 to vector<8x1xf32>
    %355 = arith.subf %354, %353 : vector<8x1xf32>
    %356 = math.exp %355 : vector<8x1xf32>
    %cst_101 = arith.constant 1.000000e+00 : f32
    %357 = vector.broadcast %cst_101 : f32 to vector<8x1xf32>
    %358 = arith.addf %357, %356 : vector<8x1xf32>
    %359 = math.log %358 : vector<8x1xf32>
    %360 = arith.addf %352, %359 : vector<8x1xf32>
    %c0_102 = arith.constant 0 : index
    %c0_103 = arith.constant 0 : index
    %361 = vector.load %arg5[%c0_102, %c0_103] : memref<8x1xf32, #tpu.memory_space<vmem>>, vector<8x1xf32>
    tpu.vector_store %arg5[%c0_102, %c0_103], %360 {strides = array<i32>} : memref<8x1xf32, #tpu.memory_space<vmem>>, vector<8x1xf32>,
    return
  }
  func.func @transform_0(%arg0: i32) -> (i32, i32) {
    %c0_i32 = arith.constant 0 : i32
    %c0_i32_0 = arith.constant 0 : i32
    return %arg0, %c0_i32 : i32, i32
  }
  func.func @transform_1(%arg0: i32) -> (i32, i32) {
    %c0_i32 = arith.constant 0 : i32
    %c0_i32_0 = arith.constant 0 : i32
    return %arg0, %c0_i32 : i32, i32
  }
  func.func @transform_2(%arg0: i32) -> (i32, i32) {
    %c0_i32 = arith.constant 0 : i32
    %c0_i32_0 = arith.constant 0 : i32
    return %arg0, %c0_i32 : i32, i32
  }
  func.func @transform_3(%arg0: i32) -> (i32, i32) {
    %c0_i32 = arith.constant 0 : i32
    %c0_i32_0 = arith.constant 0 : i32
    return %arg0, %c0_i32 : i32, i32
  }
  func.func @transform_4(%arg0: i32) -> (i32, i32) {
    %c0_i32 = arith.constant 0 : i32
    %c0_i32_0 = arith.constant 0 : i32
    return %arg0, %c0_i32 : i32, i32
  }
}

</mosaic_0001>

<bundles_post_ra>
// kernel: embedding_loss_betae.2
= control target key start
LH: loop header
LB: loop body
LE: loop exit
PB: predicated region body
PF: predicated region fallthrough
CT: control target
= control target key end

     0   :  { %s1040_s0 = inlined_call_operand.vmem [shape: f32[8,32], index: 0, kind: input, shape index: {}]   ;;  %s1041_s1 = inlined_call_operand.vmem [shape: f32[8,32], index: 1, kind: input, shape index: {}]   ;;  %s1042_s2 = inlined_call_operand.vmem [shape: f32[8,32], index: 2, kind: input, shape index: {}]   ;;  %s1043_s3 = inlined_call_operand.vmem [shape: f32[8,32], index: 3, kind: input, shape index: {}]   ;;  %s1044_s4 = inlined_call_operand.vmem [shape: f32[8,1], index: 4, kind: output, shape index: {}]  }
   0x1   :  { %v528_v0 = vld [vmem:[%s1040_s0] sm:$0xff] }
   0x2   :  { %1066 = vst [vmem:[#allocation2_spill] sm:$0xff] %v528_v0  ;;  %v533_v1 = vld [vmem:[%s1041_s1] sm:$0xff]  ;;  %v536_v2 = vadd.f32 8.0, %v528_v0  ;;  %v695_v36 = vadd.f32 1.0, %v528_v0 }
   0x3   :  { %1067 = vst [vmem:[#allocation3_spill] sm:$0xff] %v533_v1  ;;  %v539_v3 = vadd.f32 8.0, %v533_v1  ;;  %v544_v4 = vld [vmem:[%s1042_s2] sm:$0xff]  ;;  %v553_v6 = vadd.f32 %v533_v1, %v528_v0 }
   0x4   :  { %460 = vrcp.f32 %v536_v2  ;;  %v549_v5 = vadd.f32 8.0, %v544_v4  ;;  %v565_v13 = vld [vmem:[%s1043_s3] sm:$0xff]  ;;  %vm29_vm0 = vweird.f32 %v536_v2  ;;  %v33_v23 = vand.u32 2147483647, %v536_v2 }
   0x5   :  { %462 = vrcp.f32 %v539_v3  ;;  %v556_v7 = vadd.f32 8.0, %v553_v6  ;;  %v568_v15 = vadd.f32 8.0, %v565_v13  ;;  %v35_v24 = vand.u32 2147483648, %v536_v2 }
   0x6   :  { %464 = vrcp.f32 %v549_v5  ;;  %vm56_vm2 = vweird.f32 %v539_v3  ;;  %v60_v25 = vand.u32 2147483647, %v539_v3  ;;  %v62_v27 = vand.u32 2147483648, %v539_v3 }
   0x7   :  { %466 = vrcp.f32 %v556_v7  ;;  %vm588_vm5 = vcmp.eq.f32.partialorder %v33_v23, 8.507059e+37  ;;  %v36_v35 = vor.u32 1.1754944e-38, %v35_v24  ;;  %vm110_vm8 = vweird.f32 %v549_v5 }
   0x8   :  { %468 = vrcp.f32 %v568_v15  ;;  %vm596_vm7 = vcmp.eq.f32.partialorder %v60_v25, 8.507059e+37  ;;  %v63_v38 = vor.u32 1.1754944e-38, %v62_v27  ;;  %v116_v40 = vand.u32 2147483648, %v549_v5 }
   0x9   :  { %v114_v43 = vand.u32 2147483647, %v549_v5  ;;  %vm83_vm10 = vweird.f32 %v556_v7  ;;  %v618_v46 = vadd.f32 %v565_v13, %v544_v4  ;;  %v89_v48 = vand.u32 2147483648, %v556_v7 }
   0xa   :  { %v461_v8 = vpop.eup %460  ;;  %v87_v51 = vand.u32 2147483647, %v556_v7  ;;  %v117_v52 = vor.u32 1.1754944e-38, %v116_v40  ;;  %v454_v40 = vadd.f32 -0.5, %v539_v3 }
   0xb   :  { %v463_v9 = vpop.eup %462  ;;  %v25_v10 = vmul.f32 %v461_v8, %v536_v2  ;;  %vm30_vm1 = vweird.f32 %v461_v8  ;;  %vm115_vm14 = vcmp.eq.f32.partialorder %v114_v43, 8.507059e+37  ;;  %v638_v56 = vadd.f32 8.0, %v618_v46 }
   0xc   :  { %v52_v11 = vmul.f32 %v463_v9, %v539_v3  ;;  %v465_v12 = vpop.eup %464  ;;  %vm57_vm3 = vweird.f32 %v463_v9  ;;  %vm582_vm4 = vmor %vm29_vm0, %vm30_vm1  ;;  %v90_v59 = vor.u32 1.1754944e-38, %v89_v48  ;;  %vm88_vm15 = vcmp.eq.f32.partialorder %v87_v51, 8.507059e+37 }
   0xd   :  { %v26_v14 = vsub.f32 1.0, %v25_v10  ;;  %v570_v16 = vpop.eup %466  ;;  %v106_v18 = vmul.f32 %v465_v12, %v549_v5  ;;  %vm592_vm6 = vmor %vm56_vm2, %vm57_vm3  ;;  %vm111_vm9 = vweird.f32 %v465_v12  ;;  %470 = vrcp.f32 %v638_v56 }
   0xe   :  { %v53_v17 = vsub.f32 1.0, %v52_v11  ;;  %v79_v20 = vmul.f32 %v570_v16, %v556_v7  ;;  %v586_v32 = vpop.eup %468  ;;  %vm84_vm11 = vweird.f32 %v570_v16  ;;  %vm612_vm12 = vmor %vm110_vm8, %vm111_vm9  ;;  %vm137_vm0 = vweird.f32 %v568_v15 }
   0xf   :  { %v27_v19 = vmul.f32 %v461_v8, %v26_v14  ;;  %v107_v22 = vsub.f32 1.0, %v106_v18  ;;  %v133_v44 = vmul.f32 %v586_v32, %v568_v15  ;;  %vm631_vm13 = vmor %vm83_vm10, %vm84_vm11  ;;  %vm138_vm1 = vweird.f32 %v586_v32 }
  0x10   :  { %v54_v21 = vmul.f32 %v463_v9, %v53_v17  ;;  %v80_v28 = vsub.f32 1.0, %v79_v20  ;;  %472 = vlog2.f32 %v536_v2  ;;  %v143_v11 = vand.u32 2147483648, %v568_v15  ;;  %vm673_vm2 = vmor %vm137_vm0, %vm138_vm1 }
  0x11   :  { %v28_v26 = vadd.f32 %v461_v8, %v27_v19  ;;  %v108_v31 = vmul.f32 %v465_v12, %v107_v22  ;;  %v134_v55 = vsub.f32 1.0, %v133_v44  ;;  %474 = vlog2.f32 %v539_v3 }
  0x12   :  { %v55_v30 = vadd.f32 %v463_v9, %v54_v21  ;;  %v81_v39 = vmul.f32 %v570_v16, %v80_v28  ;;  %v141_v14 = vand.u32 2147483647, %v568_v15  ;;  %476 = vlog2.f32 %v556_v7 }
  0x13   :  { %v32_v37 = vsel %vm582_vm4, %v461_v8, %v28_v26  ;;  %v109_v42 = vadd.f32 %v465_v12, %v108_v31  ;;  %v135_v62 = vmul.f32 %v586_v32, %v134_v55  ;;  %v677_v19 = vpop.eup %470  ;;  %478 = vlog2.f32 %v549_v5 }
  0x14   :  { %v59_v41 = vsel %vm592_vm6, %v463_v9, %v55_v30  ;;  %v622_v47 = vsel %vm588_vm5, %v36_v35, %v32_v37  ;;  %v82_v50 = vadd.f32 %v570_v16, %v81_v39  ;;  %v144_v22 = vor.u32 1.1754944e-38, %v143_v11 }
  0x15   :  { %1078 = vst [vmem:[#allocation4_spill] sm:$0xff] %v622_v47  ;;  %v627_v49 = vsel %vm596_vm7, %v63_v38, %v59_v41  ;;  %v113_v54 = vsel %vm612_vm12, %v465_v12, %v109_v42  ;;  %v642_v57 = vmul.f32 %v622_v47, %v622_v47  ;;  %v136_v12 = vadd.f32 %v586_v32, %v135_v62 }
  0x16   :  { %1079 = vst [vmem:[#allocation5_spill] sm:$0xff] %v627_v49  ;;  %v646_v58 = vmul.f32 %v627_v49, %v627_v49  ;;  %v86_v60 = vsel %vm631_vm13, %v570_v16, %v82_v50  ;;  %v651_v61 = vsel %vm115_vm14, %v117_v52, %v113_v54  ;;  %480 = vlog2.f32 %v568_v15  ;;  %v473_v24 = vpop.eup %472 }
  0x17   :  { %v44_v63 = vmul.f32 0.0007936508, %v642_v57  ;;  %v658_v9 = vsel %vm88_vm15, %v90_v59, %v86_v60  ;;  %v122_v10 = vmul.f32 %v651_v61, %v651_v61  ;;  %v140_v23 = vsel %vm673_vm2, %v586_v32, %v136_v12  ;;  %v475_v28 = vpop.eup %474 }
  0x18   :  { %1082 = vst [vmem:[#allocation6_spill] sm:$0xff] %v646_v58  ;;  %v71_v8 = vmul.f32 0.0007936508, %v646_v58  ;;  %v671_v17 = vmul.f32 %v658_v9, %v658_v9  ;;  %vm142_vm3 = vcmp.eq.f32.partialorder %v141_v14, 8.507059e+37  ;;  %v160_v27 = vmul.f32 %v677_v19, %v638_v56  ;;  %v477_v31 = vpop.eup %476 }
  0x19   :  { %1083 = vst [vmem:[#allocation7_spill] sm:$0xff] %v658_v9  ;;  %v45_v16 = vsub.f32 0.0027777778, %v44_v63  ;;  %v125_v21 = vmul.f32 0.0007936508, %v122_v10  ;;  %v689_v33 = vsel %vm142_vm3, %v144_v22, %v140_v23  ;;  %v479_v34 = vpop.eup %478  ;;  %v453_v32 = vadd.f32 -0.5, %v536_v2 }
  0x1a   :  { %1084 = vst [vmem:[#allocation8_spill] sm:$0xff] %v671_v17  ;;  %v72_v20 = vsub.f32 0.0027777778, %v71_v8  ;;  %v98_v26 = vmul.f32 0.0007936508, %v671_v17  ;;  %v698_v37 = vadd.f32 2.0, %v528_v0  ;;  %v149_v48 = vmul.f32 %v689_v33, %v689_v33 }
  0x1b   :  { %v46_v25 = vmul.f32 %v45_v16, %v642_v57  ;;  %v126_v30 = vsub.f32 0.0027777778, %v125_v21  ;;  %v691_v35 = vmul.f32 0.6931472, %v473_v24  ;;  %v161_v42 = vsub.f32 1.0, %v160_v27 }
  0x1c   :  { %v73_v29 = vmul.f32 %v72_v20, %v646_v58  ;;  %v481_v38 = vpop.eup %480  ;;  %v99_v41 = vsub.f32 0.0027777778, %v98_v26  ;;  %v701_v43 = vmul.f32 0.6931472, %v475_v28  ;;  %v705_v2 = vmul.f32 0.6931472, %v477_v31 }
  0x1d   :  { %1087 = vst [vmem:[#allocation9_spill] sm:$0xff] %v691_v35  ;;  %v47_v39 = vsub.f32 0.083333336, %v46_v25  ;;  %v127_v45 = vmul.f32 %v126_v30, %v122_v10  ;;  %v455_v50 = vadd.f32 -0.5, %v556_v7  ;;  %v121_v51 = vmul.f32 0.6931472, %v479_v34 }
  0x1e   :  { %1088 = vst [vmem:[#allocation10_spill] sm:$0xff] %v701_v43  ;;  %v74_v44 = vsub.f32 0.083333336, %v73_v29  ;;  %v456_v52 = vadd.f32 -0.5, %v549_v5  ;;  %v148_v53 = vmul.f32 0.6931472, %v481_v38  ;;  %v43_v59 = vmul.f32 %v453_v32, %v691_v35 }
  0x1f   :  { %1089 = vst [vmem:[#allocation11_spill] sm:$0xff] %v705_v2  ;;  %v457_v54 = vadd.f32 -0.5, %v568_v15  ;;  %v168_v3 = vand.u32 2147483647, %v638_v56  ;;  %v170_v55 = vand.u32 2147483648, %v638_v56  ;;  %v48_v60 = vmul.f32 %v47_v39, %v622_v47 }
  0x20   :  { %v100_v62 = vmul.f32 %v99_v41, %v671_v17  ;;  %v162_v63 = vmul.f32 %v677_v19, %v161_v42  ;;  %v70_v7 = vmul.f32 %v454_v40, %v701_v43  ;;  %v75_v8 = vmul.f32 %v74_v44, %v627_v49 }
  0x21   :  { %v128_v5 = vsub.f32 0.083333336, %v127_v45  ;;  %v152_v10 = vmul.f32 0.0007936508, %v149_v48  ;;  %v719_v15 = vmul.f32 %v455_v50, %v705_v2  ;;  %v721_v11 = vmul.f32 %v456_v52, %v121_v51 }
  0x22   :  { %vm164_vm4 = vweird.f32 %v638_v56  ;;  %vm165_vm5 = vweird.f32 %v677_v19  ;;  %v725_v12 = vmul.f32 %v457_v54, %v148_v53  ;;  %vm727_vm6 = vcmp.eq.f32.partialorder %v168_v3, 8.507059e+37 }
  0x23   :  { %v171_v16 = vor.u32 1.1754944e-38, %v170_v55  ;;  %482 = vlog2.f32 %v638_v56  ;;  %v732_v18 = vadd.f32 %v48_v60, %v43_v59  ;;  %v101_v20 = vsub.f32 0.083333336, %v100_v62  ;;  %vm741_vm7 = vmor %vm164_vm4, %vm165_vm5 }
  0x24   :  { %1090 = vst [vmem:[#allocation12_spill] sm:$0xff] %v725_v12  ;;  %v163_v21 = vadd.f32 %v677_v19, %v162_v63  ;;  %v736_v22 = vadd.f32 -0.5, %v638_v56  ;;  %v738_v23 = vadd.f32 %v75_v8, %v70_v7  ;;  %v129_v24 = vmul.f32 %v128_v5, %v651_v61 }
  0x25   :  { %1093 = vst [vmem:[#allocation13_spill] sm:$0xff] %v732_v18  ;;  %v153_v25 = vsub.f32 0.0027777778, %v152_v10  ;;  %v187_v27 = vadd.f32 3.0, %v528_v0  ;;  %v188_v28 = vadd.f32 4.0, %v528_v0  ;;  %v748_v29 = vadd.f32 1.0, %v553_v6 }
  0x26   :  { %1094 = vst [vmem:[#allocation14_spill] sm:$0xff] %v738_v23  ;;  %v751_v30 = vadd.f32 2.0, %v553_v6  ;;  %v754_v56 = vadd.f32 3.0, %v553_v6  ;;  %v757_v61 = vadd.f32 4.0, %v553_v6  ;;  %v760_v31 = vadd.f32 5.0, %v553_v6 }
  0x27   :  { %v763_v34 = vadd.f32 6.0, %v553_v6  ;;  %v766_v32 = vadd.f32 7.0, %v553_v6  ;;  %v102_v38 = vmul.f32 %v101_v20, %v658_v9  ;;  %v167_v39 = vsel %vm741_vm7, %v677_v19, %v163_v21 }
  0x28   :  { %v189_v40 = vadd.f32 5.0, %v528_v0  ;;  %v190_v41 = vadd.f32 6.0, %v528_v0  ;;  %v294_v44 = vadd.f32 1.0, %v618_v46  ;;  %v296_v45 = vadd.f32 2.0, %v618_v46 }
  0x29   :  { %1097 = vst [vmem:[#allocation15_spill] sm:$0xff] %v766_v32  ;;  %v483_v42 = vpop.eup %482  ;;  %v297_v50 = vadd.f32 3.0, %v618_v46  ;;  %v300_v51 = vadd.f32 4.0, %v618_v46  ;;  %v191_v52 = vadd.f32 7.0, %v528_v0  ;;  %v301_v53 = vadd.f32 5.0, %v618_v46 }
  0x2a   :  { %v303_v54 = vadd.f32 6.0, %v618_v46  ;;  %v304_v19 = vadd.f32 7.0, %v618_v46  ;;  %v784_v3 = vmul.f32 %v748_v29, %v553_v6  ;;  %v788_v55 = vmul.f32 %v754_v56, %v751_v30 }
  0x2b   :  { %v792_v59 = vmul.f32 %v760_v31, %v757_v61  ;;  %v796_v60 = vmul.f32 %v766_v32, %v763_v34  ;;  %v798_v62 = vmul.f32 %v153_v25, %v149_v48  ;;  %v802_v63 = vsel %vm727_vm6, %v171_v16, %v167_v39 }
  0x2c   :  { %1098 = vst [vmem:[#allocation16_spill] sm:$0xff] %v784_v3  ;;  %v193_v7 = vadd.f32 %v695_v36, %v528_v0  ;;  %v195_v8 = vadd.f32 %v187_v27, %v698_v37  ;;  %v295_v5 = vmul.f32 %v294_v44, %v618_v46  ;;  %v298_v10 = vmul.f32 %v297_v50, %v296_v45 }
  0x2d   :  { %1099 = vst [vmem:[#allocation17_spill] sm:$0xff] %v788_v55  ;;  %v302_v20 = vmul.f32 %v301_v53, %v300_v51  ;;  %v305_v21 = vmul.f32 %v304_v19, %v303_v54  ;;  %v192_v26 = vmul.f32 %v695_v36, %v528_v0  ;;  %v194_v48 = vmul.f32 %v187_v27, %v698_v37 }
  0x2e   :  { %1100 = vst [vmem:[#allocation18_spill] sm:$0xff] %v792_v59  ;;  %v196_v25 = vmul.f32 %v189_v40, %v188_v28  ;;  %v197_v23 = vadd.f32 %v189_v40, %v188_v28  ;;  %v176_v14 = vmul.f32 %v802_v63, %v802_v63  ;;  %v198_v16 = vmul.f32 %v191_v52, %v190_v41 }
  0x2f   :  { %1101 = vst [vmem:[#allocation19_spill] sm:$0xff] %v796_v60  ;;  %v815_v39 = vmul.f32 %v788_v55, %v784_v3  ;;  %v819_v46 = vmul.f32 %v796_v60, %v792_v59  ;;  %v199_v44 = vadd.f32 %v191_v52, %v190_v41  ;;  %v201_v45 = vmul.f32 %v194_v48, %v193_v7 }
  0x30   :  { %v202_v50 = vmul.f32 %v195_v8, %v192_v26  ;;  %v212_v36 = vadd.f32 1.0, %v533_v1  ;;  %v213_v37 = vadd.f32 2.0, %v533_v1  ;;  %v214_v27 = vadd.f32 3.0, %v533_v1 }
  0x31   :  { %1102 = vst [vmem:[#allocation20_spill] sm:$0xff] %v815_v39  ;;  %v299_v28 = vmul.f32 %v298_v10, %v295_v5  ;;  %v306_v40 = vmul.f32 %v305_v21, %v302_v20  ;;  %v215_v51 = vadd.f32 4.0, %v533_v1  ;;  %v216_v53 = vadd.f32 5.0, %v533_v1 }
  0x32   :  { %1103 = vst [vmem:[#allocation21_spill] sm:$0xff] %v819_v46  ;;  %v217_v54 = vadd.f32 6.0, %v533_v1  ;;  %v218_v19 = vadd.f32 7.0, %v533_v1  ;;  %v179_v0 = vmul.f32 0.0007936508, %v176_v14  ;;  %v828_v41 = vmul.f32 %v194_v48, %v192_v26 }
  0x33   :  { %v830_v52 = vmul.f32 %v198_v16, %v196_v25  ;;  %v834_v7 = vmul.f32 %v819_v46, %v815_v39  ;;  %v837_v8 = vadd.f32 %v102_v38, %v719_v15  ;;  %v840_v5 = vadd.f32 %v129_v24, %v721_v11 }
  0x34   :  { %v843_v20 = vmul.f32 0.6931472, %v483_v42  ;;  %v845_v21 = vadd.f32 %v202_v50, %v201_v45  ;;  %v205_v26 = vmul.f32 %v198_v16, %v197_v23  ;;  %v206_v48 = vmul.f32 %v199_v44, %v196_v25 }
  0x35   :  { %1104 = vst [vmem:[#allocation22_spill] sm:$0xff] %v837_v8  ;;  %v847_v18 = vmul.f32 %v306_v40, %v299_v28  ;;  %v219_v2 = vmul.f32 %v212_v36, %v533_v1  ;;  %v221_v43 = vmul.f32 %v214_v27, %v213_v37  ;;  %v223_v39 = vmul.f32 %v216_v53, %v215_v51 }
  0x36   :  { %1105 = vst [vmem:[#allocation23_spill] sm:$0xff] %v840_v5  ;;  %v225_v46 = vmul.f32 %v218_v19, %v217_v54  ;;  %v180_v15 = vsub.f32 0.0027777778, %v179_v0  ;;  %v852_v11 = vmul.f32 %v830_v52, %v828_v41  ;;  %v220_v24 = vadd.f32 %v212_v36, %v533_v1 }
  0x37   :  { %484 = vrcp.f32 %v834_v7  ;;  %v266_v38 = vadd.f32 1.0, %v544_v4  ;;  %v268_v23 = vadd.f32 2.0, %v544_v4  ;;  %v269_v42 = vadd.f32 3.0, %v544_v4 }
  0x38   :  { %v272_v25 = vadd.f32 4.0, %v544_v4  ;;  %v273_v16 = vadd.f32 5.0, %v544_v4  ;;  %v275_v0 = vadd.f32 6.0, %v544_v4  ;;  %v276_v44 = vadd.f32 7.0, %v544_v4 }
  0x39   :  { %486 = vrcp.f32 %v847_v18  ;;  %v222_v45 = vadd.f32 %v214_v27, %v213_v37  ;;  %v864_v50 = vmul.f32 %v221_v43, %v219_v2  ;;  %v231_v36 = vmul.f32 %v225_v46, %v223_v39 }
  0x3a   :  { %v280_v28 = vadd.f32 1.0, %v565_v13  ;;  %v282_v40 = vadd.f32 2.0, %v565_v13  ;;  %v283_v10 = vadd.f32 3.0, %v565_v13  ;;  %v286_v1 = vadd.f32 4.0, %v565_v13 }
  0x3b   :  { %v287_v8 = vadd.f32 5.0, %v565_v13  ;;  %v207_v5 = vadd.f32 %v206_v48, %v205_v26  ;;  %v224_v9 = vadd.f32 %v216_v53, %v215_v51  ;;  %v289_v49 = vadd.f32 6.0, %v565_v13 }
  0x3c   :  { %v290_v35 = vadd.f32 7.0, %v565_v13  ;;  %v267_v27 = vmul.f32 %v266_v38, %v544_v4  ;;  %v270_v12 = vmul.f32 %v269_v42, %v268_v23  ;;  %v274_v17 = vmul.f32 %v273_v16, %v272_v25 }
  0x3d   :  { %v873_v37 = vpop.eup %484  ;;  %v277_v47 = vmul.f32 %v276_v44, %v275_v0  ;;  %v181_v59 = vmul.f32 %v180_v15, %v176_v14  ;;  %v226_v58 = vadd.f32 %v218_v19, %v217_v54  ;;  %v228_v60 = vmul.f32 %v221_v43, %v220_v24 }
  0x3e   :  { %v229_v3 = vmul.f32 %v222_v45, %v219_v2  ;;  %v877_v32 = vmul.f32 %v231_v36, %v864_v50  ;;  %v281_v51 = vmul.f32 %v280_v28, %v565_v13  ;;  %v284_v53 = vmul.f32 %v283_v10, %v282_v40  ;;  %v1110_v45 = vld [vmem:[#allocation17_spill] sm:$0xff]  ;;  %v1111_v40 = vld [vmem:[#allocation16_spill] sm:$0xff] }
  0x3f   :  { %v487_v55 = vpop.eup %486  ;;  %v288_v26 = vmul.f32 %v287_v8, %v286_v1  ;;  %v291_v48 = vmul.f32 %v290_v35, %v289_v49  ;;  %488 = vrcp.f32 %v852_v11  ;;  %v365_v38 = vmul.f32 %v873_v37, %v834_v7 }
  0x40   :  { %v388_v23 = vmul.f32 %v487_v55, %v847_v18  ;;  %v232_v14 = vmul.f32 %v225_v46, %v224_v9  ;;  %v271_v54 = vmul.f32 %v270_v12, %v267_v27  ;;  %v278_v43 = vmul.f32 %v277_v47, %v274_v17 }
  0x41   :  { %v398_v2 = vand.u32 2147483648, %v847_v18  ;;  %vm392_vm8 = vweird.f32 %v847_v18  ;;  %vm393_vm9 = vweird.f32 %v487_v55  ;;  %v396_v10 = vand.u32 2147483647, %v847_v18 }
  0x42   :  { %v389_v19 = vsub.f32 1.0, %v388_v23  ;;  %v182_v1 = vsub.f32 0.083333336, %v181_v59  ;;  %v230_v49 = vadd.f32 %v229_v3, %v228_v60  ;;  %v233_v35 = vmul.f32 %v226_v58, %v223_v39  ;;  %vm895_vm10 = vmor %vm392_vm8, %vm393_vm9  ;;  %v1116_v23 = vld [vmem:[#allocation18_spill] sm:$0xff] }
  0x43   :  { %490 = vrcp.f32 %v877_v32  ;;  %v285_v8 = vmul.f32 %v284_v53, %v281_v51  ;;  %v292_v15 = vmul.f32 %v291_v48, %v288_v26  ;;  %v366_v24 = vsub.f32 1.0, %v365_v38  ;;  %v1112_v51 = vld [vmem:[#allocation19_spill] sm:$0xff] }
  0x44   :  { %v390_v42 = vmul.f32 %v487_v55, %v389_v19  ;;  %v1106_v47 = vsub.f32 0.083333336, %v798_v62  ;;  %v178_v17 = vmul.f32 %v736_v22, %v843_v20  ;;  %v209_v12 = vmul.f32 %v830_v52, %v845_v21 }
  0x45   :  { %v399_v58 = vor.u32 1.1754944e-38, %v398_v2  ;;  %v899_v3 = vpop.eup %488  ;;  %v210_v59 = vmul.f32 %v207_v5, %v828_v41  ;;  %v279_v60 = vmul.f32 %v278_v43, %v271_v54  ;;  %vm397_vm11 = vcmp.eq.f32.partialorder %v396_v10, 8.507059e+37  ;;  %v1109_v5 = vld [vmem:[#allocation15_spill] sm:$0xff]  ;;  %v1117_v54 = vld [vmem:[#allocation4_spill] sm:$0xff] }
  0x46   :  { %v156_v9 = vmul.f32 %v1106_v47, %v689_v33  ;;  %v391_v39 = vadd.f32 %v487_v55, %v390_v42  ;;  %v183_v33 = vmul.f32 %v182_v1, %v802_v63  ;;  %v234_v62 = vadd.f32 %v233_v35, %v232_v14  ;;  %v1118_v2 = vld [vmem:[#allocation8_spill] sm:$0xff] }
  0x47   :  { %v247_v22 = vadd.f32 %v748_v29, %v553_v6  ;;  %v310_v46 = vmul.f32 0.003968254, %v642_v57  ;;  %v236_v52 = vmul.f32 %v231_v36, %v230_v49  ;;  %v293_v20 = vmul.f32 %v292_v15, %v285_v8  ;;  %v1119_v10 = vld [vmem:[#allocation12_spill] sm:$0xff] }
  0x48   :  { %v367_v21 = vmul.f32 %v873_v37, %v366_v24  ;;  %v395_v25 = vsel %vm895_vm10, %v487_v55, %v391_v39  ;;  %v249_v41 = vadd.f32 %v754_v56, %v751_v30  ;;  %v251_v63 = vadd.f32 %v760_v31, %v757_v61 }
  0x49   :  { %v909_v16 = vpop.eup %490  ;;  %v317_v6 = vmul.f32 %v899_v3, %v852_v11  ;;  %v400_v29 = vsel %vm397_vm11, %v399_v58, %v395_v25  ;;  %v253_v0 = vadd.f32 %v1109_v5, %v763_v34  ;;  %vm369_vm12 = vweird.f32 %v834_v7 }
  0x4a   :  { %vm370_vm13 = vweird.f32 %v873_v37  ;;  %v401_v55 = vmul.f32 %v400_v29, %v279_v60  ;;  %v237_v44 = vmul.f32 %v234_v62, %v864_v50  ;;  %v255_v36 = vmul.f32 %v1110_v45, %v247_v22  ;;  %v1113_v50 = vld [vmem:[#allocation6_spill] sm:$0xff]  ;;  %v1121_v22 = vld [vmem:[#allocation5_spill] sm:$0xff] }
  0x4b   :  { %v311_v30 = vsub.f32 0.008333334, %v310_v46  ;;  %v375_v56 = vand.u32 2147483648, %v834_v7  ;;  %v341_v61 = vmul.f32 %v909_v16, %v877_v32  ;;  %v368_v31 = vadd.f32 %v873_v37, %v367_v21  ;;  %vm935_vm14 = vmor %vm369_vm12, %vm370_vm13 }
  0x4c   :  { %v373_v28 = vand.u32 2147483647, %v834_v7  ;;  %v928_v34 = vmul.f32 %v401_v55, %v293_v20  ;;  %v256_v27 = vmul.f32 %v249_v41, %v1111_v40  ;;  %v259_v53 = vmul.f32 %v1112_v51, %v251_v63 }
  0x4d   :  { %v318_v26 = vsub.f32 1.0, %v317_v6  ;;  %v334_v48 = vmul.f32 0.003968254, %v1113_v50  ;;  %v260_v14 = vmul.f32 %v253_v0, %v1116_v23  ;;  %v941_v43 = vmul.f32 0.5, %v1117_v54 }
  0x4e   :  { %v358_v19 = vmul.f32 0.003968254, %v1118_v2  ;;  %492 = vrcp.f32 %v928_v34  ;;  %v946_v1 = vadd.f32 %v156_v9, %v1119_v10  ;;  %v948_v49 = vadd.f32 %v183_v33, %v178_v17  ;;  %v1120_v17 = vld [vmem:[#allocation9_spill] sm:$0xff]  ;;  %v1133_v10 = vld [vmem:[#allocation10_spill] sm:$0xff] }
  0x4f   :  { %v950_v35 = vadd.f32 %v210_v59, %v209_v12  ;;  %v376_v7 = vor.u32 1.1754944e-38, %v375_v56  ;;  %v312_v8 = vmul.f32 %v311_v30, %v642_v57  ;;  %v342_v15 = vsub.f32 1.0, %v341_v61 }
  0x50   :  { %v372_v24 = vsel %vm935_vm14, %v873_v37, %v368_v31  ;;  %vm374_vm15 = vcmp.eq.f32.partialorder %v373_v28, 8.507059e+37  ;;  %v956_v42 = vadd.f32 %v237_v44, %v236_v52  ;;  %v257_v47 = vadd.f32 %v256_v27, %v255_v36  ;;  %v1128_v31 = vld [vmem:[#allocation7_spill] sm:$0xff]  ;;  %v1129_v27 = vld [vmem:[#allocation21_spill] sm:$0xff] }
  0x51   :  { %v319_v18 = vmul.f32 %v899_v3, %v318_v26  ;;  %v335_v9 = vsub.f32 0.008333334, %v334_v48  ;;  %v261_v58 = vadd.f32 %v260_v14, %v259_v53  ;;  %v309_v12 = vsub.f32 %v1120_v17, %v941_v43  ;;  %v1132_v14 = vld [vmem:[#allocation20_spill] sm:$0xff] }
  0x52   :  { %vm321_vm0 = vweird.f32 %v852_v11  ;;  %v359_v59 = vsub.f32 0.008333334, %v358_v19  ;;  %vm322_vm1 = vweird.f32 %v899_v3  ;;  %v325_v60 = vand.u32 2147483647, %v852_v11 }
  0x53   :  { %v327_v37 = vand.u32 2147483648, %v852_v11  ;;  %v377_v39 = vsel %vm374_vm15, %v376_v7, %v372_v24  ;;  %v313_v62 = vsub.f32 0.083333336, %v312_v8  ;;  %v332_v46 = vmul.f32 0.5, %v1121_v22  ;;  %vm974_vm3 = vmor %vm321_vm0, %vm322_vm1  ;;  %v1134_v8 = vld [vmem:[#allocation11_spill] sm:$0xff] }
  0x54   :  { %v493_v33 = vpop.eup %492  ;;  %v343_v52 = vmul.f32 %v909_v16, %v342_v15  ;;  %vm345_vm2 = vweird.f32 %v877_v32  ;;  %v320_v20 = vadd.f32 %v899_v3, %v319_v18  ;;  %v336_v21 = vmul.f32 %v335_v9, %v1113_v50  ;;  %v1136_v9 = vld [vmem:[#allocation13_spill] sm:$0xff] }
  0x55   :  { %v351_v25 = vand.u32 2147483648, %v877_v32  ;;  %v404_v41 = vmul.f32 %v493_v33, %v928_v34  ;;  %vm346_vm4 = vweird.f32 %v909_v16  ;;  %v360_v6 = vmul.f32 %v359_v59, %v1118_v2 }
  0x56   :  { %v385_v29 = vmul.f32 %v377_v39, %v852_v11  ;;  %v414_v5 = vand.u32 2147483648, %v928_v34  ;;  %vm408_vm5 = vweird.f32 %v928_v34  ;;  %vm409_vm6 = vweird.f32 %v493_v33  ;;  %vm996_vm8 = vmor %vm345_vm2, %vm346_vm4 }
  0x57   :  { %v405_v0 = vsub.f32 1.0, %v404_v41  ;;  %v412_v55 = vand.u32 2147483647, %v928_v34  ;;  %vm984_vm7 = vcmp.eq.f32.partialorder %v325_v60, 8.507059e+37  ;;  %v328_v45 = vor.u32 1.1754944e-38, %v327_v37  ;;  %vm1004_vm9 = vmor %vm408_vm5, %vm409_vm6 }
  0x58   :  { %v344_v36 = vadd.f32 %v909_v16, %v343_v52  ;;  %v349_v30 = vand.u32 2147483647, %v877_v32  ;;  %v314_v56 = vmul.f32 %v313_v62, %v642_v57  ;;  %v324_v11 = vsel %vm974_vm3, %v899_v3, %v320_v20 }
  0x59   :  { %v356_v28 = vmul.f32 0.5, %v1128_v31  ;;  %v406_v40 = vmul.f32 %v493_v33, %v405_v0  ;;  %v263_v51 = vmul.f32 %v1129_v27, %v257_v47  ;;  %v337_v53 = vsub.f32 0.083333336, %v336_v21  ;;  %v1135_v47 = vld [vmem:[#allocation23_spill] sm:$0xff] }
  0x5a   :  { %v352_v26 = vor.u32 1.1754944e-38, %v351_v25  ;;  %v415_v3 = vor.u32 1.1754944e-38, %v414_v5  ;;  %v361_v48 = vsub.f32 0.083333336, %v360_v6  ;;  %v386_v38 = vmul.f32 %v385_v29, %v877_v32  ;;  %v1139_v25 = vld [vmem:[#allocation2_spill] sm:$0xff] }
  0x5b   :  { %v407_v23 = vadd.f32 %v493_v33, %v406_v40  ;;  %vm413_vm10 = vcmp.eq.f32.partialorder %v412_v55, 8.507059e+37  ;;  %v264_v54 = vmul.f32 %v261_v58, %v1132_v14  ;;  %v329_v43 = vsel %vm984_vm7, %v328_v45, %v324_v11  ;;  %v1137_v58 = vld [vmem:[#allocation14_spill] sm:$0xff] }
  0x5c   :  { %v348_v19 = vsel %vm996_vm8, %v909_v16, %v344_v36  ;;  %vm350_vm11 = vcmp.eq.f32.partialorder %v349_v30, 8.507059e+37  ;;  %v315_v34 = vsub.f32 %v309_v12, %v314_v56  ;;  %v333_v7 = vsub.f32 %v1133_v10, %v332_v46  ;;  %v1138_v46 = vld [vmem:[#allocation22_spill] sm:$0xff] }
  0x5d   :  { %v357_v15 = vsub.f32 %v1134_v8, %v356_v28  ;;  %v411_v32 = vsel %vm1004_vm9, %v493_v33, %v407_v23  ;;  %v338_v24 = vmul.f32 %v337_v53, %v1113_v50  ;;  %v380_v18 = vadd.f32 %v946_v1, %v1135_v47 }
  0x5e   :  { %v382_v17 = vadd.f32 %v1137_v58, %v1136_v9  ;;  %v416_v59 = vsel %vm413_vm10, %v415_v3, %v411_v32  ;;  %v330_v16 = vmul.f32 %v329_v43, %v950_v35  ;;  %v353_v60 = vsel %vm350_vm11, %v352_v26, %v348_v19 }
  0x5f   :  { %v362_v12 = vmul.f32 %v361_v48, %v1118_v2  ;;  %v417_v37 = vmul.f32 %v416_v59, %v386_v38  ;;  %v265_v62 = vadd.f32 %v264_v54, %v263_v51  ;;  %v339_v22 = vsub.f32 %v333_v7, %v338_v24  ;;  %v1140_v2 = vld [vmem:[#allocation3_spill] sm:$0xff] }
  0x60   :  { %v354_v33 = vmul.f32 %v353_v60, %v956_v42  ;;  %v381_v50 = vsub.f32 %v380_v18, %v948_v49  ;;  %v383_v52 = vsub.f32 %v382_v17, %v1138_v46  ;;  %v331_v1 = vsub.f32 %v315_v34, %v330_v16 }
  0x61   :  { %494 = vlog2.f32 %v417_v37  ;;  %v363_v20 = vsub.f32 %v357_v15, %v362_v12  ;;  %v378_v21 = vmul.f32 %v377_v39, %v265_v62  ;;  %v421_v41 = vsub.f32 %v1139_v25, %v544_v4 }
  0x62   :  { %v427_v35 = vsub.f32 %v544_v4, %v1139_v25  ;;  %v428_v63 = vsub.f32 %v565_v13, %v1140_v2  ;;  %v355_v6 = vsub.f32 %v339_v22, %v354_v33  ;;  %v384_v29 = vsub.f32 %v381_v50, %v383_v52 }
  0x63   :  { %v424_v42 = vsub.f32 %v1140_v2, %v565_v13  ;;  %v379_v5 = vsub.f32 %v363_v20, %v378_v21  ;;  %v422_v55 = vmul.f32 %v421_v41, %v331_v1  ;;  %vm433_vm12 = vcmask 261120  }
  0x64   :  { %v429_v44 = vadd.f32 %v428_v63, %v427_v35  ;;  %vm447_vm13 = vcmask 7168  }
  0x65   :  { %v425_v45 = vmul.f32 %v424_v42, %v355_v6 }
  0x66   :  { %v430_v30 = vmul.f32 %v429_v44, %v379_v5 }
  0x67   :  { %v495_v49 = vpop.eup %494 }
  0x68   :  { %v419_v0 = vmul.f32 0.6931472, %v495_v49 }
  0x6a   :  { %v420_v39 = vadd.f32 %v419_v0, %v384_v29 }
  0x6c   :  { %v423_v36 = vadd.f32 %v422_v55, %v420_v39 }
  0x6e   :  { %v426_v56 = vadd.f32 %v425_v45, %v423_v36 }
  0x70   :  { %v431_v11 = vadd.f32 %v430_v30, %v426_v56 }
  0x72   :  { %v432_v4 = vand.u32 2147483647, %v431_v11 }
  0x74   :  { %v434_v61 = vsel %vm433_vm12, %v432_v4, 0.0 }
  0x75   :  { %435 = vadd.xlane.f32.xlu0 %v434_v61 }
  0xe8   :  { %v436_v31 = vpop.xlane.xlu0 %435 }
  0xe9   :  { %v459_v28 = vadd.f32 -2.0, %v436_v31 }
  0xeb   :  { %v439_v40 = vand.u32 2147483647, %v459_v28  ;;  %v438_v57 = vmax.f32 %v459_v28, 0.0 }
  0xed   :  { %v440_v27 = vsub.f32 0.0, %v439_v40 }
  0xef   :  { %v441_v13 = vmul.f32 1.442695, %v440_v27 }
  0xf1   :  { %496 = vpow2.f32 %v441_v13 }
  0xf7   :  { %v497_v51 = vpop.eup %496 }
  0xf8   :  { %v443_v53 = vadd.f32 1.0, %v497_v51 }
  0xfa   :  { %498 = vlog2.f32 %v443_v53 }
 0x100   :  { %v499_v26 = vpop.eup %498 }
 0x101   :  { %v445_v3 = vmul.f32 0.6931472, %v499_v26 }
 0x103   :  { %v446_v48 = vadd.f32 %v445_v3, %v438_v57 }
 0x105   :  { %448 = vst.msk [vmem:[%s1044_s4] sm:$0xff] %vm447_vm13, %v446_v48 }

// kernel: embedding_loss_betae.3
= control target key start
LH: loop header
LB: loop body
LE: loop exit
PB: predicated region body
PF: predicated region fallthrough
CT: control target
= control target key end

     0   :  { %s4139_s0 = inlined_call_operand.vmem [shape: f32[32,32], index: 0, kind: input, shape index: {}]   ;;  %s4140_s1 = inlined_call_operand.vmem [shape: f32[32,32], index: 1, kind: input, shape index: {}]   ;;  %s4141_s2 = inlined_call_operand.vmem [shape: f32[32,32], index: 2, kind: input, shape index: {}]   ;;  %s4142_s3 = inlined_call_operand.vmem [shape: f32[32,32], index: 3, kind: input, shape index: {}]   ;;  %s4143_s4 = inlined_call_operand.vmem [shape: f32[32,1], index: 4, kind: output, shape index: {}]  }
   0x1   :  { %v1969_v0 = vld [vmem:[%s4139_s0 + $0x10] sm:$0xff] }
   0x2   :  { %4199 = vst [vmem:[#allocation2_spill] sm:$0xff] %v1969_v0  ;;  %v1974_v1 = vld [vmem:[%s4140_s1 + $0x10] sm:$0xff]  ;;  %v1977_v2 = vadd.f32 8.0, %v1969_v0  ;;  %v711_v61 = vadd.f32 6.0, %v1969_v0 }
   0x3   :  { %4200 = vst [vmem:[#allocation3_spill] sm:$0xff] %v1974_v1  ;;  %v1980_v3 = vadd.f32 8.0, %v1974_v1  ;;  %v1985_v4 = vld [vmem:[%s4141_s2 + $0x10] sm:$0xff]  ;;  %v1993_v6 = vadd.f32 %v1974_v1, %v1969_v0 }
   0x4   :  { %1775 = vrcp.f32 %v1977_v2  ;;  %v1989_v5 = vadd.f32 8.0, %v1985_v4  ;;  %v2002_v8 = vld [vmem:[%s4142_s3 + $0x10] sm:$0xff]  ;;  %v84_v23 = vand.u32 2147483647, %v1977_v2  ;;  %v86_v24 = vand.u32 2147483648, %v1977_v2 }
   0x5   :  { %1777 = vrcp.f32 %v1980_v3  ;;  %v1997_v7 = vadd.f32 8.0, %v1993_v6  ;;  %v2007_v9 = vadd.f32 8.0, %v2002_v8  ;;  %v2030_v22 = vadd.f32 %v2002_v8, %v1985_v4 }
   0x6   :  { %1779 = vrcp.f32 %v1989_v5  ;;  %vm80_vm0 = vweird.f32 %v1977_v2  ;;  %v192_v28 = vand.u32 2147483647, %v1980_v3  ;;  %v194_v29 = vand.u32 2147483648, %v1980_v3 }
   0x7   :  { %1781 = vrcp.f32 %v1997_v7  ;;  %vm188_vm2 = vweird.f32 %v1980_v3  ;;  %vm2045_vm4 = vcmp.eq.f32.partialorder %v84_v23, 8.507059e+37  ;;  %v87_v34 = vor.u32 1.1754944e-38, %v86_v24 }
   0x8   :  { %1783 = vrcp.f32 %v2007_v9  ;;  %vm404_vm5 = vweird.f32 %v1989_v5  ;;  %v2060_v38 = vadd.f32 8.0, %v2030_v22  ;;  %vm2066_vm9 = vcmp.eq.f32.partialorder %v192_v28, 8.507059e+37 }
   0x9   :  { %v195_v41 = vor.u32 1.1754944e-38, %v194_v29  ;;  %v410_v43 = vand.u32 2147483648, %v1989_v5  ;;  %v408_v45 = vand.u32 2147483647, %v1989_v5  ;;  %vm296_vm10 = vweird.f32 %v1997_v7 }
   0xa   :  { %v2009_v10 = vpop.eup %1775  ;;  %1785 = vrcp.f32 %v2060_v38  ;;  %v300_v47 = vand.u32 2147483647, %v1997_v7  ;;  %v302_v48 = vand.u32 2147483648, %v1997_v7  ;;  %vm512_vm13 = vweird.f32 %v2007_v9 }
   0xb   :  { %v2011_v11 = vpop.eup %1777  ;;  %v76_v12 = vmul.f32 %v2009_v10, %v1977_v2  ;;  %vm81_vm1 = vweird.f32 %v2009_v10  ;;  %v411_v53 = vor.u32 1.1754944e-38, %v410_v43  ;;  %v518_v54 = vand.u32 2147483648, %v2007_v9 }
   0xc   :  { %v184_v13 = vmul.f32 %v2011_v11, %v1980_v3  ;;  %v2018_v14 = vpop.eup %1779  ;;  %vm189_vm3 = vweird.f32 %v2011_v11  ;;  %vm2053_vm6 = vmor %vm80_vm0, %vm81_vm1  ;;  %vm409_vm0 = vcmp.eq.f32.partialorder %v408_v45, 8.507059e+37  ;;  %v516_v58 = vand.u32 2147483647, %v2007_v9 }
   0xd   :  { %v2020_v15 = vpop.eup %1781  ;;  %v400_v16 = vmul.f32 %v2018_v14, %v1989_v5  ;;  %v77_v17 = vsub.f32 1.0, %v76_v12  ;;  %vm405_vm7 = vweird.f32 %v2018_v14  ;;  %vm2062_vm8 = vmor %vm188_vm2, %vm189_vm3  ;;  %1787 = vlog2.f32 %v1977_v2 }
   0xe   :  { %v185_v18 = vsub.f32 1.0, %v184_v13  ;;  %v292_v19 = vmul.f32 %v2020_v15, %v1997_v7  ;;  %v2026_v21 = vpop.eup %1783  ;;  %vm297_vm11 = vweird.f32 %v2020_v15  ;;  %vm2084_vm12 = vmor %vm404_vm5, %vm405_vm7  ;;  %vm301_vm2 = vcmp.eq.f32.partialorder %v300_v47, 8.507059e+37 }
   0xf   :  { %v401_v20 = vsub.f32 1.0, %v400_v16  ;;  %v78_v25 = vmul.f32 %v2009_v10, %v77_v17  ;;  %v508_v27 = vmul.f32 %v2026_v21, %v2007_v9  ;;  %vm513_vm14 = vweird.f32 %v2026_v21  ;;  %vm2098_vm15 = vmor %vm296_vm10, %vm297_vm11 }
  0x10   :  { %v186_v26 = vmul.f32 %v2011_v11, %v185_v18  ;;  %v293_v30 = vsub.f32 1.0, %v292_v19  ;;  %vm2115_vm1 = vmor %vm512_vm13, %vm513_vm14  ;;  %v2119_v62 = vpop.eup %1785  ;;  %v303_v63 = vor.u32 1.1754944e-38, %v302_v48  ;;  %v519_v12 = vor.u32 1.1754944e-38, %v518_v54 }
  0x11   :  { %v402_v31 = vmul.f32 %v2018_v14, %v401_v20  ;;  %v509_v32 = vsub.f32 1.0, %v508_v27  ;;  %v79_v35 = vadd.f32 %v2009_v10, %v78_v25  ;;  %v616_v13 = vmul.f32 %v2119_v62, %v2060_v38 }
  0x12   :  { %v187_v37 = vadd.f32 %v2011_v11, %v186_v26  ;;  %v294_v42 = vmul.f32 %v2020_v15, %v293_v30  ;;  %vm517_vm3 = vcmp.eq.f32.partialorder %v516_v58, 8.507059e+37  ;;  %1789 = vlog2.f32 %v1980_v3 }
  0x13   :  { %v403_v44 = vadd.f32 %v2018_v14, %v402_v31  ;;  %v510_v46 = vmul.f32 %v2026_v21, %v509_v32  ;;  %v83_v50 = vsel %vm2053_vm6, %v2009_v10, %v79_v35  ;;  %v617_v19 = vsub.f32 1.0, %v616_v13  ;;  %v1788_v23 = vpop.eup %1787 }
  0x14   :  { %v191_v51 = vsel %vm2062_vm8, %v2011_v11, %v187_v37  ;;  %v295_v52 = vadd.f32 %v2020_v15, %v294_v42  ;;  %v2109_v59 = vsel %vm2045_vm4, %v87_v34, %v83_v50  ;;  %1791 = vlog2.f32 %v1997_v7 }
  0x15   :  { %v407_v56 = vsel %vm2084_vm12, %v2018_v14, %v403_v44  ;;  %v511_v57 = vadd.f32 %v2026_v21, %v510_v46  ;;  %v2113_v60 = vsel %vm2066_vm9, %v195_v41, %v191_v51  ;;  %v2131_v14 = vmul.f32 %v2109_v59, %v2109_v59 }
  0x16   :  { %v299_v10 = vsel %vm2098_vm15, %v2020_v15, %v295_v52  ;;  %v2125_v11 = vsel %vm409_vm0, %v411_v53, %v407_v56  ;;  %v2135_v16 = vmul.f32 %v2113_v60, %v2113_v60  ;;  %v618_v28 = vmul.f32 %v2119_v62, %v617_v19 }
  0x17   :  { %v515_v17 = vsel %vm2115_vm1, %v2026_v21, %v511_v57  ;;  %v2141_v15 = vsel %vm301_vm2, %v303_v63, %v299_v10  ;;  %v439_v18 = vmul.f32 %v2125_v11, %v2125_v11  ;;  %v127_v24 = vmul.f32 0.0007936508, %v2131_v14 }
  0x18   :  { %4215 = vst [vmem:[#allocation4_spill] sm:$0xff] %v2141_v15  ;;  %v2146_v20 = vsel %vm517_vm3, %v519_v12, %v515_v17  ;;  %v235_v25 = vmul.f32 0.0007936508, %v2135_v16  ;;  %v2152_v21 = vmul.f32 %v2141_v15, %v2141_v15  ;;  %v2157_v29 = vmul.f32 0.6931472, %v1788_v23  ;;  %v1790_v32 = vpop.eup %1789 }
  0x19   :  { %v451_v26 = vmul.f32 0.0007936508, %v439_v18  ;;  %v547_v27 = vmul.f32 %v2146_v20, %v2146_v20  ;;  %v1749_v30 = vadd.f32 -0.5, %v1977_v2  ;;  %1793 = vlog2.f32 %v1989_v5 }
  0x1a   :  { %4216 = vst [vmem:[#allocation5_spill] sm:$0xff] %v2152_v21  ;;  %v691_v31 = vadd.f32 1.0, %v1969_v0  ;;  %v131_v33 = vsub.f32 0.0027777778, %v127_v24  ;;  %v239_v34 = vsub.f32 0.0027777778, %v235_v25  ;;  %vm620_vm4 = vweird.f32 %v2060_v38  ;;  %v1792_v35 = vpop.eup %1791 }
  0x1b   :  { %4217 = vst [vmem:[#allocation6_spill] sm:$0xff] %v2157_v29  ;;  %vm621_vm5 = vweird.f32 %v2119_v62  ;;  %v343_v36 = vmul.f32 0.0007936508, %v2152_v21  ;;  %v624_v37 = vand.u32 2147483647, %v2060_v38  ;;  %v626_v39 = vand.u32 2147483648, %v2060_v38 }
  0x1c   :  { %v695_v2 = vadd.f32 2.0, %v1969_v0  ;;  %v1753_v40 = vadd.f32 -0.5, %v1980_v3  ;;  %v455_v41 = vsub.f32 0.0027777778, %v451_v26  ;;  %v559_v42 = vmul.f32 0.0007936508, %v547_v27  ;;  %vm2176_vm6 = vmor %vm620_vm4, %vm621_vm5 }
  0x1d   :  { %v619_v43 = vadd.f32 %v2119_v62, %v618_v28  ;;  %v123_v44 = vmul.f32 %v1749_v30, %v2157_v29  ;;  %v1757_v45 = vadd.f32 -0.5, %v1997_v7  ;;  %v1761_v46 = vadd.f32 -0.5, %v1989_v5 }
  0x1e   :  { %1795 = vlog2.f32 %v2007_v9  ;;  %v135_v3 = vmul.f32 %v131_v33, %v2131_v14  ;;  %v2181_v48 = vmul.f32 0.6931472, %v1790_v32  ;;  %v243_v49 = vmul.f32 %v239_v34, %v2135_v16 }
  0x1f   :  { %v2184_v50 = vmul.f32 0.6931472, %v1792_v35  ;;  %v1794_v51 = vpop.eup %1793  ;;  %v347_v7 = vsub.f32 0.0027777778, %v343_v36  ;;  %vm2186_vm7 = vcmp.eq.f32.partialorder %v624_v37, 8.507059e+37  ;;  %v627_v52 = vor.u32 1.1754944e-38, %v626_v39 }
  0x20   :  { %4220 = vst [vmem:[#allocation7_spill] sm:$0xff] %v2181_v48  ;;  %1797 = vlog2.f32 %v2060_v38  ;;  %v459_v53 = vmul.f32 %v455_v41, %v439_v18  ;;  %v563_v54 = vsub.f32 0.0027777778, %v559_v42  ;;  %v623_v55 = vsel %vm2176_vm6, %v2119_v62, %v619_v43 }
  0x21   :  { %4221 = vst [vmem:[#allocation8_spill] sm:$0xff] %v2184_v50  ;;  %v699_v56 = vadd.f32 3.0, %v1969_v0  ;;  %v703_v57 = vadd.f32 4.0, %v1969_v0  ;;  %v707_v58 = vadd.f32 5.0, %v1969_v0  ;;  %v715_v63 = vadd.f32 7.0, %v1969_v0 }
  0x22   :  { %v139_v10 = vsub.f32 0.083333336, %v135_v3  ;;  %v231_v12 = vmul.f32 %v1753_v40, %v2181_v48  ;;  %v2201_v13 = vmul.f32 %v1757_v45, %v2184_v50  ;;  %v1765_v17 = vadd.f32 -0.5, %v2007_v9 }
  0x23   :  { %v247_v62 = vsub.f32 0.083333336, %v243_v49  ;;  %v351_v19 = vmul.f32 %v347_v7, %v2152_v21  ;;  %v434_v23 = vmul.f32 0.6931472, %v1794_v51  ;;  %v2207_v24 = vsel %vm2186_vm7, %v627_v52, %v623_v55 }
  0x24   :  { %v1796_v18 = vpop.eup %1795  ;;  %v463_v25 = vsub.f32 0.083333336, %v459_v53  ;;  %v567_v26 = vmul.f32 %v563_v54, %v547_v27  ;;  %v719_v28 = vmul.f32 %v691_v31, %v1969_v0  ;;  %v723_v30 = vadd.f32 %v691_v31, %v1969_v0 }
  0x25   :  { %v727_v33 = vmul.f32 %v699_v56, %v695_v2  ;;  %v731_v34 = vadd.f32 %v699_v56, %v695_v2  ;;  %v735_v35 = vmul.f32 %v707_v58, %v703_v57  ;;  %v743_v9 = vmul.f32 %v715_v63, %v711_v61 }
  0x26   :  { %v1798_v32 = vpop.eup %1797  ;;  %v143_v36 = vmul.f32 %v139_v10, %v2109_v59  ;;  %v542_v37 = vmul.f32 0.6931472, %v1796_v18  ;;  %v655_v39 = vmul.f32 %v2207_v24, %v2207_v24  ;;  %v739_v40 = vadd.f32 %v707_v58, %v703_v57 }
  0x27   :  { %v251_v41 = vmul.f32 %v247_v62, %v2113_v60  ;;  %v447_v42 = vmul.f32 %v1761_v46, %v434_v23  ;;  %v1769_v27 = vadd.f32 -0.5, %v2060_v38  ;;  %v747_v43 = vadd.f32 %v715_v63, %v711_v61 }
  0x28   :  { %v355_v45 = vsub.f32 0.083333336, %v351_v19  ;;  %v467_v31 = vmul.f32 %v463_v25, %v2125_v11  ;;  %v571_v47 = vsub.f32 0.083333336, %v567_v26  ;;  %v650_v2 = vmul.f32 0.6931472, %v1798_v32 }
  0x29   :  { %v2217_v3 = vmul.f32 %v727_v33, %v719_v28  ;;  %v755_v49 = vmul.f32 %v727_v33, %v723_v30  ;;  %v759_v51 = vmul.f32 %v731_v34, %v719_v28  ;;  %v2219_v7 = vmul.f32 %v743_v9, %v735_v35 }
  0x2a   :  { %v2221_v5 = vadd.f32 %v143_v36, %v123_v44  ;;  %v2223_v52 = vmul.f32 %v1765_v17, %v542_v37  ;;  %v667_v53 = vmul.f32 0.0007936508, %v655_v39  ;;  %v771_v46 = vmul.f32 %v743_v9, %v739_v40 }
  0x2b   :  { %v775_v54 = vmul.f32 %v747_v43, %v735_v35  ;;  %v799_v38 = vadd.f32 1.0, %v1974_v1  ;;  %v803_v55 = vadd.f32 2.0, %v1974_v1  ;;  %v807_v11 = vadd.f32 3.0, %v1974_v1 }
  0x2c   :  { %4224 = vst [vmem:[#allocation9_spill] sm:$0xff] %v2221_v5  ;;  %v2228_v56 = vadd.f32 %v251_v41, %v231_v12  ;;  %v2231_v57 = vmul.f32 %v355_v45, %v2141_v15  ;;  %v2233_v58 = vadd.f32 %v467_v31, %v447_v42  ;;  %v2236_v44 = vmul.f32 %v571_v47, %v2146_v20 }
  0x2d   :  { %v2238_v61 = vmul.f32 %v1769_v27, %v650_v2  ;;  %v2240_v63 = vadd.f32 %v759_v51, %v755_v49  ;;  %v2244_v10 = vmul.f32 %v2219_v7, %v2217_v3  ;;  %v811_v17 = vadd.f32 4.0, %v1974_v1 }
  0x2e   :  { %4225 = vst [vmem:[#allocation10_spill] sm:$0xff] %v2228_v56  ;;  %v671_v12 = vsub.f32 0.0027777778, %v667_v53  ;;  %v815_v18 = vadd.f32 5.0, %v1974_v1  ;;  %v819_v62 = vadd.f32 6.0, %v1974_v1  ;;  %v823_v19 = vadd.f32 7.0, %v1974_v1 }
  0x2f   :  { %4226 = vst [vmem:[#allocation11_spill] sm:$0xff] %v2233_v58  ;;  %v2250_v23 = vadd.f32 %v775_v54, %v771_v46  ;;  %v827_v20 = vmul.f32 %v799_v38, %v1974_v1  ;;  %v831_v25 = vadd.f32 %v799_v38, %v1974_v1  ;;  %v835_v26 = vmul.f32 %v807_v11, %v803_v55 }
  0x30   :  { %v839_v28 = vadd.f32 %v807_v11, %v803_v55  ;;  %v907_v30 = vadd.f32 1.0, %v1993_v6  ;;  %v911_v32 = vadd.f32 2.0, %v1993_v6  ;;  %v915_v33 = vadd.f32 3.0, %v1993_v6 }
  0x31   :  { %v919_v34 = vadd.f32 4.0, %v1993_v6  ;;  %v923_v35 = vadd.f32 5.0, %v1993_v6  ;;  %v927_v9 = vadd.f32 6.0, %v1993_v6  ;;  %v931_v36 = vadd.f32 7.0, %v1993_v6 }
  0x32   :  { %v2261_v37 = vmul.f32 %v671_v12, %v655_v39  ;;  %v843_v40 = vmul.f32 %v815_v18, %v811_v17  ;;  %v847_v41 = vadd.f32 %v815_v18, %v811_v17  ;;  %v851_v42 = vmul.f32 %v823_v19, %v819_v62 }
  0x33   :  { %v1127_v27 = vadd.f32 1.0, %v2030_v22  ;;  %v1135_v43 = vadd.f32 2.0, %v2030_v22  ;;  %v1139_v45 = vadd.f32 3.0, %v2030_v22  ;;  %v1151_v31 = vadd.f32 4.0, %v2030_v22 }
  0x34   :  { %v855_v47 = vadd.f32 %v823_v19, %v819_v62  ;;  %v1155_v2 = vadd.f32 5.0, %v2030_v22  ;;  %v1163_v49 = vadd.f32 6.0, %v2030_v22  ;;  %v1167_v51 = vadd.f32 7.0, %v2030_v22 }
  0x35   :  { %v935_v39 = vmul.f32 %v907_v30, %v1993_v6  ;;  %v943_v53 = vmul.f32 %v915_v33, %v911_v32  ;;  %v951_v46 = vmul.f32 %v923_v35, %v919_v34  ;;  %v959_v54 = vmul.f32 %v931_v36, %v927_v9 }
  0x36   :  { %v2271_v38 = vmul.f32 %v835_v26, %v827_v20  ;;  %v863_v55 = vmul.f32 %v835_v26, %v831_v25  ;;  %v867_v11 = vmul.f32 %v839_v28, %v827_v20  ;;  %v939_v17 = vadd.f32 %v907_v30, %v1993_v6 }
  0x37   :  { %v1131_v12 = vmul.f32 %v1127_v27, %v2030_v22  ;;  %v1143_v18 = vmul.f32 %v1139_v45, %v1135_v43  ;;  %v1159_v62 = vmul.f32 %v1155_v2, %v1151_v31  ;;  %v1171_v19 = vmul.f32 %v1167_v51, %v1163_v49 }
  0x38   :  { %v679_v1 = vsub.f32 0.083333336, %v2261_v37  ;;  %v875_v0 = vmul.f32 %v851_v42, %v843_v40  ;;  %v879_v50 = vmul.f32 %v851_v42, %v847_v41  ;;  %v883_v15 = vmul.f32 %v855_v47, %v843_v40 }
  0x39   :  { %v947_v56 = vadd.f32 %v915_v33, %v911_v32  ;;  %v955_v5 = vadd.f32 %v923_v35, %v919_v34  ;;  %v967_v58 = vmul.f32 %v943_v53, %v935_v39  ;;  %v983_v48 = vmul.f32 %v959_v54, %v951_v46 }
  0x3a   :  { %v963_v29 = vadd.f32 %v931_v36, %v927_v9  ;;  %v971_v21 = vmul.f32 %v943_v53, %v939_v17  ;;  %v1015_v20 = vadd.f32 1.0, %v1985_v4  ;;  %v1023_v6 = vadd.f32 2.0, %v1985_v4 }
  0x3b   :  { %v1027_v22 = vadd.f32 3.0, %v1985_v4  ;;  %v1039_v25 = vadd.f32 4.0, %v1985_v4  ;;  %v1147_v26 = vmul.f32 %v1143_v18, %v1131_v12  ;;  %v1175_v28 = vmul.f32 %v1171_v19, %v1159_v62 }
  0x3c   :  { %v1043_v30 = vadd.f32 5.0, %v1985_v4  ;;  %v1051_v37 = vadd.f32 6.0, %v1985_v4  ;;  %v1055_v32 = vadd.f32 7.0, %v1985_v4  ;;  %1799 = vrcp.f32 %v2244_v10 }
  0x3d   :  { %v2284_v33 = vmul.f32 %v983_v48, %v967_v58  ;;  %v1071_v34 = vadd.f32 1.0, %v2002_v8  ;;  %v1079_v35 = vadd.f32 2.0, %v2002_v8  ;;  %v1083_v9 = vadd.f32 3.0, %v2002_v8 }
  0x3e   :  { %v1095_v36 = vadd.f32 4.0, %v2002_v8  ;;  %v1099_v40 = vadd.f32 5.0, %v2002_v8  ;;  %v1107_v41 = vadd.f32 6.0, %v2002_v8  ;;  %v1111_v42 = vadd.f32 7.0, %v2002_v8 }
  0x3f   :  { %v975_v27 = vmul.f32 %v947_v56, %v935_v39  ;;  %v987_v43 = vmul.f32 %v959_v54, %v955_v5  ;;  %v991_v45 = vmul.f32 %v963_v29, %v951_v46  ;;  %v2293_v31 = vmul.f32 %v1175_v28, %v1147_v26 }
  0x40   :  { %v1019_v47 = vmul.f32 %v1015_v20, %v1985_v4  ;;  %v1031_v2 = vmul.f32 %v1027_v22, %v1023_v6  ;;  %v1047_v49 = vmul.f32 %v1043_v30, %v1039_v25  ;;  %v1059_v51 = vmul.f32 %v1055_v32, %v1051_v37 }
  0x41   :  { %v787_v53 = vmul.f32 %v2219_v7, %v2240_v63  ;;  %v791_v17 = vmul.f32 %v2250_v23, %v2217_v3  ;;  %v871_v12 = vadd.f32 %v867_v11, %v863_v55  ;;  %1801 = vrcp.f32 %v2284_v33 }
  0x42   :  { %v2301_v18 = vpop.eup %1799  ;;  %v1075_v29 = vmul.f32 %v1071_v34, %v2002_v8  ;;  %v1087_v5 = vmul.f32 %v1083_v9, %v1079_v35  ;;  %v1103_v56 = vmul.f32 %v1099_v40, %v1095_v36  ;;  %v1115_v39 = vmul.f32 %v1111_v42, %v1107_v41  ;;  %v4228_v41 = vld [vmem:[#allocation6_spill] sm:$0xff] }
  0x43   :  { %v683_v46 = vmul.f32 %v679_v1, %v2207_v24  ;;  %v887_v54 = vadd.f32 %v883_v15, %v879_v50  ;;  %v2306_v62 = vmul.f32 %v875_v0, %v2271_v38  ;;  %1803 = vrcp.f32 %v2293_v31 }
  0x44   :  { %v979_v7 = vadd.f32 %v975_v27, %v971_v21  ;;  %v995_v3 = vadd.f32 %v991_v45, %v987_v43  ;;  %v1035_v63 = vmul.f32 %v1031_v2, %v1019_v47  ;;  %v1063_v23 = vmul.f32 %v1059_v51, %v1047_v49  ;;  %v2364_v45 = vld [vmem:[%s4139_s0] sm:$0xff] }
  0x45   :  { %v2311_v55 = vadd.f32 %v2231_v57, %v2201_v13  ;;  %v1191_v11 = vmul.f32 0.003968254, %v2131_v14  ;;  %v1244_v19 = vmul.f32 %v2301_v18, %v2244_v10  ;;  %v1287_v1 = vmul.f32 0.003968254, %v2135_v16 }
  0x46   :  { %v2319_v15 = vadd.f32 %v2236_v44, %v2223_v52  ;;  %v2321_v50 = vadd.f32 %v791_v17, %v787_v53  ;;  %v1091_v21 = vmul.f32 %v1087_v5, %v1075_v29  ;;  %v1119_v24 = vmul.f32 %v1115_v39, %v1103_v56  ;;  %v4231_v17 = vld [vmem:[#allocation7_spill] sm:$0xff] }
  0x47   :  { %v2323_v20 = vpop.eup %1801  ;;  %v2326_v13 = vadd.f32 %v683_v46, %v2238_v61  ;;  %v2328_v57 = vmul.f32 %v875_v0, %v871_v12  ;;  %v2331_v6 = vmul.f32 %v887_v54, %v2271_v38  ;;  %1805 = vrcp.f32 %v2306_v62  ;;  %v2388_v54 = vld [vmem:[%s4140_s1] sm:$0xff] }
  0x48   :  { %v2334_v22 = vmul.f32 %v983_v48, %v979_v7  ;;  %v2336_v52 = vmul.f32 %v995_v3, %v967_v58  ;;  %v1067_v44 = vmul.f32 %v1063_v23, %v1035_v63  ;;  %v2339_v25 = vmul.f32 0.5, %v2109_v59  ;;  %v4227_v59 = vld [vmem:[#allocation5_spill] sm:$0xff] }
  0x49   :  { %v1804_v26 = vpop.eup %1803  ;;  %v1195_v28 = vsub.f32 0.008333334, %v1191_v11  ;;  %v1245_v30 = vsub.f32 1.0, %v1244_v19  ;;  %vm1248_vm8 = vweird.f32 %v2244_v10  ;;  %v1291_v0 = vsub.f32 0.008333334, %v1287_v1 }
  0x4a   :  { %v1123_v61 = vmul.f32 %v1119_v24, %v1091_v21  ;;  %v1252_v38 = vand.u32 2147483647, %v2244_v10  ;;  %v1436_v37 = vmul.f32 %v2323_v20, %v2284_v33  ;;  %v1528_v48 = vmul.f32 %v1804_v26, %v2293_v31 }
  0x4b   :  { %v1254_v58 = vand.u32 2147483648, %v2244_v10  ;;  %v2348_v32 = vmul.f32 0.5, %v2113_v60  ;;  %v1383_v34 = vmul.f32 0.003968254, %v4227_v59  ;;  %v1538_v35 = vand.u32 2147483648, %v2293_v31 }
  0x4c   :  { %v1529_v9 = vsub.f32 1.0, %v1528_v48  ;;  %vm1532_vm9 = vweird.f32 %v2293_v31  ;;  %vm1533_vm10 = vweird.f32 %v1804_v26  ;;  %v1536_v36 = vand.u32 2147483647, %v2293_v31 }
  0x4d   :  { %v2354_v40 = vpop.eup %1805  ;;  %v1187_v42 = vsub.f32 %v4228_v41, %v2339_v25  ;;  %v1199_v27 = vmul.f32 %v1195_v28, %v2131_v14  ;;  %v1246_v60 = vmul.f32 %v2301_v18, %v1245_v30  ;;  %v1295_v43 = vmul.f32 %v1291_v0, %v2135_v16  ;;  %vm2378_vm12 = vmor %vm1532_vm9, %vm1533_vm10 }
  0x4e   :  { %vm2366_vm11 = vcmp.eq.f32.partialorder %v1252_v38, 8.507059e+37  ;;  %v1437_v2 = vsub.f32 1.0, %v1436_v37  ;;  %v1530_v49 = vmul.f32 %v1804_v26, %v1529_v9  ;;  %v2371_v51 = vadd.f32 8.0, %v2364_v45  ;;  %v4236_v37 = vld [vmem:[#allocation11_spill] sm:$0xff] }
  0x4f   :  { %v1255_v53 = vor.u32 1.1754944e-38, %v1254_v58  ;;  %v1283_v12 = vsub.f32 %v4231_v17, %v2348_v32  ;;  %v1387_v29 = vsub.f32 0.008333334, %v1383_v34  ;;  %v1539_v56 = vor.u32 1.1754944e-38, %v1538_v35  ;;  %v4237_v58 = vld [vmem:[#allocation9_spill] sm:$0xff]  ;;  %v4238_v34 = vld [vmem:[#allocation10_spill] sm:$0xff] }
  0x50   :  { %vm1249_vm13 = vweird.f32 %v2301_v18  ;;  %v1340_v39 = vmul.f32 %v2354_v40, %v2306_v62  ;;  %v1531_v46 = vadd.f32 %v1804_v26, %v1530_v49  ;;  %vm1537_vm14 = vcmp.eq.f32.partialorder %v1536_v36, 8.507059e+37 }
  0x51   :  { %v1203_v7 = vsub.f32 0.083333336, %v1199_v27  ;;  %v1247_v31 = vadd.f32 %v2301_v18, %v1246_v60  ;;  %v1299_v3 = vsub.f32 0.083333336, %v1295_v43  ;;  %v1348_v63 = vand.u32 2147483647, %v2306_v62  ;;  %vm2402_vm0 = vmor %vm1248_vm8, %vm1249_vm13 }
  0x52   :  { %vm1344_vm15 = vweird.f32 %v2306_v62  ;;  %v1438_v23 = vmul.f32 %v2323_v20, %v1437_v2  ;;  %v1535_v11 = vsel %vm2378_vm12, %v1804_v26, %v1531_v46  ;;  %1807 = vrcp.f32 %v2371_v51  ;;  %v4239_v43 = vld [vmem:[#allocation4_spill] sm:$0xff] }
  0x53   :  { %v2398_v19 = vadd.f32 8.0, %v2388_v54  ;;  %v1391_v21 = vmul.f32 %v1387_v29, %v4227_v59  ;;  %vm1440_vm1 = vweird.f32 %v2284_v33  ;;  %v1540_v24 = vsel %vm1537_vm14, %v1539_v56, %v1535_v11 }
  0x54   :  { %v2410_v28 = vadd.f32 %v2388_v54, %v2364_v45  ;;  %v1341_v26 = vsub.f32 1.0, %v1340_v39  ;;  %vm1441_vm2 = vweird.f32 %v2323_v20  ;;  %v1444_v30 = vand.u32 2147483647, %v2284_v33  ;;  %v2455_v39 = vld [vmem:[%s4141_s2] sm:$0xff] }
  0x55   :  { %v1541_v0 = vmul.f32 %v1540_v24, %v1067_v44  ;;  %v1446_v38 = vand.u32 2147483648, %v2284_v33  ;;  %v1471_v48 = vadd.f32 %v2319_v15, %v4236_v37  ;;  %v1479_v35 = vadd.f32 %v4238_v34, %v4237_v58  ;;  %vm2436_vm3 = vmor %vm1440_vm1, %vm1441_vm2  ;;  %v2515_v24 = vld [vmem:[%s4142_s3] sm:$0xff] }
  0x56   :  { %v2420_v9 = vadd.f32 8.0, %v2410_v28  ;;  %v1251_v36 = vsel %vm2402_vm0, %v2301_v18, %v1247_v31  ;;  %v1439_v27 = vadd.f32 %v2323_v20, %v1438_v23  ;;  %1809 = vrcp.f32 %v2398_v19 }
  0x57   :  { %v2426_v60 = vmul.f32 %v1541_v0, %v1123_v61  ;;  %v1207_v44 = vmul.f32 %v1203_v7, %v2131_v14  ;;  %v1350_v15 = vand.u32 2147483648, %v2306_v62  ;;  %v1375_v2 = vmul.f32 0.5, %v4239_v43  ;;  %v4244_v7 = vld [vmem:[#allocation8_spill] sm:$0xff] }
  0x58   :  { %v1395_v49 = vsub.f32 0.083333336, %v1391_v21  ;;  %v2440_v18 = vpop.eup %1807  ;;  %v1303_v61 = vmul.f32 %v1299_v3, %v2135_v16  ;;  %v1342_v5 = vmul.f32 %v2354_v40, %v1341_v26  ;;  %vm1345_vm4 = vweird.f32 %v2354_v40 }
  0x59   :  { %1811 = vrcp.f32 %v2426_v60  ;;  %v1256_v14 = vsel %vm2366_vm11, %v1255_v53, %v1251_v36  ;;  %vm2448_vm5 = vcmp.eq.f32.partialorder %v1444_v30, 8.507059e+37  ;;  %v1447_v33 = vor.u32 1.1754944e-38, %v1446_v38  ;;  %vm2489_vm6 = vmor %vm1344_vm15, %vm1345_vm4 }
  0x5a   :  { %1813 = vrcp.f32 %v2420_v9  ;;  %v1443_v16 = vsel %vm2436_vm3, %v2323_v20, %v1439_v27  ;;  %v1475_v46 = vsub.f32 %v1471_v48, %v2326_v13  ;;  %v1483_v47 = vsub.f32 %v1479_v35, %v2311_v55 }
  0x5b   :  { %v2464_v53 = vadd.f32 8.0, %v2455_v39  ;;  %v1379_v31 = vsub.f32 %v4244_v7, %v1375_v2  ;;  %v1399_v3 = vmul.f32 %v1395_v49, %v4227_v59  ;;  %v46_v23 = vmul.f32 %v2440_v18, %v2371_v51 }
  0x5c   :  { %v2470_v11 = vpop.eup %1809  ;;  %v2475_v20 = vsub.f32 %v1187_v42, %v1207_v44  ;;  %v2478_v13 = vmul.f32 %v1256_v14, %v2321_v50  ;;  %v1343_v55 = vadd.f32 %v2354_v40, %v1342_v5  ;;  %v903_v1 = vadd.f32 %v2331_v6, %v2328_v57 }
  0x5d   :  { %v1011_v59 = vadd.f32 %v2336_v52, %v2334_v22  ;;  %vm2493_vm7 = vcmp.eq.f32.partialorder %v1348_v63, 8.507059e+37  ;;  %v1448_v50 = vsel %vm2448_vm5, %v1447_v33, %v1443_v16  ;;  %v2502_v57 = vsub.f32 %v1283_v12, %v1303_v61 }
  0x5e   :  { %v1351_v6 = vor.u32 1.1754944e-38, %v1350_v15  ;;  %v2504_v22 = vsub.f32 %v1475_v46, %v1483_v47  ;;  %1815 = vrcp.f32 %v2464_v53  ;;  %v2509_v42 = vsub.f32 %v1379_v31, %v1399_v3 }
  0x5f   :  { %v1812_v41 = vpop.eup %1811  ;;  %v47_v26 = vsub.f32 1.0, %v46_v23  ;;  %v154_v32 = vmul.f32 %v2470_v11, %v2398_v19  ;;  %v1275_v17 = vsub.f32 %v2475_v20, %v2478_v13  ;;  %v1347_v12 = vsel %vm2489_vm6, %v2354_v40, %v1343_v55 }
  0x60   :  { %v2507_v52 = vpop.eup %1813  ;;  %v1592_v63 = vmul.f32 %v1812_v41, %v2426_v60  ;;  %v1491_v30 = vmul.f32 %v1448_v50, %v2244_v10  ;;  %v1602_v0 = vand.u32 2147483648, %v2426_v60  ;;  %vm1596_vm8 = vweird.f32 %v2426_v60 }
  0x61   :  { %vm1597_vm9 = vweird.f32 %v1812_v41  ;;  %v1600_v37 = vand.u32 2147483647, %v2426_v60  ;;  %v2530_v48 = vadd.f32 %v2515_v24, %v2455_v39  ;;  %v54_v58 = vand.u32 2147483647, %v2371_v51 }
  0x62   :  { %v1593_v38 = vsub.f32 1.0, %v1592_v63  ;;  %v262_v34 = vmul.f32 %v2507_v52, %v2420_v9  ;;  %v2536_v40 = vadd.f32 8.0, %v2515_v24  ;;  %v1352_v10 = vsel %vm2493_vm7, %v1351_v6, %v1347_v12  ;;  %vm2543_vm10 = vmor %vm1596_vm8, %vm1597_vm9 }
  0x63   :  { %v48_v36 = vmul.f32 %v2440_v18, %v47_v26  ;;  %v155_v27 = vsub.f32 1.0, %v154_v32  ;;  %v1603_v15 = vor.u32 1.1754944e-38, %v1602_v0  ;;  %vm50_vm11 = vweird.f32 %v2371_v51  ;;  %v4256_v26 = vld [vmem:[#allocation3_spill] sm:$0xff] }
  0x64   :  { %v1594_v35 = vmul.f32 %v1812_v41, %v1593_v38  ;;  %v2541_v60 = vpop.eup %1815  ;;  %v56_v43 = vand.u32 2147483648, %v2371_v51  ;;  %1817 = vrcp.f32 %v2536_v40  ;;  %v1495_v2 = vmul.f32 %v1491_v30, %v2306_v62 }
  0x65   :  { %vm1601_vm12 = vcmp.eq.f32.partialorder %v1600_v37, 8.507059e+37  ;;  %vm51_vm13 = vweird.f32 %v2440_v18  ;;  %v2552_v29 = vmul.f32 %v1352_v10, %v903_v1  ;;  %vm2554_vm14 = vcmp.eq.f32.partialorder %v54_v58, 8.507059e+37  ;;  %v4255_v1 = vld [vmem:[#allocation2_spill] sm:$0xff] }
  0x66   :  { %v1595_v49 = vadd.f32 %v1812_v41, %v1594_v35  ;;  %vm158_vm15 = vweird.f32 %v2398_v19  ;;  %v263_v5 = vsub.f32 1.0, %v262_v34  ;;  %v49_v56 = vadd.f32 %v2440_v18, %v48_v36  ;;  %vm2567_vm0 = vmor %vm50_vm11, %vm51_vm13 }
  0x67   :  { %v156_v62 = vmul.f32 %v2470_v11, %v155_v27  ;;  %v370_v33 = vmul.f32 %v2541_v60, %v2464_v53  ;;  %v57_v47 = vor.u32 1.1754944e-38, %v56_v43  ;;  %v162_v7 = vand.u32 2147483647, %v2398_v19 }
  0x68   :  { %v1599_v14 = vsel %vm2543_vm10, %v1812_v41, %v1595_v49  ;;  %v164_v31 = vand.u32 2147483648, %v2398_v19  ;;  %v1449_v3 = vmul.f32 %v1448_v50, %v1011_v59  ;;  %vm159_vm1 = vweird.f32 %v2470_v11 }
  0x69   :  { %v1604_v16 = vsel %vm1601_vm12, %v1603_v15, %v1599_v14  ;;  %vm266_vm2 = vweird.f32 %v2420_v9  ;;  %v1635_v21 = vsub.f32 %v4255_v1, %v1985_v4  ;;  %v1659_v25 = vsub.f32 %v1985_v4, %v4255_v1  ;;  %vm2591_vm3 = vmor %vm158_vm15, %vm159_vm1 }
  0x6a   :  { %v1605_v23 = vmul.f32 %v1604_v16, %v1495_v2  ;;  %v2575_v55 = vpop.eup %1817  ;;  %v264_v41 = vmul.f32 %v2507_v52, %v263_v5  ;;  %v270_v6 = vand.u32 2147483647, %v2420_v9  ;;  %v53_v59 = vsel %vm2567_vm0, %v2440_v18, %v49_v56 }
  0x6b   :  { %v157_v50 = vadd.f32 %v2470_v11, %v156_v62  ;;  %v371_v63 = vsub.f32 1.0, %v370_v33  ;;  %v1663_v32 = vsub.f32 %v2002_v8, %v4256_v26  ;;  %vm267_vm4 = vweird.f32 %v2507_v52 }
  0x6c   :  { %1819 = vlog2.f32 %v1605_v23  ;;  %v478_v4 = vmul.f32 %v2575_v55, %v2536_v40  ;;  %v2599_v30 = vadd.f32 8.0, %v2530_v48  ;;  %v1371_v18 = vsub.f32 %v2502_v57, %v2552_v29  ;;  %vm2624_vm6 = vmor %vm266_vm2, %vm267_vm4 }
  0x6d   :  { %1821 = vlog2.f32 %v2371_v51  ;;  %vm2604_vm5 = vcmp.eq.f32.partialorder %v162_v7, 8.507059e+37  ;;  %v272_v38 = vand.u32 2147483648, %v2420_v9  ;;  %v2611_v37 = vsel %vm2554_vm14, %v57_v47, %v53_v59 }
  0x6e   :  { %v165_v58 = vor.u32 1.1754944e-38, %v164_v31  ;;  %v265_v34 = vadd.f32 %v2507_v52, %v264_v41  ;;  %1823 = vrcp.f32 %v2599_v30  ;;  %v1467_v10 = vsub.f32 %v2509_v42, %v1449_v3 }
  0x6f   :  { %v1639_v57 = vmul.f32 %v1635_v21, %v1275_v17  ;;  %v161_v35 = vsel %vm2591_vm3, %v2470_v11, %v157_v50  ;;  %v372_v27 = vmul.f32 %v2541_v60, %v371_v63  ;;  %v1647_v44 = vsub.f32 %v4256_v26, %v2002_v8 }
  0x70   :  { %v1667_v42 = vadd.f32 %v1663_v32, %v1659_v25  ;;  %vm2631_vm7 = vcmp.eq.f32.partialorder %v270_v6, 8.507059e+37  ;;  %v479_v20 = vsub.f32 1.0, %v478_v4  ;;  %v2637_v11 = vmul.f32 %v2611_v37, %v2611_v37 }
  0x71   :  { %v273_v17 = vor.u32 1.1754944e-38, %v272_v38  ;;  %vm374_vm8 = vweird.f32 %v2464_v53  ;;  %vm375_vm9 = vweird.f32 %v2541_v60  ;;  %v2643_v8 = vsel %vm2604_vm5, %v165_v58, %v161_v35 }
  0x72   :  { %v1820_v13 = vpop.eup %1819  ;;  %4265 = vst [vmem:[#allocation5_spill] sm:$0xff] %v2643_v8  ;;  %v269_v2 = vsel %vm2624_vm6, %v2507_v52, %v265_v34  ;;  %v380_v49 = vand.u32 2147483648, %v2464_v53  ;;  %1825 = vlog2.f32 %v2398_v19  ;;  %v373_v61 = vadd.f32 %v2541_v60, %v372_v27  ;;  %vm2655_vm10 = vmor %vm374_vm8, %vm375_vm9 }
  0x73   :  { %v1626_v43 = vmul.f32 0.6931472, %v1820_v13  ;;  %v1822_v29 = vpop.eup %1821  ;;  %v378_v5 = vand.u32 2147483647, %v2464_v53  ;;  %v1651_v62 = vmul.f32 %v1647_v44, %v1371_v18  ;;  %v1671_v33 = vmul.f32 %v1667_v42, %v1467_v10 }
  0x74   :  { %v2652_v14 = vpop.eup %1823  ;;  %v480_v52 = vmul.f32 %v2575_v55, %v479_v20  ;;  %v125_v46 = vmul.f32 0.0007936508, %v2637_v11  ;;  %v2663_v47 = vmul.f32 %v2643_v8, %v2643_v8  ;;  %v2667_v7 = vsel %vm2631_vm7, %v273_v17, %v269_v2 }
  0x75   :  { %v1631_v56 = vadd.f32 %v1626_v43, %v2504_v22  ;;  %4269 = vst [vmem:[#allocation7_spill] sm:$0xff] %v2667_v7  ;;  %v586_v22 = vmul.f32 %v2652_v14, %v2599_v30  ;;  %v381_v3 = vor.u32 1.1754944e-38, %v380_v49  ;;  %vm482_vm11 = vweird.f32 %v2536_v40 }
  0x76   :  { %4268 = vst [vmem:[#allocation6_spill] sm:$0xff] %v2663_v47  ;;  %vm483_vm12 = vweird.f32 %v2575_v55  ;;  %v377_v23 = vsel %vm2655_vm10, %v2541_v60, %v373_v61  ;;  %vm379_vm13 = vcmp.eq.f32.partialorder %v378_v5, 8.507059e+37  ;;  %v488_v1 = vand.u32 2147483648, %v2536_v40 }
  0x77   :  { %v1643_v31 = vadd.f32 %v1639_v57, %v1631_v56  ;;  %v587_v21 = vsub.f32 1.0, %v586_v22  ;;  %v2679_v41 = vmul.f32 %v2667_v7, %v2667_v7  ;;  %v481_v6 = vadd.f32 %v2575_v55, %v480_v52  ;;  %vm2686_vm14 = vmor %vm482_vm11, %vm483_vm12 }
  0x78   :  { %v486_v59 = vand.u32 2147483647, %v2536_v40  ;;  %v1826_v50 = vpop.eup %1825  ;;  %v2683_v63 = vmul.f32 0.6931472, %v1822_v29  ;;  %v233_v26 = vmul.f32 0.0007936508, %v2663_v47  ;;  %v2691_v4 = vsel %vm379_vm13, %v381_v3, %v377_v23 }
  0x79   :  { %v1655_v25 = vadd.f32 %v1651_v62, %v1643_v31  ;;  %4270 = vst [vmem:[#allocation11_spill] sm:$0xff] %v2679_v41  ;;  %vm1681_vm15 = vcmask 261120   ;;  %v1747_v12 = vadd.f32 -0.5, %v2371_v51  ;;  %v129_v18 = vsub.f32 0.0027777778, %v125_v46 }
  0x7a   :  { %4271 = vst [vmem:[#allocation9_spill] sm:$0xff] %v2683_v63  ;;  %1827 = vlog2.f32 %v2420_v9  ;;  %v489_v0 = vor.u32 1.1754944e-38, %v488_v1  ;;  %v588_v38 = vmul.f32 %v2652_v14, %v587_v21  ;;  %v341_v34 = vmul.f32 0.0007936508, %v2679_v41 }
  0x7b   :  { %v1675_v32 = vadd.f32 %v1671_v33, %v1655_v25  ;;  %v485_v10 = vsel %vm2686_vm14, %v2575_v55, %v481_v6  ;;  %vm487_vm0 = vcmp.eq.f32.partialorder %v486_v59, 8.507059e+37  ;;  %v237_v57 = vsub.f32 0.0027777778, %v233_v26 }
  0x7c   :  { %v437_v51 = vmul.f32 %v2691_v4, %v2691_v4  ;;  %vm590_vm1 = vweird.f32 %v2599_v30  ;;  %vm591_vm2 = vweird.f32 %v2652_v14  ;;  %v2704_v36 = vmul.f32 0.6931472, %v1826_v50 }
  0x7d   :  { %v1679_v58 = vand.u32 2147483647, %v1675_v32  ;;  %v1751_v27 = vadd.f32 -0.5, %v2398_v19  ;;  %v596_v44 = vand.u32 2147483648, %v2599_v30  ;;  %1829 = vlog2.f32 %v2464_v53  ;;  %vm2715_vm3 = vmor %vm590_vm1, %vm591_vm2 }
  0x7e   :  { %4274 = vst [vmem:[#allocation10_spill] sm:$0xff] %v2704_v36  ;;  %v2709_v55 = vsel %vm487_vm0, %v489_v0, %v485_v10  ;;  %v589_v42 = vadd.f32 %v2652_v14, %v588_v38  ;;  %v594_v15 = vand.u32 2147483647, %v2599_v30  ;;  %v133_v20 = vmul.f32 %v129_v18, %v2637_v11 }
  0x7f   :  { %v1688_v35 = vsel %vm1681_vm15, %v1679_v58, 0.0  ;;  %v345_v13 = vsub.f32 0.0027777778, %v341_v34  ;;  %1831 = vlog2.f32 %v2536_v40  ;;  %v241_v43 = vmul.f32 %v237_v57, %v2663_v47 }
  0x80   :  { %1689 = vadd.xlane.f32.xlu1 %v1688_v35  ;;  %v1828_v19 = vpop.eup %1827  ;;  %v449_v2 = vmul.f32 0.0007936508, %v437_v51  ;;  %1833 = vlog2.f32 %v2599_v30  ;;  %v545_v49 = vmul.f32 %v2709_v55, %v2709_v55  ;;  %v597_v29 = vor.u32 1.1754944e-38, %v596_v44 }
  0x81   :  { %v2724_v61 = vmul.f32 %v1747_v12, %v2683_v63  ;;  %v2727_v5 = vmul.f32 %v1751_v27, %v2704_v36  ;;  %v593_v56 = vsel %vm2715_vm3, %v2652_v14, %v589_v42  ;;  %vm595_vm4 = vcmp.eq.f32.partialorder %v594_v15, 8.507059e+37 }
  0x82   :  { %v137_v62 = vsub.f32 0.083333336, %v133_v20  ;;  %v2732_v33 = vmul.f32 0.6931472, %v1828_v19  ;;  %v1755_v16 = vadd.f32 -0.5, %v2420_v9  ;;  %v349_v52 = vmul.f32 %v345_v13, %v2679_v41 }
  0x83   :  { %v1830_v46 = vpop.eup %1829  ;;  %v245_v22 = vsub.f32 0.083333336, %v241_v43  ;;  %v1759_v31 = vadd.f32 -0.5, %v2464_v53  ;;  %v453_v3 = vsub.f32 0.0027777778, %v449_v2  ;;  %v689_v23 = vadd.f32 1.0, %v2364_v45 }
  0x84   :  { %4277 = vst [vmem:[#allocation4_spill] sm:$0xff] %v2732_v33  ;;  %v557_v21 = vmul.f32 0.0007936508, %v545_v49  ;;  %v2738_v25 = vsel %vm595_vm4, %v597_v29, %v593_v56  ;;  %v693_v14 = vadd.f32 2.0, %v2364_v45  ;;  %v697_v6 = vadd.f32 3.0, %v2364_v45 }
  0x85   :  { %v1832_v1 = vpop.eup %1831  ;;  %v701_v9 = vadd.f32 4.0, %v2364_v45  ;;  %v705_v50 = vadd.f32 5.0, %v2364_v45  ;;  %v709_v26 = vadd.f32 6.0, %v2364_v45  ;;  %v713_v53 = vadd.f32 7.0, %v2364_v45 }
  0x86   :  { %v1834_v59 = vpop.eup %1833  ;;  %v2747_v60 = vmul.f32 %v137_v62, %v2611_v37  ;;  %v353_v32 = vsub.f32 0.083333336, %v349_v52  ;;  %v430_v12 = vmul.f32 0.6931472, %v1830_v46  ;;  %v1763_v18 = vadd.f32 -0.5, %v2536_v40 }
  0x87   :  { %v2750_v0 = vmul.f32 %v453_v3, %v437_v51  ;;  %v538_v38 = vmul.f32 0.6931472, %v1832_v1  ;;  %v653_v58 = vmul.f32 %v2738_v25, %v2738_v25  ;;  %v1767_v34 = vadd.f32 -0.5, %v2599_v30 }
  0x88   :  { %v561_v10 = vsub.f32 0.0027777778, %v557_v21  ;;  %v646_v57 = vmul.f32 0.6931472, %v1834_v59  ;;  %v717_v35 = vmul.f32 %v689_v23, %v2364_v45  ;;  %v725_v27 = vmul.f32 %v697_v6, %v693_v14 }
  0x89   :  { %v721_v44 = vadd.f32 %v689_v23, %v2364_v45  ;;  %v729_v42 = vadd.f32 %v697_v6, %v693_v14  ;;  %v733_v15 = vmul.f32 %v705_v50, %v701_v9  ;;  %v741_v20 = vmul.f32 %v713_v53, %v709_v26 }
  0x8a   :  { %v2758_v40 = vmul.f32 %v245_v22, %v2643_v8  ;;  %v2761_v51 = vmul.f32 %v1755_v16, %v2732_v33  ;;  %v2764_v13 = vmul.f32 %v353_v32, %v2667_v7  ;;  %v2766_v30 = vmul.f32 %v1759_v31, %v430_v12 }
  0x8b   :  { %v2769_v19 = vmul.f32 %v1763_v18, %v538_v38  ;;  %v665_v43 = vmul.f32 0.0007936508, %v653_v58  ;;  %v737_v45 = vadd.f32 %v705_v50, %v701_v9  ;;  %v2771_v2 = vmul.f32 %v561_v10, %v545_v49 }
  0x8c   :  { %4278 = vst [vmem:[#allocation8_spill] sm:$0xff] %v2766_v30  ;;  %v2773_v29 = vmul.f32 %v1767_v34, %v646_v57  ;;  %v745_v56 = vadd.f32 %v713_v53, %v709_v26  ;;  %v2775_v62 = vmul.f32 %v725_v27, %v717_v35  ;;  %v753_v16 = vmul.f32 %v725_v27, %v721_v44 }
  0x8d   :  { %4279 = vst [vmem:[#allocation2_spill] sm:$0xff] %v2769_v19  ;;  %v757_v52 = vmul.f32 %v729_v42, %v717_v35  ;;  %v2777_v46 = vmul.f32 %v741_v20, %v733_v15  ;;  %v797_v22 = vadd.f32 1.0, %v2388_v54  ;;  %v801_v31 = vadd.f32 2.0, %v2388_v54 }
  0x8e   :  { %4280 = vst [vmem:[#allocation3_spill] sm:$0xff] %v2773_v29  ;;  %v805_v3 = vadd.f32 3.0, %v2388_v54  ;;  %v809_v23 = vadd.f32 4.0, %v2388_v54  ;;  %v813_v49 = vadd.f32 5.0, %v2388_v54  ;;  %v669_v1 = vsub.f32 0.0027777778, %v665_v43 }
  0x8f   :  { %v817_v21 = vadd.f32 6.0, %v2388_v54  ;;  %v821_v14 = vadd.f32 7.0, %v2388_v54  ;;  %v905_v6 = vadd.f32 1.0, %v2410_v28  ;;  %v909_v59 = vadd.f32 2.0, %v2410_v28 }
  0x90   :  { %v913_v9 = vadd.f32 3.0, %v2410_v28  ;;  %v917_v50 = vadd.f32 4.0, %v2410_v28  ;;  %v921_v26 = vadd.f32 5.0, %v2410_v28  ;;  %v769_v53 = vmul.f32 %v741_v20, %v737_v45 }
  0x91   :  { %v773_v32 = vmul.f32 %v745_v56, %v733_v15  ;;  %v925_v12 = vadd.f32 6.0, %v2410_v28  ;;  %v929_v18 = vadd.f32 7.0, %v2410_v28  ;;  %v825_v38 = vmul.f32 %v797_v22, %v2388_v54 }
  0x92   :  { %v829_v34 = vadd.f32 %v797_v22, %v2388_v54  ;;  %v833_v10 = vmul.f32 %v805_v3, %v801_v31  ;;  %v837_v57 = vadd.f32 %v805_v3, %v801_v31  ;;  %v841_v35 = vmul.f32 %v813_v49, %v809_v23 }
  0x93   :  { %v845_v27 = vadd.f32 %v813_v49, %v809_v23  ;;  %v849_v44 = vmul.f32 %v821_v14, %v817_v21  ;;  %v853_v42 = vadd.f32 %v821_v14, %v817_v21  ;;  %v2795_v43 = vmul.f32 %v669_v1, %v653_v58 }
  0x94   :  { %v933_v17 = vmul.f32 %v905_v6, %v2410_v28  ;;  %v941_v20 = vmul.f32 %v913_v9, %v909_v59  ;;  %v949_v15 = vmul.f32 %v921_v26, %v917_v50  ;;  %v957_v45 = vmul.f32 %v929_v18, %v925_v12 }
  0x95   :  { %v1125_v56 = vadd.f32 1.0, %v2530_v48  ;;  %v1133_v33 = vadd.f32 2.0, %v2530_v48  ;;  %v1137_v7 = vadd.f32 3.0, %v2530_v48  ;;  %v1149_v54 = vadd.f32 4.0, %v2530_v48 }
  0x96   :  { %v1153_v22 = vadd.f32 5.0, %v2530_v48  ;;  %v1161_v31 = vadd.f32 6.0, %v2530_v48  ;;  %v1165_v58 = vadd.f32 7.0, %v2530_v48  ;;  %v861_v3 = vmul.f32 %v833_v10, %v829_v34 }
  0x97   :  { %v865_v23 = vmul.f32 %v837_v57, %v825_v38  ;;  %v877_v49 = vmul.f32 %v849_v44, %v845_v27  ;;  %v881_v1 = vmul.f32 %v853_v42, %v841_v35  ;;  %v569_v21 = vsub.f32 0.083333336, %v2771_v2 }
  0x98   :  { %v761_v14 = vadd.f32 %v757_v52, %v753_v16  ;;  %v777_v36 = vadd.f32 %v773_v32, %v769_v53  ;;  %v2808_v8 = vmul.f32 %v2777_v46, %v2775_v62  ;;  %v857_v41 = vmul.f32 %v833_v10, %v825_v38 }
  0x99   :  { %v873_v47 = vmul.f32 %v849_v44, %v841_v35  ;;  %v2810_v63 = vmul.f32 %v941_v20, %v933_v17  ;;  %v2812_v29 = vmul.f32 %v957_v45, %v949_v15  ;;  %v1129_v19 = vmul.f32 %v1125_v56, %v2530_v48 }
  0x9a   :  { %v1141_v34 = vmul.f32 %v1137_v7, %v1133_v33  ;;  %v1157_v57 = vmul.f32 %v1153_v22, %v1149_v54  ;;  %v1169_v27 = vmul.f32 %v1165_v58, %v1161_v31  ;;  %v677_v42 = vsub.f32 0.083333336, %v2795_v43 }
  0x9b   :  { %4281 = vst [vmem:[#allocation12_spill] sm:$0xff] %v2810_v63  ;;  %v869_v2 = vadd.f32 %v865_v23, %v861_v3  ;;  %v885_v16 = vadd.f32 %v881_v1, %v877_v49  ;;  %v937_v52 = vadd.f32 %v905_v6, %v2410_v28  ;;  %v945_v53 = vadd.f32 %v913_v9, %v909_v59 }
  0x9c   :  { %4282 = vst [vmem:[#allocation13_spill] sm:$0xff] %v2812_v29  ;;  %v953_v32 = vadd.f32 %v921_v26, %v917_v50  ;;  %v961_v30 = vadd.f32 %v929_v18, %v925_v12  ;;  %v1013_v38 = vadd.f32 1.0, %v2455_v39  ;;  %v2820_v10 = vmul.f32 %v2812_v29, %v2810_v63 }
  0x9d   :  { %v1021_v48 = vadd.f32 2.0, %v2455_v39  ;;  %v1025_v7 = vadd.f32 3.0, %v2455_v39  ;;  %v1037_v33 = vadd.f32 4.0, %v2455_v39  ;;  %v1041_v35 = vadd.f32 5.0, %v2455_v39 }
  0x9e   :  { %v1049_v44 = vadd.f32 6.0, %v2455_v39  ;;  %v1145_v28 = vmul.f32 %v1141_v34, %v1129_v19  ;;  %v1173_v6 = vmul.f32 %v1169_v27, %v1157_v57  ;;  %v1053_v59 = vadd.f32 7.0, %v2455_v39 }
  0x9f   :  { %v1069_v9 = vadd.f32 1.0, %v2515_v24  ;;  %v1077_v50 = vadd.f32 2.0, %v2515_v24  ;;  %v1081_v26 = vadd.f32 3.0, %v2515_v24  ;;  %v1093_v12 = vadd.f32 4.0, %v2515_v24 }
  0xa0   :  { %v1097_v18 = vadd.f32 5.0, %v2515_v24  ;;  %v1105_v43 = vadd.f32 6.0, %v2515_v24  ;;  %v1109_v56 = vadd.f32 7.0, %v2515_v24  ;;  %v2835_v54 = vmul.f32 %v873_v47, %v857_v41 }
  0xa1   :  { %v969_v19 = vmul.f32 %v941_v20, %v937_v52  ;;  %v973_v22 = vmul.f32 %v945_v53, %v933_v17  ;;  %v985_v31 = vmul.f32 %v957_v45, %v953_v32  ;;  %v989_v58 = vmul.f32 %v961_v30, %v949_v15 }
  0xa2   :  { %v1017_v3 = vmul.f32 %v1013_v38, %v2455_v39  ;;  %v1029_v23 = vmul.f32 %v1025_v7, %v1021_v48  ;;  %v2838_v49 = vmul.f32 %v1173_v6, %v1145_v28  ;;  %v1045_v1 = vmul.f32 %v1041_v35, %v1037_v33  ;;  %v4290_v6 = vld [vmem:[#allocation6_spill] sm:$0xff] }
  0xa3   :  { %v1057_v34 = vmul.f32 %v1053_v59, %v1049_v44  ;;  %v1073_v57 = vmul.f32 %v1069_v9, %v2515_v24  ;;  %1835 = vrcp.f32 %v2808_v8  ;;  %v1085_v27 = vmul.f32 %v1081_v26, %v1077_v50  ;;  %v4289_v44 = vld [vmem:[#allocation9_spill] sm:$0xff]  ;;  %v4291_v50 = vld [vmem:[#allocation11_spill] sm:$0xff] }
  0xa4   :  { %v1101_v63 = vmul.f32 %v1097_v18, %v1093_v12  ;;  %v1113_v29 = vmul.f32 %v1109_v56, %v1105_v43  ;;  %1837 = vrcp.f32 %v2820_v10  ;;  %v4283_v17 = vsub.f32 0.083333336, %v2750_v0  ;;  %v2903_v43 = vld [vmem:[%s4139_s0 + $0x18] sm:$0xff] }
  0xa5   :  { %v573_v39 = vmul.f32 %v569_v21, %v2709_v55  ;;  %v785_v20 = vmul.f32 %v2777_v46, %v761_v14  ;;  %1839 = vrcp.f32 %v2835_v54  ;;  %v681_v15 = vmul.f32 %v677_v42, %v2738_v25  ;;  %v4287_v42 = vld [vmem:[#allocation13_spill] sm:$0xff] }
  0xa6   :  { %v465_v30 = vmul.f32 %v4283_v17, %v2691_v4  ;;  %v789_v45 = vmul.f32 %v777_v36, %v2775_v62  ;;  %v893_v52 = vmul.f32 %v873_v47, %v869_v2  ;;  %1841 = vrcp.f32 %v2838_v49  ;;  %v4285_v62 = vld [vmem:[#allocation2_spill] sm:$0xff] }
  0xa7   :  { %v897_v53 = vmul.f32 %v885_v16, %v857_v41  ;;  %v977_v32 = vadd.f32 %v973_v22, %v969_v19  ;;  %v993_v38 = vadd.f32 %v989_v58, %v985_v31  ;;  %v1033_v48 = vmul.f32 %v1029_v23, %v1017_v3  ;;  %v2918_v23 = vld [vmem:[%s4140_s1 + $0x18] sm:$0xff] }
  0xa8   :  { %v1061_v7 = vmul.f32 %v1057_v34, %v1045_v1  ;;  %v1089_v0 = vmul.f32 %v1085_v27, %v1073_v57  ;;  %v1117_v4 = vmul.f32 %v1113_v29, %v1101_v63  ;;  %v2853_v55 = vmul.f32 0.5, %v2611_v37  ;;  %v4284_v37 = vld [vmem:[#allocation8_spill] sm:$0xff]  ;;  %v4292_v57 = vld [vmem:[#allocation5_spill] sm:$0xff] }
  0xa9   :  { %v2855_v46 = vpop.eup %1835  ;;  %v2859_v25 = vadd.f32 %v2747_v60, %v2724_v61  ;;  %v2863_v47 = vadd.f32 %v2758_v40, %v2727_v5  ;;  %v1189_v41 = vmul.f32 0.003968254, %v2637_v11  ;;  %v2870_v63 = vadd.f32 %v2764_v13, %v2761_v51  ;;  %v4286_v5 = vld [vmem:[#allocation3_spill] sm:$0xff]  ;;  %v4288_v51 = vld [vmem:[#allocation12_spill] sm:$0xff] }
  0xaa   :  { %v2866_v36 = vpop.eup %1837  ;;  %v2873_v29 = vadd.f32 %v465_v30, %v4284_v37  ;;  %v2876_v21 = vadd.f32 %v573_v39, %v4285_v62  ;;  %v2878_v61 = vadd.f32 %v789_v45, %v785_v20  ;;  %v2883_v40 = vadd.f32 %v681_v15, %v4286_v5 }
  0xab   :  { %v2880_v60 = vpop.eup %1839  ;;  %v2885_v14 = vadd.f32 %v897_v53, %v893_v52  ;;  %v2888_v2 = vmul.f32 %v4287_v42, %v977_v32  ;;  %v2891_v13 = vmul.f32 %v993_v38, %v4288_v51  ;;  %v1065_v33 = vmul.f32 %v1061_v7, %v1033_v48 }
  0xac   :  { %v1842_v16 = vpop.eup %1841  ;;  %v1121_v35 = vmul.f32 %v1117_v4, %v1089_v0  ;;  %v1185_v28 = vsub.f32 %v4289_v44, %v2853_v55  ;;  %v1285_v59 = vmul.f32 0.003968254, %v4290_v6  ;;  %v1193_v9 = vsub.f32 0.008333334, %v1189_v41  ;;  %v4295_v0 = vld [vmem:[#allocation10_spill] sm:$0xff] }
  0xad   :  { %v1381_v26 = vmul.f32 0.003968254, %v4291_v50  ;;  %v1406_v12 = vmul.f32 %v2866_v36, %v2820_v10  ;;  %v1498_v18 = vmul.f32 %v1842_v16, %v2838_v49  ;;  %v1214_v56 = vmul.f32 %v2855_v46, %v2808_v8 }
  0xae   :  { %v1310_v19 = vmul.f32 %v2880_v60, %v2835_v54  ;;  %v1508_v22 = vand.u32 2147483648, %v2838_v49  ;;  %v2911_v31 = vadd.f32 8.0, %v2903_v43  ;;  %vm1502_vm5 = vweird.f32 %v2838_v49 }
  0xaf   :  { %v1499_v58 = vsub.f32 1.0, %v1498_v18  ;;  %vm1503_vm6 = vweird.f32 %v1842_v16  ;;  %v1506_v3 = vand.u32 2147483647, %v2838_v49  ;;  %vm1218_vm7 = vweird.f32 %v2808_v8 }
  0xb0   :  { %v1222_v1 = vand.u32 2147483647, %v2808_v8  ;;  %v1224_v34 = vand.u32 2147483648, %v2808_v8  ;;  %v2924_v27 = vmul.f32 0.5, %v4292_v57  ;;  %v1289_v17 = vsub.f32 0.008333334, %v1285_v59  ;;  %vm2930_vm9 = vmor %vm1502_vm5, %vm1503_vm6 }
  0xb1   :  { %v1197_v30 = vmul.f32 %v1193_v9, %v2637_v11  ;;  %vm1314_vm8 = vweird.f32 %v2835_v54  ;;  %v1407_v39 = vsub.f32 1.0, %v1406_v12  ;;  %v1500_v20 = vmul.f32 %v1842_v16, %v1499_v58 }
  0xb2   :  { %v1215_v15 = vsub.f32 1.0, %v1214_v56  ;;  %v1385_v45 = vsub.f32 0.008333334, %v1381_v26  ;;  %v1509_v53 = vor.u32 1.1754944e-38, %v1508_v22  ;;  %1843 = vrcp.f32 %v2911_v31 }
  0xb3   :  { %v1311_v32 = vsub.f32 1.0, %v1310_v19  ;;  %v1501_v38 = vadd.f32 %v1842_v16, %v1500_v20  ;;  %vm1507_vm10 = vcmp.eq.f32.partialorder %v1506_v3, 8.507059e+37  ;;  %v2937_v48 = vadd.f32 %v2918_v23, %v2903_v43 }
  0xb4   :  { %v1225_v7 = vor.u32 1.1754944e-38, %v1224_v34  ;;  %v1281_v4 = vsub.f32 %v4295_v0, %v2924_v27  ;;  %v1293_v49 = vmul.f32 %v1289_v17, %v4290_v6  ;;  %v2943_v41 = vadd.f32 8.0, %v2918_v23  ;;  %v4298_v34 = vld [vmem:[#allocation7_spill] sm:$0xff] }
  0xb5   :  { %v1201_v37 = vsub.f32 0.083333336, %v1197_v30  ;;  %v1408_v62 = vmul.f32 %v2866_v36, %v1407_v39  ;;  %v1505_v5 = vsel %vm2930_vm9, %v1842_v16, %v1501_v38  ;;  %v2949_v42 = vadd.f32 8.0, %v2937_v48 }
  0xb6   :  { %v1216_v51 = vmul.f32 %v2855_v46, %v1215_v15  ;;  %vm1219_vm11 = vweird.f32 %v2855_v46  ;;  %vm2953_vm12 = vcmp.eq.f32.partialorder %v1222_v1, 8.507059e+37  ;;  %v1389_v9 = vmul.f32 %v1385_v45, %v4291_v50 }
  0xb7   :  { %v1510_v26 = vsel %vm1507_vm10, %v1509_v53, %v1505_v5  ;;  %v1312_v12 = vmul.f32 %v2880_v60, %v1311_v32  ;;  %vm1410_vm13 = vweird.f32 %v2820_v10  ;;  %vm1411_vm14 = vweird.f32 %v2866_v36  ;;  %vm2986_vm2 = vmor %vm1218_vm7, %vm1219_vm11  ;;  %v3010_v32 = vld [vmem:[%s4141_s2 + $0x18] sm:$0xff] }
  0xb8   :  { %v1511_v16 = vmul.f32 %v1510_v26, %v1065_v33  ;;  %v2961_v18 = vpop.eup %1843  ;;  %v1297_v56 = vsub.f32 0.083333336, %v1293_v49  ;;  %v1414_v19 = vand.u32 2147483647, %v2820_v10  ;;  %v1416_v22 = vand.u32 2147483648, %v2820_v10  ;;  %vm2978_vm1 = vmor %vm1410_vm13, %vm1411_vm14  ;;  %v4305_v49 = vld [vmem:[#allocation4_spill] sm:$0xff] }
  0xb9   :  { %1845 = vrcp.f32 %v2943_v41  ;;  %vm1315_vm0 = vweird.f32 %v2880_v60  ;;  %v1409_v58 = vadd.f32 %v2866_v36, %v1408_v62  ;;  %v1217_v1 = vadd.f32 %v2855_v46, %v1216_v51 }
  0xba   :  { %v2968_v3 = vmul.f32 %v1511_v16, %v1121_v35  ;;  %1847 = vrcp.f32 %v2949_v42  ;;  %v1320_v33 = vand.u32 2147483648, %v2835_v54  ;;  %v1373_v57 = vmul.f32 0.5, %v4298_v34  ;;  %vm3001_vm3 = vmor %vm1314_vm8, %vm1315_vm0 }
  0xbb   :  { %v1393_v27 = vsub.f32 0.083333336, %v1389_v9  ;;  %v1313_v30 = vadd.f32 %v2880_v60, %v1312_v12  ;;  %v1318_v39 = vand.u32 2147483647, %v2835_v54  ;;  %v91_v10 = vmul.f32 %v2961_v18, %v2911_v31 }
  0xbc   :  { %1849 = vrcp.f32 %v2968_v3  ;;  %v1205_v20 = vmul.f32 %v1201_v37, %v2637_v11  ;;  %v1301_v15 = vmul.f32 %v1297_v56, %v4290_v6  ;;  %v1417_v52 = vor.u32 1.1754944e-38, %v1416_v22  ;;  %v3067_v56 = vld [vmem:[%s4142_s3 + $0x18] sm:$0xff] }
  0xbd   :  { %v1469_v53 = vadd.f32 %v2876_v21, %v2873_v29  ;;  %v1413_v11 = vsel %vm2978_vm1, %v2866_v36, %v1409_v58  ;;  %vm1415_vm4 = vcmp.eq.f32.partialorder %v1414_v19, 8.507059e+37  ;;  %v1477_v6 = vadd.f32 %v2863_v47, %v2859_v25 }
  0xbe   :  { %v3018_v38 = vadd.f32 8.0, %v3010_v32  ;;  %v1221_v29 = vsel %vm2986_vm2, %v2855_v46, %v1217_v1  ;;  %v1321_v21 = vor.u32 1.1754944e-38, %v1320_v33  ;;  %v1377_v37 = vsub.f32 %v4305_v49, %v1373_v57 }
  0xbf   :  { %v3020_v0 = vpop.eup %1845  ;;  %v1397_v62 = vmul.f32 %v1393_v27, %v4291_v50  ;;  %v3031_v36 = vadd.f32 %v2891_v13, %v2888_v2  ;;  %v1317_v25 = vsel %vm3001_vm3, %v2880_v60, %v1313_v30  ;;  %vm1319_vm5 = vcmp.eq.f32.partialorder %v1318_v39, 8.507059e+37 }
  0xc0   :  { %v3027_v5 = vpop.eup %1847  ;;  %v92_v47 = vsub.f32 1.0, %v91_v10  ;;  %v3039_v46 = vsub.f32 %v1185_v28, %v1205_v20  ;;  %v3041_v51 = vsub.f32 %v1281_v4, %v1301_v15  ;;  %v3043_v50 = vsel %vm1415_vm4, %v1417_v52, %v1413_v11 }
  0xc1   :  { %v1473_v9 = vsub.f32 %v1469_v53, %v2883_v40  ;;  %v1226_v2 = vsel %vm2953_vm12, %v1225_v7, %v1221_v29  ;;  %v1481_v13 = vsub.f32 %v1477_v6, %v2870_v63  ;;  %v199_v60 = vmul.f32 %v3020_v0, %v2943_v41 }
  0xc2   :  { %v1850_v26 = vpop.eup %1849  ;;  %1851 = vrcp.f32 %v3018_v38  ;;  %v1322_v55 = vsel %vm1319_vm5, %v1321_v21, %v1317_v25  ;;  %v3052_v44 = vsub.f32 %v1377_v37, %v1397_v62  ;;  %v307_v4 = vmul.f32 %v3027_v5, %v2949_v42 }
  0xc3   :  { %v1562_v28 = vmul.f32 %v1850_v26, %v2968_v3  ;;  %v1489_v40 = vmul.f32 %v3043_v50, %v2808_v8  ;;  %v1572_v7 = vand.u32 2147483648, %v2968_v3  ;;  %v93_v63 = vmul.f32 %v2961_v18, %v92_v47 }
  0xc4   :  { %v99_v59 = vand.u32 2147483647, %v2911_v31  ;;  %vm1566_vm6 = vweird.f32 %v2968_v3  ;;  %vm1567_vm7 = vweird.f32 %v1850_v26  ;;  %v1570_v16 = vand.u32 2147483647, %v2968_v3 }
  0xc5   :  { %v1563_v12 = vsub.f32 1.0, %v1562_v28  ;;  %v3069_v19 = vsub.f32 %v1473_v9, %v1481_v13  ;;  %v101_v8 = vand.u32 2147483648, %v2911_v31  ;;  %v200_v22 = vsub.f32 1.0, %v199_v60  ;;  %vm3085_vm10 = vmor %vm1566_vm6, %vm1567_vm7 }
  0xc6   :  { %v3073_v58 = vadd.f32 8.0, %v3067_v56  ;;  %vm95_vm8 = vweird.f32 %v2911_v31  ;;  %vm96_vm9 = vweird.f32 %v2961_v18  ;;  %v308_v33 = vsub.f32 1.0, %v307_v4 }
  0xc7   :  { %v1564_v1 = vmul.f32 %v1850_v26, %v1563_v12  ;;  %v1227_v57 = vmul.f32 %v1226_v2, %v2878_v61  ;;  %v3081_v27 = vmul.f32 %v1322_v55, %v2885_v14  ;;  %v1573_v35 = vor.u32 1.1754944e-38, %v1572_v7  ;;  %vm3095_vm13 = vmor %vm95_vm8, %vm96_vm9 }
  0xc8   :  { %v3077_v34 = vpop.eup %1851  ;;  %vm3089_vm11 = vcmp.eq.f32.partialorder %v99_v59, 8.507059e+37  ;;  %v1493_v39 = vmul.f32 %v1489_v40, %v2835_v54  ;;  %vm1571_vm12 = vcmp.eq.f32.partialorder %v1570_v16, 8.507059e+37  ;;  %v94_v61 = vadd.f32 %v2961_v18, %v93_v63  ;;  %v1937_v63 = vld [vmem:[%s4140_s1] sm:$0xff] }
  0xc9   :  { %v1565_v10 = vadd.f32 %v1850_v26, %v1564_v1  ;;  %v102_v3 = vor.u32 1.1754944e-38, %v101_v8  ;;  %v201_v20 = vmul.f32 %v3020_v0, %v200_v22  ;;  %vm203_vm14 = vweird.f32 %v2943_v41 }
  0xca   :  { %1853 = vrcp.f32 %v3073_v58  ;;  %v207_v54 = vand.u32 2147483647, %v2943_v41  ;;  %v309_v45 = vmul.f32 %v3027_v5, %v308_v33  ;;  %v415_v52 = vmul.f32 %v3077_v34, %v3018_v38 }
  0xcb   :  { %v1569_v15 = vsel %vm3085_vm10, %v1850_v26, %v1565_v10  ;;  %vm204_vm0 = vweird.f32 %v3020_v0  ;;  %v209_v11 = vand.u32 2147483648, %v2943_v41  ;;  %vm311_vm1 = vweird.f32 %v2949_v42 }
  0xcc   :  { %v1574_v53 = vsel %vm1571_vm12, %v1573_v35, %v1569_v15  ;;  %v98_v29 = vsel %vm3095_vm13, %v2961_v18, %v94_v61  ;;  %vm312_vm2 = vweird.f32 %v3027_v5  ;;  %v315_v21 = vand.u32 2147483647, %v2949_v42  ;;  %vm3127_vm3 = vmor %vm203_vm14, %vm204_vm0 }
  0xcd   :  { %v1575_v6 = vmul.f32 %v1574_v53, %v1493_v39  ;;  %v1273_v49 = vsub.f32 %v3039_v46, %v1227_v57  ;;  %v3119_v37 = vadd.f32 %v3067_v56, %v3010_v32  ;;  %v202_v62 = vadd.f32 %v3020_v0, %v201_v20  ;;  %vm3149_vm5 = vmor %vm311_vm1, %vm312_vm2 }
  0xce   :  { %v317_v25 = vand.u32 2147483648, %v2949_v42  ;;  %v1369_v47 = vsub.f32 %v3041_v51, %v3081_v27  ;;  %v310_v46 = vadd.f32 %v3027_v5, %v309_v45  ;;  %v416_v9 = vsub.f32 1.0, %v415_v52 }
  0xcf   :  { %1855 = vlog2.f32 %v1575_v6  ;;  %v1419_v2 = vmul.f32 %v3043_v50, %v3031_v36  ;;  %v3138_v13 = vsel %vm3089_vm11, %v102_v3, %v98_v29  ;;  %vm3141_vm4 = vcmp.eq.f32.partialorder %v207_v54, 8.507059e+37  ;;  %v1935_v36 = vld [vmem:[%s4139_s0] sm:$0xff] }
  0xd0   :  { %v3132_v26 = vpop.eup %1853  ;;  %4314 = vst [vmem:[#allocation8_spill] sm:$0xff] %v3138_v13  ;;  %1857 = vlog2.f32 %v2911_v31  ;;  %v1936_v50 = vld [vmem:[%s4141_s2] sm:$0xff]  ;;  %v210_v28 = vor.u32 1.1754944e-38, %v209_v11  ;;  %vm3159_vm6 = vcmp.eq.f32.partialorder %v315_v21, 8.507059e+37  ;;  %v3164_v40 = vadd.f32 8.0, %v3119_v37 }
  0xd1   :  { %v1633_v55 = vsub.f32 %v1935_v36, %v1936_v50  ;;  %v1657_v7 = vsub.f32 %v1936_v50, %v1935_v36  ;;  %v1661_v59 = vsub.f32 %v2515_v24, %v1937_v63  ;;  %v206_v12 = vsel %vm3127_vm3, %v3020_v0, %v202_v62 }
  0xd2   :  { %v318_v16 = vor.u32 1.1754944e-38, %v317_v25  ;;  %v3175_v8 = vmul.f32 %v3138_v13, %v3138_v13  ;;  %v314_v22 = vsel %vm3149_vm5, %v3027_v5, %v310_v46  ;;  %v417_v1 = vmul.f32 %v3077_v34, %v416_v9 }
  0xd3   :  { %v523_v33 = vmul.f32 %v3132_v26, %v3073_v58  ;;  %v1465_v57 = vsub.f32 %v3052_v44, %v1419_v2  ;;  %v1645_v27 = vsub.f32 %v1937_v63, %v2515_v24  ;;  %1859 = vlog2.f32 %v2943_v41 }
  0xd4   :  { %4321 = vst [vmem:[#allocation2_spill] sm:$0xff] %v3175_v8  ;;  %vm419_vm7 = vweird.f32 %v3018_v38  ;;  %v1637_v17 = vmul.f32 %v1633_v55, %v1273_v49  ;;  %v3189_v35 = vsel %vm3141_vm4, %v210_v28, %v206_v12  ;;  %vm420_vm8 = vweird.f32 %v3077_v34 }
  0xd5   :  { %v1856_v0 = vpop.eup %1855  ;;  %4322 = vst [vmem:[#allocation3_spill] sm:$0xff] %v3189_v35  ;;  %1861 = vrcp.f32 %v3164_v40  ;;  %v1665_v39 = vadd.f32 %v1661_v59, %v1657_v7  ;;  %v3195_v24 = vsel %vm3159_vm6, %v318_v16, %v314_v22  ;;  %v425_v44 = vand.u32 2147483648, %v3018_v38  ;;  %vm3211_vm9 = vmor %vm419_vm7, %vm420_vm8 }
  0xd6   :  { %v1858_v5 = vpop.eup %1857  ;;  %v1622_v30 = vmul.f32 0.6931472, %v1856_v0  ;;  %4323 = vst [vmem:[#allocation13_spill] sm:$0xff] %v3195_v24  ;;  %v128_v10 = vmul.f32 0.0007936508, %v3175_v8  ;;  %v418_v61 = vadd.f32 %v3077_v34, %v417_v1  ;;  %v524_v3 = vsub.f32 1.0, %v523_v33 }
  0xd7   :  { %v423_v14 = vand.u32 2147483647, %v3018_v38  ;;  %v1649_v15 = vmul.f32 %v1645_v27, %v1369_v47  ;;  %v3204_v54 = vmul.f32 %v3189_v35, %v3189_v35  ;;  %1863 = vlog2.f32 %v2949_v42 }
  0xd8   :  { %v1629_v20 = vadd.f32 %v1622_v30, %v3069_v19  ;;  %v3217_v52 = vmul.f32 %v3195_v24, %v3195_v24  ;;  %v1669_v11 = vmul.f32 %v1665_v39, %v1465_v57  ;;  %v426_v6 = vor.u32 1.1754944e-38, %v425_v44 }
  0xd9   :  { %4324 = vst [vmem:[#allocation12_spill] sm:$0xff] %v3204_v54  ;;  %v1860_v19 = vpop.eup %1859  ;;  %v132_v21 = vsub.f32 0.0027777778, %v128_v10  ;;  %v422_v49 = vsel %vm3211_vm9, %v3077_v34, %v418_v61  ;;  %vm424_vm10 = vcmp.eq.f32.partialorder %v423_v14, 8.507059e+37  ;;  %v525_v62 = vmul.f32 %v3132_v26, %v524_v3 }
  0xda   :  { %4327 = vst [vmem:[#allocation9_spill] sm:$0xff] %v3217_v52  ;;  %v1641_v53 = vadd.f32 %v1637_v17, %v1629_v20  ;;  %v236_v47 = vmul.f32 0.0007936508, %v3204_v54  ;;  %v3226_v18 = vmul.f32 0.6931472, %v1858_v5  ;;  %vm527_vm11 = vweird.f32 %v3073_v58 }
  0xdb   :  { %v3219_v29 = vpop.eup %1861  ;;  %v344_v46 = vmul.f32 0.0007936508, %v3217_v52  ;;  %vm528_vm12 = vweird.f32 %v3132_v26  ;;  %v3231_v51 = vsel %vm424_vm10, %v426_v6, %v422_v49  ;;  %v533_v34 = vand.u32 2147483648, %v3073_v58 }
  0xdc   :  { %v1653_v25 = vadd.f32 %v1649_v15, %v1641_v53  ;;  %4328 = vst [vmem:[#allocation6_spill] sm:$0xff] %v3226_v18  ;;  %v631_v60 = vmul.f32 %v3219_v29, %v3164_v40  ;;  %v136_v36 = vmul.f32 %v132_v21, %v3175_v8  ;;  %1865 = vlog2.f32 %v3018_v38  ;;  %vm3241_vm13 = vmor %vm527_vm11, %vm528_vm12 }
  0xdd   :  { %v1864_v9 = vpop.eup %1863  ;;  %v526_v50 = vadd.f32 %v3132_v26, %v525_v62  ;;  %v531_v55 = vand.u32 2147483647, %v3073_v58  ;;  %v1750_v4 = vadd.f32 -0.5, %v2911_v31  ;;  %v240_v7 = vsub.f32 0.0027777778, %v236_v47 }
  0xde   :  { %v1673_v2 = vadd.f32 %v1669_v11, %v1653_v25  ;;  %v3245_v59 = vmul.f32 0.6931472, %v1860_v19  ;;  %v1754_v12 = vadd.f32 -0.5, %v2943_v41  ;;  %v3248_v16 = vmul.f32 0.6931472, %v1864_v9 }
  0xdf   :  { %v440_v22 = vmul.f32 %v3231_v51, %v3231_v51  ;;  %v348_v33 = vsub.f32 0.0027777778, %v344_v46  ;;  %v534_v57 = vor.u32 1.1754944e-38, %v533_v34  ;;  %v632_v27 = vsub.f32 1.0, %v631_v60 }
  0xe0   :  { %v1677_v28 = vand.u32 2147483647, %v1673_v2  ;;  %4331 = vst [vmem:[#allocation11_spill] sm:$0xff] %v3245_v59  ;;  %v140_v31 = vsub.f32 0.083333336, %v136_v36  ;;  %v1758_v0 = vadd.f32 -0.5, %v2949_v42  ;;  %v530_v17 = vsel %vm3241_vm13, %v3132_v26, %v526_v50 }
  0xe1   :  { %4332 = vst [vmem:[#allocation5_spill] sm:$0xff] %v3248_v16  ;;  %vm532_vm14 = vcmp.eq.f32.partialorder %v531_v55, 8.507059e+37  ;;  %v244_v41 = vmul.f32 %v240_v7, %v3204_v54  ;;  %v452_v30 = vmul.f32 0.0007936508, %v440_v22  ;;  %v124_v39 = vmul.f32 %v1750_v4, %v3226_v18 }
  0xe2   :  { %v1682_v1 = vsel %vm1681_vm15, %v1677_v28, 0.0  ;;  %v1866_v5 = vpop.eup %1865  ;;  %v352_v44 = vmul.f32 %v348_v33, %v3217_v52  ;;  %v3260_v10 = vsel %vm532_vm14, %v534_v57, %v530_v17  ;;  %v633_v61 = vmul.f32 %v3219_v29, %v632_v27 }
  0xe3   :  { %1683 = vadd.xlane.f32.xlu0 %v1682_v1  ;;  %v144_v14 = vmul.f32 %v140_v31, %v3138_v13  ;;  %v232_v42 = vmul.f32 %v1754_v12, %v3245_v59  ;;  %v340_v3 = vmul.f32 %v1758_v0, %v3248_v16  ;;  %v1762_v26 = vadd.f32 -0.5, %v3018_v38 }
  0xe4   :  { %v248_v20 = vsub.f32 0.083333336, %v244_v41  ;;  %v436_v15 = vmul.f32 0.6931472, %v1866_v5  ;;  %vm635_vm0 = vweird.f32 %v3164_v40  ;;  %vm636_vm1 = vweird.f32 %v3219_v29 }
  0xe5   :  { %v456_v45 = vsub.f32 0.0027777778, %v452_v30  ;;  %1867 = vlog2.f32 %v3073_v58  ;;  %v548_v19 = vmul.f32 %v3260_v10, %v3260_v10  ;;  %v641_v53 = vand.u32 2147483648, %v3164_v40  ;;  %vm3278_vm2 = vmor %vm635_vm0, %vm636_vm1 }
  0xe6   :  { %v356_v11 = vsub.f32 0.083333336, %v352_v44  ;;  %v634_v6 = vadd.f32 %v3219_v29, %v633_v61  ;;  %v639_v21 = vand.u32 2147483647, %v3164_v40  ;;  %1869 = vlog2.f32 %v3164_v40 }
  0xe7   :  { %v3276_v38 = vadd.f32 %v144_v14, %v124_v39  ;;  %v692_v62 = vadd.f32 1.0, %v2903_v43  ;;  %v696_v25 = vadd.f32 2.0, %v2903_v43  ;;  %v700_v47 = vadd.f32 3.0, %v2903_v43 }
  0xe8   :  { %v704_v46 = vadd.f32 4.0, %v2903_v43  ;;  %v708_v9 = vadd.f32 5.0, %v2903_v43  ;;  %v712_v2 = vadd.f32 6.0, %v2903_v43  ;;  %v716_v34 = vadd.f32 7.0, %v2903_v43 }
  0xe9   :  { %4333 = vst [vmem:[#allocation10_spill] sm:$0xff] %v3276_v38  ;;  %v252_v60 = vmul.f32 %v248_v20, %v3189_v35  ;;  %v3290_v36 = vmul.f32 %v1762_v26, %v436_v15  ;;  %v560_v50 = vmul.f32 0.0007936508, %v548_v19  ;;  %v642_v55 = vor.u32 1.1754944e-38, %v641_v53 }
  0xea   :  { %v360_v28 = vmul.f32 %v356_v11, %v3195_v24  ;;  %v3293_v4 = vmul.f32 %v456_v45, %v440_v22  ;;  %v638_v7 = vsel %vm3278_vm2, %v3219_v29, %v634_v6  ;;  %vm640_vm3 = vcmp.eq.f32.partialorder %v639_v21, 8.507059e+37 }
  0xeb   :  { %v1868_v63 = vpop.eup %1867  ;;  %v720_v12 = vmul.f32 %v692_v62, %v2903_v43  ;;  %v724_v1 = vadd.f32 %v692_v62, %v2903_v43  ;;  %v728_v33 = vmul.f32 %v700_v47, %v696_v25  ;;  %v732_v57 = vadd.f32 %v700_v47, %v696_v25 }
  0xec   :  { %v1870_v27 = vpop.eup %1869  ;;  %v736_v31 = vmul.f32 %v708_v9, %v704_v46  ;;  %v740_v0 = vadd.f32 %v708_v9, %v704_v46  ;;  %v744_v17 = vmul.f32 %v716_v34, %v712_v2  ;;  %v748_v41 = vadd.f32 %v716_v34, %v712_v2 }
  0xed   :  { %v3300_v5 = vadd.f32 %v252_v60, %v232_v42  ;;  %v3303_v22 = vadd.f32 -0.5, %v3073_v58  ;;  %v564_v30 = vsub.f32 0.0027777778, %v560_v50  ;;  %v3305_v29 = vsel %vm640_vm3, %v642_v55, %v638_v7 }
  0xee   :  { %v3307_v39 = vadd.f32 %v360_v28, %v340_v3  ;;  %v3310_v43 = vmul.f32 0.6931472, %v1868_v63  ;;  %v3313_v61 = vadd.f32 -0.5, %v3164_v40  ;;  %v3315_v14 = vmul.f32 0.6931472, %v1870_v27 }
  0xef   :  { %4336 = vst [vmem:[#allocation7_spill] sm:$0xff] %v3300_v5  ;;  %v3317_v26 = vmul.f32 %v728_v33, %v720_v12  ;;  %v756_v42 = vmul.f32 %v728_v33, %v724_v1  ;;  %v760_v20 = vmul.f32 %v732_v57, %v720_v12  ;;  %v656_v58 = vmul.f32 %v3305_v29, %v3305_v29 }
  0xf0   :  { %4337 = vst [vmem:[#allocation4_spill] sm:$0xff] %v3307_v39  ;;  %v768_v15 = vmul.f32 %v744_v17, %v736_v31  ;;  %v772_v45 = vmul.f32 %v744_v17, %v740_v0  ;;  %v776_v3 = vmul.f32 %v748_v41, %v736_v31  ;;  %v568_v53 = vmul.f32 %v564_v30, %v548_v19 }
  0xf1   :  { %v800_v11 = vadd.f32 1.0, %v2918_v23  ;;  %v804_v6 = vadd.f32 2.0, %v2918_v23  ;;  %v808_v40 = vadd.f32 3.0, %v2918_v23  ;;  %v812_v21 = vadd.f32 4.0, %v2918_v23 }
  0xf2   :  { %v908_v49 = vadd.f32 1.0, %v2937_v48  ;;  %v912_v62 = vadd.f32 2.0, %v2937_v48  ;;  %v916_v25 = vadd.f32 3.0, %v2937_v48  ;;  %v920_v47 = vadd.f32 4.0, %v2937_v48 }
  0xf3   :  { %v924_v46 = vadd.f32 5.0, %v2937_v48  ;;  %v928_v19 = vadd.f32 6.0, %v2937_v48  ;;  %v932_v9 = vadd.f32 7.0, %v2937_v48  ;;  %v668_v2 = vmul.f32 0.0007936508, %v656_v58 }
  0xf4   :  { %v816_v34 = vadd.f32 5.0, %v2918_v23  ;;  %v820_v60 = vadd.f32 6.0, %v2918_v23  ;;  %v824_v50 = vadd.f32 7.0, %v2918_v23  ;;  %v828_v55 = vmul.f32 %v800_v11, %v2918_v23 }
  0xf5   :  { %v1128_v28 = vadd.f32 1.0, %v3119_v37  ;;  %v1136_v7 = vadd.f32 2.0, %v3119_v37  ;;  %v1140_v63 = vadd.f32 3.0, %v3119_v37  ;;  %v1152_v12 = vadd.f32 4.0, %v3119_v37 }
  0xf6   :  { %v1156_v1 = vadd.f32 5.0, %v3119_v37  ;;  %v1164_v33 = vadd.f32 6.0, %v3119_v37  ;;  %v1168_v57 = vadd.f32 7.0, %v3119_v37  ;;  %v3344_v27 = vmul.f32 %v908_v49, %v2937_v48 }
  0xf7   :  { %v3346_v31 = vmul.f32 %v916_v25, %v912_v62  ;;  %v3348_v0 = vmul.f32 %v924_v46, %v920_v47  ;;  %v3350_v17 = vmul.f32 %v932_v9, %v928_v19  ;;  %v672_v41 = vsub.f32 0.0027777778, %v668_v2 }
  0xf8   :  { %v832_v30 = vadd.f32 %v800_v11, %v2918_v23  ;;  %v836_v44 = vmul.f32 %v808_v40, %v804_v6  ;;  %v840_v39 = vadd.f32 %v808_v40, %v804_v6  ;;  %v844_v16 = vmul.f32 %v816_v34, %v812_v21 }
  0xf9   :  { %v848_v5 = vadd.f32 %v816_v34, %v812_v21  ;;  %v852_v38 = vmul.f32 %v824_v50, %v820_v60  ;;  %v856_v24 = vadd.f32 %v824_v50, %v820_v60  ;;  %v1132_v59 = vmul.f32 %v1128_v28, %v3119_v37 }
  0xfa   :  { %v1144_v18 = vmul.f32 %v1140_v63, %v1136_v7  ;;  %v1160_v35 = vmul.f32 %v1156_v1, %v1152_v12  ;;  %v1172_v52 = vmul.f32 %v1168_v57, %v1164_v33  ;;  %v764_v54 = vadd.f32 %v760_v20, %v756_v42 }
  0xfb   :  { %v780_v13 = vadd.f32 %v776_v3, %v772_v45  ;;  %v3356_v8 = vmul.f32 %v3346_v31, %v3344_v27  ;;  %v3360_v23 = vmul.f32 %v3350_v17, %v3348_v0  ;;  %v572_v11 = vsub.f32 0.083333336, %v568_v53 }
  0xfc   :  { %v676_v6 = vmul.f32 %v672_v41, %v656_v58  ;;  %v864_v40 = vmul.f32 %v836_v44, %v832_v30  ;;  %v868_v21 = vmul.f32 %v840_v39, %v828_v55  ;;  %v860_v2 = vmul.f32 %v836_v44, %v828_v55 }
  0xfd   :  { %v876_v34 = vmul.f32 %v852_v38, %v844_v16  ;;  %v880_v37 = vmul.f32 %v852_v38, %v848_v5  ;;  %v884_v60 = vmul.f32 %v856_v24, %v844_v16  ;;  %v4338_v42 = vsub.f32 0.083333336, %v3293_v4 }
  0xfe   :  { %v556_v45 = vmul.f32 %v3303_v22, %v3310_v43  ;;  %v1148_v3 = vmul.f32 %v1144_v18, %v1132_v59  ;;  %v1176_v50 = vmul.f32 %v1172_v52, %v1160_v35  ;;  %v664_v28 = vmul.f32 %v3313_v61, %v3315_v14 }
  0xff   :  { %v468_v20 = vmul.f32 %v4338_v42, %v3231_v51  ;;  %v3370_v58 = vmul.f32 %v768_v15, %v3317_v26  ;;  %v788_v39 = vmul.f32 %v768_v15, %v764_v54  ;;  %v3374_v38 = vmul.f32 %v3360_v23, %v3356_v8 }
 0x100   :  { %v576_v24 = vmul.f32 %v572_v11, %v3260_v10  ;;  %v680_v16 = vsub.f32 0.083333336, %v676_v6  ;;  %v792_v51 = vmul.f32 %v780_v13, %v3317_v26  ;;  %v872_v4 = vadd.f32 %v868_v21, %v864_v40 }
 0x101   :  { %v888_v5 = vadd.f32 %v884_v60, %v880_v37  ;;  %v3378_v18 = vmul.f32 %v876_v34, %v860_v2  ;;  %v940_v35 = vadd.f32 %v908_v49, %v2937_v48  ;;  %v948_v52 = vadd.f32 %v916_v25, %v912_v62  ;;  %v4339_v60 = vld [vmem:[#allocation2_spill] sm:$0xff] }
 0x102   :  { %v956_v59 = vadd.f32 %v924_v46, %v920_v47  ;;  %v964_v22 = vadd.f32 %v932_v9, %v928_v19  ;;  %v1016_v54 = vadd.f32 1.0, %v3010_v32  ;;  %v3382_v44 = vmul.f32 %v1176_v50, %v1148_v3 }
 0x103   :  { %v1024_v43 = vadd.f32 2.0, %v3010_v32  ;;  %v1028_v10 = vadd.f32 3.0, %v3010_v32  ;;  %v1040_v61 = vadd.f32 4.0, %v3010_v32  ;;  %1871 = vrcp.f32 %v3374_v38 }
 0x104   :  { %v1044_v13 = vadd.f32 5.0, %v3010_v32  ;;  %v1052_v14 = vadd.f32 6.0, %v3010_v32  ;;  %v1056_v48 = vadd.f32 7.0, %v3010_v32  ;;  %v1072_v26 = vadd.f32 1.0, %v3067_v56 }
 0x105   :  { %v1080_v15 = vadd.f32 2.0, %v3067_v56  ;;  %v1084_v53 = vadd.f32 3.0, %v3067_v56  ;;  %v1096_v49 = vadd.f32 4.0, %v3067_v56  ;;  %1873 = vrcp.f32 %v3370_v58 }
 0x106   :  { %v1100_v62 = vadd.f32 5.0, %v3067_v56  ;;  %v1108_v25 = vadd.f32 6.0, %v3067_v56  ;;  %v1112_v47 = vadd.f32 7.0, %v3067_v56  ;;  %1875 = vrcp.f32 %v3382_v44 }
 0x107   :  { %v684_v46 = vmul.f32 %v680_v16, %v3305_v29  ;;  %v896_v19 = vmul.f32 %v876_v34, %v872_v4  ;;  %v900_v9 = vmul.f32 %v888_v5, %v860_v2  ;;  %v972_v55 = vmul.f32 %v3346_v31, %v940_v35 }
 0x108   :  { %v976_v7 = vmul.f32 %v948_v52, %v3344_v27  ;;  %v988_v63 = vmul.f32 %v3350_v17, %v956_v59  ;;  %v992_v12 = vmul.f32 %v964_v22, %v3348_v0  ;;  %1877 = vrcp.f32 %v3378_v18 }
 0x109   :  { %v3406_v1 = vpop.eup %1871  ;;  %v1020_v33 = vmul.f32 %v1016_v54, %v3010_v32  ;;  %v1032_v57 = vmul.f32 %v1028_v10, %v1024_v43  ;;  %v1048_v41 = vmul.f32 %v1044_v13, %v1040_v61  ;;  %v1060_v30 = vmul.f32 %v1056_v48, %v1052_v14  ;;  %v4340_v43 = vld [vmem:[#allocation8_spill] sm:$0xff] }
 0x10a   :  { %v1076_v29 = vmul.f32 %v1072_v26, %v3067_v56  ;;  %v1088_v11 = vmul.f32 %v1084_v53, %v1080_v15  ;;  %v1104_v6 = vmul.f32 %v1100_v62, %v1096_v49  ;;  %v1116_v31 = vmul.f32 %v1112_v47, %v1108_v25  ;;  %v4343_v25 = vld [vmem:[#allocation12_spill] sm:$0xff] }
 0x10b   :  { %v3410_v40 = vpop.eup %1873  ;;  %v3413_v27 = vadd.f32 %v468_v20, %v3290_v36  ;;  %v3415_v0 = vadd.f32 %v576_v24, %v556_v45  ;;  %v3417_v17 = vadd.f32 %v684_v46, %v664_v28  ;;  %v3419_v21 = vadd.f32 %v792_v51, %v788_v39 }
 0x10c   :  { %v1876_v2 = vpop.eup %1875  ;;  %v980_v34 = vadd.f32 %v976_v7, %v972_v55  ;;  %v996_v37 = vadd.f32 %v992_v12, %v988_v63  ;;  %v1192_v42 = vmul.f32 0.003968254, %v4339_v60  ;;  %v1451_v3 = vmul.f32 %v3406_v1, %v3374_v38  ;;  %v3470_v63 = vld [vmem:[%s4140_s1 + $0x8] sm:$0xff] }
 0x10d   :  { %v3424_v50 = vadd.f32 %v900_v9, %v896_v19  ;;  %v1036_v16 = vmul.f32 %v1032_v57, %v1020_v33  ;;  %v1064_v4 = vmul.f32 %v1060_v30, %v1048_v41  ;;  %v1543_v36 = vmul.f32 %v1876_v2, %v3382_v44  ;;  %v4344_v9 = vld [vmem:[#allocation9_spill] sm:$0xff]  ;;  %4345 = vst [vmem:[#allocation2_spill] sm:$0xff] %v3470_v63  ;;  %v4346_v41 = vld [vmem:[#allocation3_spill] sm:$0xff] }
 0x10e   :  { %v3427_v20 = vpop.eup %1877  ;;  %v1092_v45 = vmul.f32 %v1088_v11, %v1076_v29  ;;  %v1120_v28 = vmul.f32 %v1116_v31, %v1104_v6  ;;  %v1259_v39 = vmul.f32 %v3410_v40, %v3370_v58  ;;  %v1553_v24 = vand.u32 2147483648, %v3382_v44 }
 0x10f   :  { %v1544_v51 = vsub.f32 1.0, %v1543_v36  ;;  %vm1547_vm4 = vweird.f32 %v3382_v44  ;;  %vm1548_vm5 = vweird.f32 %v1876_v2  ;;  %v1551_v5 = vand.u32 2147483647, %v3382_v44  ;;  %v3448_v44 = vld [vmem:[%s4139_s0 + $0x8] sm:$0xff] }
 0x110   :  { %v3435_v35 = vmul.f32 %v3360_v23, %v980_v34  ;;  %v3438_v52 = vmul.f32 %v996_v37, %v3356_v8  ;;  %v1196_v59 = vsub.f32 0.008333334, %v1192_v42  ;;  %v1452_v22 = vsub.f32 1.0, %v1451_v3  ;;  %vm3451_vm7 = vmor %vm1547_vm4, %vm1548_vm5 }
 0x111   :  { %v1068_v54 = vmul.f32 %v1064_v4, %v1036_v16  ;;  %v3441_v10 = vmul.f32 0.5, %v4340_v43  ;;  %v1355_v61 = vmul.f32 %v3427_v20, %v3378_v18  ;;  %v1545_v13 = vmul.f32 %v1876_v2, %v1544_v51 }
 0x112   :  { %v1124_v23 = vmul.f32 %v1120_v28, %v1092_v45  ;;  %vm1263_vm6 = vweird.f32 %v3370_v58  ;;  %v1554_v14 = vor.u32 1.1754944e-38, %v1553_v24  ;;  %v3456_v48 = vadd.f32 8.0, %v3448_v44 }
 0x113   :  { %v1260_v26 = vsub.f32 1.0, %v1259_v39  ;;  %v1267_v15 = vand.u32 2147483647, %v3370_v58  ;;  %v1546_v53 = vadd.f32 %v1876_v2, %v1545_v13  ;;  %vm1552_vm8 = vcmp.eq.f32.partialorder %v1551_v5, 8.507059e+37 }
 0x114   :  { %v1200_v49 = vmul.f32 %v1196_v59, %v4339_v60  ;;  %v1269_v62 = vand.u32 2147483648, %v3370_v58  ;;  %v1288_v47 = vmul.f32 0.003968254, %v4343_v25  ;;  %v1453_v46 = vmul.f32 %v3406_v1, %v1452_v22  ;;  %v4351_v59 = vld [vmem:[#allocation6_spill] sm:$0xff] }
 0x115   :  { %v1356_v19 = vsub.f32 1.0, %v1355_v61  ;;  %v1384_v55 = vmul.f32 0.003968254, %v4344_v9  ;;  %vm1455_vm9 = vweird.f32 %v3374_v38  ;;  %v1550_v7 = vsel %vm3451_vm7, %v1876_v2, %v1546_v53 }
 0x116   :  { %vm1456_vm10 = vweird.f32 %v3406_v1  ;;  %v1555_v12 = vsel %vm1552_vm8, %v1554_v14, %v1550_v7  ;;  %1879 = vrcp.f32 %v3456_v48  ;;  %v3475_v33 = vadd.f32 8.0, %v3470_v63 }
 0x117   :  { %v1261_v57 = vmul.f32 %v3410_v40, %v1260_v26  ;;  %v3479_v30 = vmul.f32 0.5, %v4346_v41  ;;  %v1461_v29 = vand.u32 2147483648, %v3374_v38  ;;  %v1556_v11 = vmul.f32 %v1555_v12, %v1068_v54  ;;  %vm3494_vm13 = vmor %vm1455_vm9, %vm1456_vm10 }
 0x118   :  { %v1292_v6 = vsub.f32 0.008333334, %v1288_v47  ;;  %v1454_v31 = vadd.f32 %v3406_v1, %v1453_v46  ;;  %v1459_v2 = vand.u32 2147483647, %v3374_v38  ;;  %v3486_v34 = vadd.f32 %v3470_v63, %v3448_v44 }
 0x119   :  { %vm1264_vm11 = vweird.f32 %v3410_v40  ;;  %vm1359_vm12 = vweird.f32 %v3378_v18  ;;  %v1388_v37 = vsub.f32 0.008333334, %v1384_v55  ;;  %v3498_v3 = vmul.f32 %v1556_v11, %v1124_v23  ;;  %v4354_v23 = vld [vmem:[#allocation11_spill] sm:$0xff] }
 0x11a   :  { %v1204_v16 = vsub.f32 0.083333336, %v1200_v49  ;;  %v1357_v4 = vmul.f32 %v3427_v20, %v1356_v19  ;;  %1881 = vrcp.f32 %v3475_v33  ;;  %v3503_v36 = vadd.f32 8.0, %v3486_v34  ;;  %vm3512_vm14 = vmor %vm1263_vm6, %vm1264_vm11  ;;  %v4359_v19 = vld [vmem:[#allocation13_spill] sm:$0xff] }
 0x11b   :  { %v1262_v45 = vadd.f32 %v3410_v40, %v1261_v57  ;;  %v1363_v28 = vand.u32 2147483647, %v3378_v18  ;;  %v1462_v39 = vor.u32 1.1754944e-38, %v1461_v29  ;;  %1883 = vrcp.f32 %v3498_v3  ;;  %v4361_v29 = vld [vmem:[#allocation7_spill] sm:$0xff] }
 0x11c   :  { %v3508_v38 = vpop.eup %1879  ;;  %v1296_v51 = vmul.f32 %v1292_v6, %v4343_v25  ;;  %vm1360_vm0 = vweird.f32 %v3427_v20  ;;  %v1458_v5 = vsel %vm3494_vm13, %v3406_v1, %v1454_v31  ;;  %vm1460_vm1 = vcmp.eq.f32.partialorder %v1459_v2, 8.507059e+37  ;;  %v3535_v1 = vld [vmem:[%s4141_s2 + $0x8] sm:$0xff] }
 0x11d   :  { %v1188_v22 = vsub.f32 %v4351_v59, %v3441_v10  ;;  %vm3523_vm2 = vcmp.eq.f32.partialorder %v1267_v15, 8.507059e+37  ;;  %v1365_v43 = vand.u32 2147483648, %v3378_v18  ;;  %v1392_v61 = vmul.f32 %v1388_v37, %v4344_v9  ;;  %vm3543_vm3 = vmor %vm1359_vm12, %vm1360_vm0 }
 0x11e   :  { %v1270_v13 = vor.u32 1.1754944e-38, %v1269_v62  ;;  %v1284_v8 = vsub.f32 %v4354_v23, %v3479_v30  ;;  %v1358_v14 = vadd.f32 %v3427_v20, %v1357_v4  ;;  %1885 = vrcp.f32 %v3503_v36  ;;  %v4360_v30 = vld [vmem:[#allocation10_spill] sm:$0xff] }
 0x11f   :  { %v1266_v10 = vsel %vm3512_vm14, %v3410_v40, %v1262_v45  ;;  %v3547_v15 = vsel %vm1460_vm1, %v1462_v39, %v1458_v5  ;;  %v61_v53 = vmul.f32 %v3508_v38, %v3456_v48  ;;  %v3552_v49 = vadd.f32 8.0, %v3535_v1  ;;  %v4362_v45 = vld [vmem:[#allocation5_spill] sm:$0xff]  ;;  %v4363_v5 = vld [vmem:[#allocation4_spill] sm:$0xff] }
 0x120   :  { %v3554_v62 = vpop.eup %1881  ;;  %v1208_v47 = vmul.f32 %v1204_v16, %v4339_v60  ;;  %v1300_v46 = vsub.f32 0.083333336, %v1296_v51  ;;  %vm3557_vm4 = vcmp.eq.f32.partialorder %v1363_v28, 8.507059e+37  ;;  %v1376_v55 = vmul.f32 0.5, %v4359_v19 }
 0x121   :  { %v1884_v7 = vpop.eup %1883  ;;  %v1366_v12 = vor.u32 1.1754944e-38, %v1365_v43  ;;  %v1396_v57 = vsub.f32 0.083333336, %v1392_v61  ;;  %v1472_v41 = vadd.f32 %v3415_v0, %v3413_v27  ;;  %v1480_v11 = vadd.f32 %v4361_v29, %v4360_v30 }
 0x122   :  { %v1271_v6 = vsel %vm3523_vm2, %v1270_v13, %v1266_v10  ;;  %v1362_v60 = vsel %vm3543_vm3, %v3427_v20, %v1358_v14  ;;  %v1492_v31 = vmul.f32 %v3547_v15, %v3370_v58  ;;  %v1607_v2 = vmul.f32 %v1884_v7, %v3498_v3 }
 0x123   :  { %v1617_v37 = vand.u32 2147483648, %v3498_v3  ;;  %v62_v42 = vsub.f32 1.0, %v61_v53  ;;  %v169_v27 = vmul.f32 %v3554_v62, %v3475_v33  ;;  %1887 = vrcp.f32 %v3552_v49 }
 0x124   :  { %v3578_v0 = vpop.eup %1885  ;;  %v1608_v16 = vsub.f32 1.0, %v1607_v2  ;;  %vm1611_vm5 = vweird.f32 %v3498_v3  ;;  %vm1612_vm6 = vweird.f32 %v1884_v7  ;;  %v1615_v20 = vand.u32 2147483647, %v3498_v3 }
 0x125   :  { %v3582_v4 = vsub.f32 %v1188_v22, %v1208_v47  ;;  %v1304_v58 = vmul.f32 %v1300_v46, %v4343_v25  ;;  %v1380_v28 = vsub.f32 %v4362_v45, %v1376_v55  ;;  %v1400_v39 = vmul.f32 %v1396_v57, %v4344_v9  ;;  %vm3594_vm7 = vmor %vm1611_vm5, %vm1612_vm6 }
 0x126   :  { %v1367_v24 = vsel %vm3557_vm4, %v1366_v12, %v1362_v60  ;;  %v1476_v51 = vsub.f32 %v1472_v41, %v3417_v17  ;;  %v1484_v59 = vsub.f32 %v1480_v11, %v4363_v5  ;;  %v1609_v54 = vmul.f32 %v1884_v7, %v1608_v16  ;;  %v1939_v16 = vld [vmem:[%s4140_s1 + $0x18] sm:$0xff] }
 0x127   :  { %v3592_v43 = vmul.f32 %v1271_v6, %v3419_v21  ;;  %v1618_v25 = vor.u32 1.1754944e-38, %v1617_v37  ;;  %v170_v22 = vsub.f32 1.0, %v169_v27  ;;  %v277_v9 = vmul.f32 %v3578_v0, %v3503_v36 }
 0x128   :  { %v1496_v61 = vmul.f32 %v1492_v31, %v3378_v18  ;;  %v1610_v13 = vadd.f32 %v1884_v7, %v1609_v54  ;;  %vm1616_vm8 = vcmp.eq.f32.partialorder %v1615_v20, 8.507059e+37  ;;  %v63_v17 = vmul.f32 %v3508_v38, %v62_v42  ;;  %v1938_v31 = vld [vmem:[%s4139_s0 + $0x18] sm:$0xff] }
 0x129   :  { %v3602_v23 = vpop.eup %1887  ;;  %v1012_v21 = vadd.f32 %v3438_v52, %v3435_v35  ;;  %v1308_v14 = vsub.f32 %v1284_v8, %v1304_v58  ;;  %v1368_v10 = vmul.f32 %v1367_v24, %v3424_v50  ;;  %v3607_v26 = vsub.f32 %v1380_v28, %v1400_v39  ;;  %v3659_v58 = vld [vmem:[%s4142_s3 + $0x8] sm:$0xff] }
 0x12a   :  { %v1614_v53 = vsel %vm3594_vm7, %v1884_v7, %v1610_v13  ;;  %vm65_vm9 = vweird.f32 %v3456_v48  ;;  %vm66_vm10 = vweird.f32 %v3508_v38  ;;  %v71_v18 = vand.u32 2147483648, %v3456_v48 }
 0x12b   :  { %v1619_v47 = vsel %vm1616_vm8, %v1618_v25, %v1614_v53  ;;  %v69_v46 = vand.u32 2147483647, %v3456_v48  ;;  %v171_v40 = vmul.f32 %v3554_v62, %v170_v22  ;;  %v278_v35 = vsub.f32 1.0, %v277_v9  ;;  %vm3619_vm11 = vmor %vm65_vm9, %vm66_vm10 }
 0x12c   :  { %v1276_v50 = vsub.f32 %v3582_v4, %v3592_v43  ;;  %v1488_v52 = vsub.f32 %v1476_v51, %v1484_v59  ;;  %v1620_v8 = vmul.f32 %v1619_v47, %v1496_v61  ;;  %v64_v19 = vadd.f32 %v3508_v38, %v63_v17 }
 0x12d   :  { %v1372_v55 = vsub.f32 %v1308_v14, %v1368_v10  ;;  %vm173_vm12 = vweird.f32 %v3475_v33  ;;  %vm174_vm13 = vweird.f32 %v3554_v62  ;;  %v385_v12 = vmul.f32 %v3602_v23, %v3552_v49 }
 0x12e   :  { %v1464_v57 = vmul.f32 %v3547_v15, %v1012_v21  ;;  %1889 = vlog2.f32 %v1620_v8  ;;  %v177_v41 = vand.u32 2147483647, %v3475_v33  ;;  %v179_v30 = vand.u32 2147483648, %v3475_v33  ;;  %vm3643_vm0 = vmor %vm173_vm12, %vm174_vm13 }
 0x12f   :  { %vm3630_vm14 = vcmp.eq.f32.partialorder %v69_v46, 8.507059e+37  ;;  %v72_v11 = vor.u32 1.1754944e-38, %v71_v18  ;;  %v172_v6 = vadd.f32 %v3554_v62, %v171_v40  ;;  %v279_v60 = vmul.f32 %v3578_v0, %v278_v35 }
 0x130   :  { %v1636_v15 = vsub.f32 %v1938_v31, %v3010_v32  ;;  %v68_v2 = vsel %vm3619_vm11, %v3508_v38, %v64_v19  ;;  %vm281_vm1 = vweird.f32 %v3503_v36  ;;  %v285_v42 = vand.u32 2147483647, %v3503_v36 }
 0x131   :  { %v1660_v27 = vsub.f32 %v3010_v32, %v1938_v31  ;;  %v1664_v20 = vsub.f32 %v3067_v56, %v1939_v16  ;;  %vm282_vm2 = vweird.f32 %v3578_v0  ;;  %v386_v4 = vsub.f32 1.0, %v385_v12 }
 0x132   :  { %v1648_v38 = vsub.f32 %v1939_v16, %v3067_v56  ;;  %vm3661_vm3 = vcmp.eq.f32.partialorder %v177_v41, 8.507059e+37  ;;  %v180_v32 = vor.u32 1.1754944e-38, %v179_v30  ;;  %v287_v28 = vand.u32 2147483648, %v3503_v36  ;;  %vm3680_vm4 = vmor %vm281_vm1, %vm282_vm2 }
 0x133   :  { %v3668_v39 = vsel %vm3630_vm14, %v72_v11, %v68_v2  ;;  %v176_v56 = vsel %vm3643_vm0, %v3554_v62, %v172_v6  ;;  %v280_v24 = vadd.f32 %v3578_v0, %v279_v60  ;;  %v3675_v51 = vadd.f32 8.0, %v3659_v58 }
 0x134   :  { %4374 = vst [vmem:[#allocation8_spill] sm:$0xff] %v3668_v39  ;;  %v1890_v5 = vpop.eup %1889  ;;  %v1468_v59 = vsub.f32 %v3607_v26, %v1464_v57  ;;  %vm3684_vm5 = vcmp.eq.f32.partialorder %v285_v42, 8.507059e+37  ;;  %vm389_vm6 = vweird.f32 %v3552_v49  ;;  %v1640_v3 = vmul.f32 %v1636_v15, %v1276_v50 }
 0x135   :  { %v1628_v62 = vmul.f32 0.6931472, %v1890_v5  ;;  %v1668_v25 = vadd.f32 %v1664_v20, %v1660_v27  ;;  %v387_v22 = vmul.f32 %v3602_v23, %v386_v4  ;;  %v1652_v9 = vmul.f32 %v1648_v38, %v1372_v55 }
 0x136   :  { %v3692_v61 = vmul.f32 %v3668_v39, %v3668_v39  ;;  %v3696_v13 = vsel %vm3661_vm3, %v180_v32, %v176_v56  ;;  %v288_v17 = vor.u32 1.1754944e-38, %v287_v28  ;;  %v284_v14 = vsel %vm3680_vm4, %v3578_v0, %v280_v24 }
 0x137   :  { %4379 = vst [vmem:[#allocation12_spill] sm:$0xff] %v3696_v13  ;;  %v1632_v21 = vadd.f32 %v1628_v62, %v1488_v52  ;;  %vm390_vm7 = vweird.f32 %v3602_v23  ;;  %1891 = vrcp.f32 %v3675_v51  ;;  %v3705_v10 = vadd.f32 %v3659_v58, %v3535_v1 }
 0x138   :  { %v393_v26 = vand.u32 2147483647, %v3552_v49  ;;  %v395_v53 = vand.u32 2147483648, %v3552_v49  ;;  %v1672_v47 = vmul.f32 %v1668_v25, %v1468_v59  ;;  %v3711_v46 = vmul.f32 %v3696_v13, %v3696_v13  ;;  %vm3721_vm8 = vmor %vm389_vm6, %vm390_vm7 }
 0x139   :  { %v1644_v18 = vadd.f32 %v1640_v3, %v1632_v21  ;;  %v388_v0 = vadd.f32 %v3602_v23, %v387_v22  ;;  %v126_v40 = vmul.f32 0.0007936508, %v3692_v61  ;;  %v3717_v35 = vsel %vm3684_vm5, %v288_v17, %v284_v14 }
 0x13a   :  { %4380 = vst [vmem:[#allocation9_spill] sm:$0xff] %v3711_v46  ;;  %1893 = vlog2.f32 %v3456_v48  ;;  %v3727_v8 = vadd.f32 8.0, %v3705_v10  ;;  %vm394_vm9 = vcmp.eq.f32.partialorder %v393_v26, 8.507059e+37  ;;  %v396_v19 = vor.u32 1.1754944e-38, %v395_v53 }
 0x13b   :  { %4381 = vst [vmem:[#allocation3_spill] sm:$0xff] %v3717_v35  ;;  %v1656_v52 = vadd.f32 %v1652_v9, %v1644_v18  ;;  %v234_v12 = vmul.f32 0.0007936508, %v3711_v46  ;;  %v3734_v57 = vmul.f32 %v3717_v35, %v3717_v35  ;;  %v392_v41 = vsel %vm3721_vm8, %v3602_v23, %v388_v0 }
 0x13c   :  { %v130_v30 = vsub.f32 0.0027777778, %v126_v40  ;;  %1895 = vlog2.f32 %v3475_v33  ;;  %v3742_v11 = vsel %vm394_vm9, %v396_v19, %v392_v41  ;;  %v1748_v16 = vadd.f32 -0.5, %v3456_v48 }
 0x13d   :  { %v3729_v55 = vpop.eup %1891  ;;  %v1676_v7 = vadd.f32 %v1672_v47, %v1656_v52  ;;  %4384 = vst [vmem:[#allocation6_spill] sm:$0xff] %v3734_v57  ;;  %1897 = vrcp.f32 %v3727_v8  ;;  %v238_v15 = vsub.f32 0.0027777778, %v234_v12  ;;  %v342_v2 = vmul.f32 0.0007936508, %v3734_v57 }
 0x13e   :  { %1899 = vlog2.f32 %v3503_v36  ;;  %v493_v6 = vmul.f32 %v3729_v55, %v3675_v51  ;;  %v134_v23 = vmul.f32 %v130_v30, %v3692_v61  ;;  %v438_v37 = vmul.f32 %v3742_v11, %v3742_v11 }
 0x13f   :  { %v1680_v29 = vand.u32 2147483647, %v1676_v7  ;;  %1901 = vlog2.f32 %v3552_v49  ;;  %v242_v38 = vmul.f32 %v238_v15, %v3711_v46  ;;  %v346_v45 = vsub.f32 0.0027777778, %v342_v2 }
 0x140   :  { %v1894_v60 = vpop.eup %1893  ;;  %v494_v20 = vsub.f32 1.0, %v493_v6  ;;  %v138_v28 = vsub.f32 0.083333336, %v134_v23  ;;  %v450_v56 = vmul.f32 0.0007936508, %v438_v37  ;;  %v1752_v48 = vadd.f32 -0.5, %v3475_v33 }
 0x141   :  { %v1691_v31 = vsel %vm1681_vm15, %v1680_v29, 0.0  ;;  %v3752_v27 = vmul.f32 0.6931472, %v1894_v60  ;;  %v246_v62 = vsub.f32 0.083333336, %v242_v38  ;;  %v350_v25 = vmul.f32 %v346_v45, %v3734_v57 }
 0x142   :  { %1692 = vadd.xlane.f32.xlu1 %v1691_v31  ;;  %v1896_v42 = vpop.eup %1895  ;;  %v495_v59 = vmul.f32 %v3729_v55, %v494_v20  ;;  %v142_v22 = vmul.f32 %v138_v28, %v3668_v39  ;;  %v1756_v9 = vadd.f32 -0.5, %v3503_v36  ;;  %vm497_vm10 = vweird.f32 %v3675_v51 }
 0x143   :  { %4385 = vst [vmem:[#allocation11_spill] sm:$0xff] %v3752_v27  ;;  %v3755_v4 = vpop.eup %1897  ;;  %v122_v24 = vmul.f32 %v1748_v16, %v3752_v27  ;;  %v3759_v5 = vmul.f32 0.6931472, %v1896_v42  ;;  %vm498_vm11 = vweird.f32 %v3729_v55  ;;  %v1760_v17 = vadd.f32 -0.5, %v3552_v49 }
 0x144   :  { %v1900_v32 = vpop.eup %1899  ;;  %v601_v54 = vmul.f32 %v3755_v4, %v3727_v8  ;;  %v454_v21 = vsub.f32 0.0027777778, %v450_v56  ;;  %v503_v14 = vand.u32 2147483648, %v3675_v51  ;;  %1903 = vlog2.f32 %v3675_v51  ;;  %vm3779_vm12 = vmor %vm497_vm10, %vm498_vm11 }
 0x145   :  { %4386 = vst [vmem:[#allocation13_spill] sm:$0xff] %v3759_v5  ;;  %v1902_v43 = vpop.eup %1901  ;;  %v3765_v3 = vmul.f32 0.6931472, %v1900_v32  ;;  %v496_v26 = vadd.f32 %v3729_v55, %v495_v59  ;;  %v501_v53 = vand.u32 2147483647, %v3675_v51  ;;  %v230_v47 = vmul.f32 %v1752_v48, %v3759_v5 }
 0x146   :  { %v432_v33 = vmul.f32 0.6931472, %v1902_v43  ;;  %v602_v18 = vsub.f32 1.0, %v601_v54  ;;  %v250_v36 = vmul.f32 %v246_v62, %v3696_v13  ;;  %v354_v0 = vsub.f32 0.083333336, %v350_v25 }
 0x147   :  { %4387 = vst [vmem:[#allocation10_spill] sm:$0xff] %v3765_v3  ;;  %v3783_v49 = vadd.f32 %v142_v22, %v122_v24  ;;  %v3786_v50 = vmul.f32 %v1756_v9, %v3765_v3  ;;  %v3788_v52 = vmul.f32 %v454_v21, %v438_v37  ;;  %v504_v19 = vor.u32 1.1754944e-38, %v503_v14 }
 0x148   :  { %v609_v7 = vand.u32 2147483647, %v3727_v8  ;;  %v611_v12 = vand.u32 2147483648, %v3727_v8  ;;  %v3792_v41 = vmul.f32 %v1760_v17, %v432_v33  ;;  %v500_v30 = vsel %vm3779_vm12, %v3729_v55, %v496_v26 }
 0x149   :  { %4390 = vst [vmem:[#allocation7_spill] sm:$0xff] %v3783_v49  ;;  %vm502_vm13 = vcmp.eq.f32.partialorder %v501_v53, 8.507059e+37  ;;  %v603_v29 = vmul.f32 %v3755_v4, %v602_v18  ;;  %v3798_v60 = vadd.f32 %v250_v36, %v230_v47  ;;  %v3801_v31 = vmul.f32 %v354_v0, %v3717_v35 }
 0x14a   :  { %v1904_v6 = vpop.eup %1903  ;;  %v3804_v15 = vadd.f32 -0.5, %v3675_v51  ;;  %vm605_vm14 = vweird.f32 %v3727_v8  ;;  %vm606_vm0 = vweird.f32 %v3755_v4  ;;  %1905 = vlog2.f32 %v3727_v8 }
 0x14b   :  { %4391 = vst [vmem:[#allocation5_spill] sm:$0xff] %v3798_v60  ;;  %v3810_v55 = vadd.f32 -0.5, %v3727_v8  ;;  %v690_v2 = vadd.f32 1.0, %v3448_v44  ;;  %v462_v23 = vsub.f32 0.083333336, %v3788_v52  ;;  %v3814_v37 = vsel %vm502_vm13, %v504_v19, %v500_v30  ;;  %vm3825_vm2 = vmor %vm605_vm14, %vm606_vm0 }
 0x14c   :  { %vm3816_vm1 = vcmp.eq.f32.partialorder %v609_v7, 8.507059e+37  ;;  %v612_v51 = vor.u32 1.1754944e-38, %v611_v12  ;;  %v3820_v16 = vmul.f32 0.6931472, %v1904_v6  ;;  %v604_v20 = vadd.f32 %v3755_v4, %v603_v29 }
 0x14d   :  { %v694_v38 = vadd.f32 2.0, %v3448_v44  ;;  %v698_v8 = vadd.f32 3.0, %v3448_v44  ;;  %v702_v32 = vadd.f32 4.0, %v3448_v44  ;;  %v706_v28 = vadd.f32 5.0, %v3448_v44 }
 0x14e   :  { %v710_v56 = vadd.f32 6.0, %v3448_v44  ;;  %v714_v24 = vadd.f32 7.0, %v3448_v44  ;;  %v546_v59 = vmul.f32 %v3814_v37, %v3814_v37  ;;  %v3836_v54 = vadd.f32 1.0, %v3486_v34 }
 0x14f   :  { %v3839_v43 = vadd.f32 2.0, %v3486_v34  ;;  %v3842_v48 = vadd.f32 3.0, %v3486_v34  ;;  %v3845_v62 = vadd.f32 4.0, %v3486_v34  ;;  %v3848_v25 = vadd.f32 5.0, %v3486_v34 }
 0x150   :  { %v3851_v22 = vadd.f32 6.0, %v3486_v34  ;;  %v3854_v9 = vadd.f32 7.0, %v3486_v34  ;;  %v1906_v17 = vpop.eup %1905  ;;  %v608_v21 = vsel %vm3825_vm2, %v3755_v4, %v604_v20  ;;  %v1126_v14 = vadd.f32 1.0, %v3705_v10 }
 0x151   :  { %v1134_v33 = vadd.f32 2.0, %v3705_v10  ;;  %v1138_v26 = vadd.f32 3.0, %v3705_v10  ;;  %v1150_v53 = vadd.f32 4.0, %v3705_v10  ;;  %v1154_v18 = vadd.f32 5.0, %v3705_v10 }
 0x152   :  { %4396 = vst [vmem:[#allocation4_spill] sm:$0xff] %v3854_v9  ;;  %v1162_v47 = vadd.f32 6.0, %v3705_v10  ;;  %v1166_v36 = vadd.f32 7.0, %v3705_v10  ;;  %v718_v0 = vmul.f32 %v690_v2, %v3448_v44  ;;  %v722_v40 = vadd.f32 %v690_v2, %v3448_v44 }
 0x153   :  { %v726_v52 = vmul.f32 %v698_v8, %v694_v38  ;;  %v730_v4 = vadd.f32 %v698_v8, %v694_v38  ;;  %v3870_v19 = vmul.f32 %v3836_v54, %v3486_v34  ;;  %v3874_v7 = vmul.f32 %v3842_v48, %v3839_v43 }
 0x154   :  { %v3878_v12 = vmul.f32 %v3848_v25, %v3845_v62  ;;  %v3882_v30 = vmul.f32 %v3854_v9, %v3851_v22  ;;  %v558_v29 = vmul.f32 0.0007936508, %v546_v59  ;;  %v3886_v44 = vsel %vm3816_vm1, %v612_v51, %v608_v21 }
 0x155   :  { %4397 = vst [vmem:[#allocation14_spill] sm:$0xff] %v3870_v19  ;;  %v734_v6 = vmul.f32 %v706_v28, %v702_v32  ;;  %v742_v2 = vmul.f32 %v714_v24, %v710_v56  ;;  %v1130_v20 = vmul.f32 %v1126_v14, %v3705_v10  ;;  %v1142_v38 = vmul.f32 %v1138_v26, %v1134_v33 }
 0x156   :  { %4398 = vst [vmem:[#allocation15_spill] sm:$0xff] %v3874_v7  ;;  %v1158_v8 = vmul.f32 %v1154_v18, %v1150_v53  ;;  %v1170_v45 = vmul.f32 %v1166_v36, %v1162_v47  ;;  %v466_v60 = vmul.f32 %v462_v23, %v3742_v11  ;;  %v738_v49 = vadd.f32 %v706_v28, %v702_v32 }
 0x157   :  { %4399 = vst [vmem:[#allocation16_spill] sm:$0xff] %v3878_v12  ;;  %v746_v3 = vadd.f32 %v714_v24, %v710_v56  ;;  %v3890_v5 = vmul.f32 %v726_v52, %v718_v0  ;;  %v654_v35 = vmul.f32 %v3886_v44, %v3886_v44  ;;  %v754_v13 = vmul.f32 %v726_v52, %v722_v40 }
 0x158   :  { %4400 = vst [vmem:[#allocation17_spill] sm:$0xff] %v3882_v30  ;;  %v3896_v42 = vmul.f32 %v3874_v7, %v3870_v19  ;;  %v3900_v10 = vmul.f32 %v3882_v30, %v3878_v12  ;;  %v562_v51 = vsub.f32 0.0027777778, %v558_v29  ;;  %v758_v21 = vmul.f32 %v730_v4, %v718_v0 }
 0x159   :  { %v3902_v14 = vmul.f32 %v742_v2, %v734_v6  ;;  %v798_v11 = vadd.f32 1.0, %v3470_v63  ;;  %v802_v23 = vadd.f32 2.0, %v3470_v63  ;;  %v806_v32 = vadd.f32 3.0, %v3470_v63 }
 0x15a   :  { %4401 = vst [vmem:[#allocation18_spill] sm:$0xff] %v3896_v42  ;;  %v1146_v28 = vmul.f32 %v1142_v38, %v1130_v20  ;;  %v1174_v56 = vmul.f32 %v1170_v45, %v1158_v8  ;;  %v810_v24 = vadd.f32 4.0, %v3470_v63  ;;  %v814_v33 = vadd.f32 5.0, %v3470_v63 }
 0x15b   :  { %4402 = vst [vmem:[#allocation19_spill] sm:$0xff] %v3900_v10  ;;  %v818_v26 = vadd.f32 6.0, %v3470_v63  ;;  %v822_v53 = vadd.f32 7.0, %v3470_v63  ;;  %v666_v18 = vmul.f32 0.0007936508, %v654_v35  ;;  %v770_v47 = vmul.f32 %v742_v2, %v738_v49 }
 0x15c   :  { %v774_v36 = vmul.f32 %v746_v3, %v734_v6  ;;  %v3913_v0 = vmul.f32 %v3900_v10, %v3896_v42  ;;  %v3917_v40 = vadd.f32 %v3801_v31, %v3786_v50  ;;  %v3920_v52 = vadd.f32 %v466_v60, %v3792_v41 }
 0x15d   :  { %v3924_v4 = vmul.f32 %v3804_v15, %v3820_v16  ;;  %v3926_v29 = vmul.f32 0.6931472, %v1906_v17  ;;  %v3928_v20 = vmul.f32 %v562_v51, %v546_v59  ;;  %v3930_v3 = vadd.f32 %v758_v21, %v754_v13 }
 0x15e   :  { %4403 = vst [vmem:[#allocation20_spill] sm:$0xff] %v3917_v40  ;;  %v3934_v49 = vmul.f32 %v3902_v14, %v3890_v5  ;;  %v3936_v6 = vmul.f32 %v1174_v56, %v1146_v28  ;;  %v826_v50 = vmul.f32 %v798_v11, %v3470_v63  ;;  %v834_v41 = vmul.f32 %v806_v32, %v802_v23 }
 0x15f   :  { %4404 = vst [vmem:[#allocation21_spill] sm:$0xff] %v3920_v52  ;;  %v842_v60 = vmul.f32 %v814_v33, %v810_v24  ;;  %v850_v31 = vmul.f32 %v822_v53, %v818_v26  ;;  %v670_v2 = vsub.f32 0.0027777778, %v666_v18  ;;  %v778_v15 = vadd.f32 %v774_v36, %v770_v47 }
 0x160   :  { %4405 = vst [vmem:[#allocation22_spill] sm:$0xff] %v3924_v4  ;;  %v830_v16 = vadd.f32 %v798_v11, %v3470_v63  ;;  %1907 = vrcp.f32 %v3913_v0  ;;  %v1014_v13 = vadd.f32 1.0, %v3535_v1  ;;  %v1022_v59 = vadd.f32 2.0, %v3535_v1 }
 0x161   :  { %v1026_v17 = vadd.f32 3.0, %v3535_v1  ;;  %v1038_v38 = vadd.f32 4.0, %v3535_v1  ;;  %v1042_v8 = vadd.f32 5.0, %v3535_v1  ;;  %v1050_v45 = vadd.f32 6.0, %v3535_v1 }
 0x162   :  { %v1054_v51 = vadd.f32 7.0, %v3535_v1  ;;  %1909 = vrcp.f32 %v3936_v6  ;;  %v838_v21 = vadd.f32 %v806_v32, %v802_v23  ;;  %v3949_v11 = vmul.f32 %v834_v41, %v826_v50 }
 0x163   :  { %v874_v28 = vmul.f32 %v850_v31, %v842_v60  ;;  %v1070_v56 = vadd.f32 1.0, %v3659_v58  ;;  %v1078_v18 = vadd.f32 2.0, %v3659_v58  ;;  %v1082_v47 = vadd.f32 3.0, %v3659_v58 }
 0x164   :  { %v1094_v36 = vadd.f32 4.0, %v3659_v58  ;;  %v1098_v63 = vadd.f32 5.0, %v3659_v58  ;;  %v570_v40 = vsub.f32 0.083333336, %v3928_v20  ;;  %v846_v52 = vadd.f32 %v814_v33, %v810_v24 }
 0x165   :  { %v1106_v42 = vadd.f32 6.0, %v3659_v58  ;;  %v1110_v23 = vadd.f32 7.0, %v3659_v58  ;;  %v1018_v10 = vmul.f32 %v1014_v13, %v3535_v1  ;;  %v1030_v27 = vmul.f32 %v1026_v17, %v1022_v59 }
 0x166   :  { %v3959_v32 = vpop.eup %1907  ;;  %v1046_v4 = vmul.f32 %v1042_v8, %v1038_v38  ;;  %v1058_v57 = vmul.f32 %v1054_v51, %v1050_v45  ;;  %v674_v39 = vmul.f32 %v670_v2, %v654_v35  ;;  %v854_v12 = vadd.f32 %v822_v53, %v818_v26 }
 0x167   :  { %v862_v46 = vmul.f32 %v834_v41, %v830_v16  ;;  %v866_v30 = vmul.f32 %v838_v21, %v826_v50  ;;  %v3963_v7 = vmul.f32 %v874_v28, %v3949_v11  ;;  %v1074_v24 = vmul.f32 %v1070_v56, %v3659_v58  ;;  %v4409_v21 = vld [vmem:[#allocation15_spill] sm:$0xff] }
 0x168   :  { %v1910_v19 = vpop.eup %1909  ;;  %v1086_v33 = vmul.f32 %v1082_v47, %v1078_v18  ;;  %v1102_v20 = vmul.f32 %v1098_v63, %v1094_v36  ;;  %v1114_v9 = vmul.f32 %v1110_v23, %v1106_v42  ;;  %1911 = vrcp.f32 %v3934_v49  ;;  %v4410_v18 = vld [vmem:[#allocation14_spill] sm:$0xff]  ;;  %v4411_v36 = vld [vmem:[#allocation17_spill] sm:$0xff] }
 0x169   :  { %v1421_v13 = vmul.f32 %v3959_v32, %v3913_v0  ;;  %v1513_v59 = vmul.f32 %v1910_v19, %v3936_v6  ;;  %v878_v35 = vmul.f32 %v850_v31, %v846_v52  ;;  %v1034_v26 = vmul.f32 %v1030_v27, %v1018_v10 }
 0x16a   :  { %v1062_v53 = vmul.f32 %v1058_v57, %v1046_v4  ;;  %v1523_v50 = vand.u32 2147483648, %v3936_v6  ;;  %vm1517_vm3 = vweird.f32 %v3936_v6  ;;  %vm1518_vm4 = vweird.f32 %v1910_v19 }
 0x16b   :  { %v1514_v41 = vsub.f32 1.0, %v1513_v59  ;;  %v1521_v2 = vand.u32 2147483647, %v3936_v6  ;;  %v678_v63 = vsub.f32 0.083333336, %v674_v39  ;;  %v870_v42 = vadd.f32 %v866_v30, %v862_v46  ;;  %vm3979_vm5 = vmor %vm1517_vm3, %vm1518_vm4 }
 0x16c   :  { %v882_v16 = vmul.f32 %v854_v12, %v842_v60  ;;  %1913 = vrcp.f32 %v3963_v7  ;;  %v1090_v17 = vmul.f32 %v1086_v33, %v1074_v24  ;;  %v1118_v38 = vmul.f32 %v1114_v9, %v1102_v20 }
 0x16d   :  { %v1422_v8 = vsub.f32 1.0, %v1421_v13  ;;  %v1515_v45 = vmul.f32 %v1910_v19, %v1514_v41  ;;  %v662_v57 = vmul.f32 %v3810_v55, %v3926_v29  ;;  %v786_v27 = vmul.f32 %v3902_v14, %v3930_v3  ;;  %v4415_v13 = vld [vmem:[#allocation16_spill] sm:$0xff]  ;;  %v4418_v41 = vld [vmem:[#allocation22_spill] sm:$0xff] }
 0x16e   :  { %v790_v10 = vmul.f32 %v778_v15, %v3890_v5  ;;  %v1524_v39 = vor.u32 1.1754944e-38, %v1523_v50  ;;  %v3983_v46 = vpop.eup %1911  ;;  %v574_v12 = vmul.f32 %v570_v40, %v3814_v37  ;;  %v1066_v9 = vmul.f32 %v1062_v53, %v1034_v26  ;;  %v4408_v40 = vld [vmem:[#allocation4_spill] sm:$0xff]  ;;  %v4417_v53 = vld [vmem:[#allocation6_spill] sm:$0xff] }
 0x16f   :  { %v1516_v30 = vadd.f32 %v1910_v19, %v1515_v45  ;;  %vm1522_vm6 = vcmp.eq.f32.partialorder %v1521_v2, 8.507059e+37  ;;  %v682_v4 = vmul.f32 %v678_v63, %v3886_v44  ;;  %v886_v55 = vadd.f32 %v882_v16, %v878_v35  ;;  %v4416_v35 = vld [vmem:[#allocation8_spill] sm:$0xff] }
 0x170   :  { %v938_v14 = vadd.f32 %v3836_v54, %v3486_v34  ;;  %v1190_v5 = vmul.f32 0.003968254, %v3692_v61  ;;  %v894_v29 = vmul.f32 %v874_v28, %v870_v42  ;;  %v1122_v3 = vmul.f32 %v1118_v38, %v1090_v17 }
 0x171   :  { %v1423_v6 = vmul.f32 %v3959_v32, %v1422_v8  ;;  %v1520_v60 = vsel %vm3979_vm5, %v1910_v19, %v1516_v30  ;;  %v946_v37 = vadd.f32 %v3842_v48, %v3839_v43  ;;  %v954_v44 = vadd.f32 %v3848_v25, %v3845_v62 }
 0x172   :  { %v3993_v31 = vpop.eup %1913  ;;  %v1229_v34 = vmul.f32 %v3983_v46, %v3934_v49  ;;  %v1525_v54 = vsel %vm1522_vm6, %v1524_v39, %v1520_v60  ;;  %v962_v15 = vadd.f32 %v4408_v40, %v3851_v22  ;;  %vm1425_vm7 = vweird.f32 %v3913_v0 }
 0x173   :  { %vm1426_vm8 = vweird.f32 %v3959_v32  ;;  %v1526_v19 = vmul.f32 %v1525_v54, %v1066_v9  ;;  %v898_v51 = vmul.f32 %v886_v55, %v3949_v11  ;;  %v970_v28 = vmul.f32 %v4409_v21, %v938_v14  ;;  %v4412_v11 = vld [vmem:[#allocation9_spill] sm:$0xff]  ;;  %v4420_v14 = vld [vmem:[#allocation12_spill] sm:$0xff] }
 0x174   :  { %v1194_v43 = vsub.f32 0.008333334, %v1190_v5  ;;  %v1431_v48 = vand.u32 2147483648, %v3913_v0  ;;  %v1325_v62 = vmul.f32 %v3993_v31, %v3963_v7  ;;  %v1424_v25 = vadd.f32 %v3959_v32, %v1423_v6  ;;  %vm4019_vm9 = vmor %vm1425_vm7, %vm1426_vm8 }
 0x175   :  { %v1429_v56 = vand.u32 2147483647, %v3913_v0  ;;  %v4012_v22 = vmul.f32 %v1526_v19, %v1122_v3  ;;  %v974_v47 = vmul.f32 %v946_v37, %v4410_v18  ;;  %v986_v23 = vmul.f32 %v4411_v36, %v954_v44 }
 0x176   :  { %v1230_v24 = vsub.f32 1.0, %v1229_v34  ;;  %v1286_v33 = vmul.f32 0.003968254, %v4412_v11  ;;  %v990_v59 = vmul.f32 %v962_v15, %v4415_v13  ;;  %v4025_v26 = vmul.f32 0.5, %v4416_v35 }
 0x177   :  { %v1382_v50 = vmul.f32 0.003968254, %v4417_v53  ;;  %1915 = vrcp.f32 %v4012_v22  ;;  %v4030_v2 = vadd.f32 %v574_v12, %v4418_v41  ;;  %v4032_v63 = vadd.f32 %v682_v4, %v662_v57  ;;  %v4419_v57 = vld [vmem:[#allocation11_spill] sm:$0xff]  ;;  %v4432_v41 = vld [vmem:[#allocation13_spill] sm:$0xff] }
 0x178   :  { %v4034_v42 = vadd.f32 %v790_v10, %v786_v27  ;;  %v1432_v0 = vor.u32 1.1754944e-38, %v1431_v48  ;;  %v1198_v16 = vmul.f32 %v1194_v43, %v3692_v61  ;;  %v1326_v17 = vsub.f32 1.0, %v1325_v62 }
 0x179   :  { %v1428_v38 = vsel %vm4019_vm9, %v3959_v32, %v1424_v25  ;;  %vm1430_vm10 = vcmp.eq.f32.partialorder %v1429_v56, 8.507059e+37  ;;  %v4040_v8 = vadd.f32 %v898_v51, %v894_v29  ;;  %v978_v45 = vadd.f32 %v974_v47, %v970_v28  ;;  %v4427_v25 = vld [vmem:[#allocation3_spill] sm:$0xff] }
 0x17a   :  { %v1231_v52 = vmul.f32 %v3983_v46, %v1230_v24  ;;  %v1290_v39 = vsub.f32 0.008333334, %v1286_v33  ;;  %v994_v12 = vadd.f32 %v990_v59, %v986_v23  ;;  %v1186_v27 = vsub.f32 %v4419_v57, %v4025_v26  ;;  %v4428_v47 = vld [vmem:[#allocation19_spill] sm:$0xff]  ;;  %v4431_v59 = vld [vmem:[#allocation18_spill] sm:$0xff] }
 0x17b   :  { %vm1233_vm11 = vweird.f32 %v3934_v49  ;;  %v1386_v10 = vsub.f32 0.008333334, %v1382_v50  ;;  %vm1234_vm12 = vweird.f32 %v3983_v46  ;;  %v1237_v9 = vand.u32 2147483647, %v3934_v49 }
 0x17c   :  { %v1239_v32 = vand.u32 2147483648, %v3934_v49  ;;  %v1433_v30 = vsel %vm1430_vm10, %v1432_v0, %v1428_v38  ;;  %v1202_v55 = vsub.f32 0.083333336, %v1198_v16  ;;  %v1278_v5 = vmul.f32 0.5, %v4420_v14  ;;  %vm4058_vm14 = vmor %vm1233_vm11, %vm1234_vm12  ;;  %v4433_v16 = vld [vmem:[#allocation10_spill] sm:$0xff] }
 0x17d   :  { %v1916_v4 = vpop.eup %1915  ;;  %v1327_v29 = vmul.f32 %v3993_v31, %v1326_v17  ;;  %vm1329_vm13 = vweird.f32 %v3963_v7  ;;  %v1232_v3 = vadd.f32 %v3983_v46, %v1231_v52  ;;  %v1294_v6 = vmul.f32 %v1290_v39, %v4412_v11  ;;  %v4435_v39 = vld [vmem:[#allocation7_spill] sm:$0xff] }
 0x17e   :  { %v1335_v60 = vand.u32 2147483648, %v3963_v7  ;;  %v1577_v37 = vmul.f32 %v1916_v4, %v4012_v22  ;;  %vm1330_vm0 = vweird.f32 %v3993_v31  ;;  %v1390_v34 = vmul.f32 %v1386_v10, %v4417_v53 }
 0x17f   :  { %v1490_v54 = vmul.f32 %v1433_v30, %v3934_v49  ;;  %v1587_v40 = vand.u32 2147483648, %v4012_v22  ;;  %vm1581_vm1 = vweird.f32 %v4012_v22  ;;  %vm1582_vm2 = vweird.f32 %v1916_v4  ;;  %vm4080_vm4 = vmor %vm1329_vm13, %vm1330_vm0 }
 0x180   :  { %v1578_v15 = vsub.f32 1.0, %v1577_v37  ;;  %v1585_v19 = vand.u32 2147483647, %v4012_v22  ;;  %vm4068_vm3 = vcmp.eq.f32.partialorder %v1237_v9, 8.507059e+37  ;;  %v1240_v21 = vor.u32 1.1754944e-38, %v1239_v32  ;;  %vm4088_vm5 = vmor %vm1581_vm1, %vm1582_vm2  ;;  %v4438_v37 = vld [vmem:[#allocation2_spill] sm:$0xff] }
 0x181   :  { %v1328_v28 = vadd.f32 %v3993_v31, %v1327_v29  ;;  %v1333_v43 = vand.u32 2147483647, %v3963_v7  ;;  %v1206_v48 = vmul.f32 %v1202_v55, %v3692_v61  ;;  %v1236_v49 = vsel %vm4058_vm14, %v3983_v46, %v1232_v3 }
 0x182   :  { %v1374_v56 = vmul.f32 0.5, %v4427_v25  ;;  %v1579_v18 = vmul.f32 %v1916_v4, %v1578_v15  ;;  %v1002_v36 = vmul.f32 %v4428_v47, %v978_v45  ;;  %v1298_v23 = vsub.f32 0.083333336, %v1294_v6  ;;  %v4434_v45 = vld [vmem:[#allocation21_spill] sm:$0xff]  ;;  %v1690_v25 = vpop.xlane.xlu1 %1689 }
 0x183   :  { %v1336_v24 = vor.u32 1.1754944e-38, %v1335_v60  ;;  %v1588_v46 = vor.u32 1.1754944e-38, %v1587_v40  ;;  %v1394_v33 = vsub.f32 0.083333336, %v1390_v34  ;;  %v1494_v20 = vmul.f32 %v1490_v54, %v3963_v7 }
 0x184   :  { %v1580_v13 = vadd.f32 %v1916_v4, %v1579_v18  ;;  %vm1586_vm6 = vcmp.eq.f32.partialorder %v1585_v19, 8.507059e+37  ;;  %v1006_v35 = vmul.f32 %v994_v12, %v4431_v59  ;;  %v1241_v26 = vsel %vm4068_vm3, %v1240_v21, %v1236_v49  ;;  %v4436_v12 = vld [vmem:[#allocation5_spill] sm:$0xff] }
 0x185   :  { %v1332_v50 = vsel %vm4080_vm4, %v3993_v31, %v1328_v28  ;;  %vm1334_vm7 = vcmp.eq.f32.partialorder %v1333_v43, 8.507059e+37  ;;  %v1210_v22 = vsub.f32 %v1186_v27, %v1206_v48  ;;  %v1282_v0 = vsub.f32 %v4432_v41, %v1278_v5  ;;  %v4437_v5 = vld [vmem:[#allocation20_spill] sm:$0xff] }
 0x186   :  { %v1378_v17 = vsub.f32 %v4433_v16, %v1374_v56  ;;  %v1584_v7 = vsel %vm4088_vm5, %v1916_v4, %v1580_v13  ;;  %v1302_v38 = vmul.f32 %v1298_v23, %v4412_v11  ;;  %v1470_v52 = vadd.f32 %v4030_v2, %v4434_v45  ;;  %v1684_v56 = vpop.xlane.xlu0 %1683 }
 0x187   :  { %v1478_v57 = vadd.f32 %v4436_v12, %v4435_v39  ;;  %v1589_v10 = vsel %vm1586_vm6, %v1588_v46, %v1584_v7  ;;  %v1242_v31 = vmul.f32 %v1241_v26, %v4034_v42  ;;  %v1337_v9 = vsel %vm1334_vm7, %v1336_v24, %v1332_v50  ;;  %v1940_v42 = vld [vmem:[%s4139_s0 + $0x8] sm:$0xff] }
 0x188   :  { %v1398_v27 = vmul.f32 %v1394_v33, %v4417_v53  ;;  %v1590_v32 = vmul.f32 %v1589_v10, %v1494_v20  ;;  %v1010_v55 = vadd.f32 %v1006_v35, %v1002_v36  ;;  %v1306_v14 = vsub.f32 %v1282_v0, %v1302_v38 }
 0x189   :  { %v1338_v4 = vmul.f32 %v1337_v9, %v4040_v8  ;;  %v1474_v11 = vsub.f32 %v1470_v52, %v4032_v63  ;;  %v1482_v29 = vsub.f32 %v1478_v57, %v4437_v5  ;;  %v1274_v2 = vsub.f32 %v1210_v22, %v1242_v31 }
 0x18a   :  { %1917 = vlog2.f32 %v1590_v32  ;;  %v1402_v3 = vsub.f32 %v1378_v17, %v1398_v27  ;;  %v1434_v6 = vmul.f32 %v1433_v30, %v1010_v55  ;;  %v1634_v60 = vsub.f32 %v1940_v42, %v3535_v1 }
 0x18b   :  { %v1658_v53 = vsub.f32 %v3535_v1, %v1940_v42  ;;  %v1662_v44 = vsub.f32 %v3659_v58, %v4438_v37  ;;  %v1370_v34 = vsub.f32 %v1306_v14, %v1338_v4  ;;  %v1486_v8 = vsub.f32 %v1474_v11, %v1482_v29 }
 0x18c   :  { %v1646_v63 = vsub.f32 %v4438_v37, %v3659_v58  ;;  %v1466_v40 = vsub.f32 %v1402_v3, %v1434_v6  ;;  %v1638_v30 = vmul.f32 %v1634_v60, %v1274_v2  ;;  %v1771_v18 = vadd.f32 -2.0, %v1684_v56 }
 0x18d   :  { %v1666_v19 = vadd.f32 %v1662_v44, %v1658_v53  ;;  %v1773_v47 = vadd.f32 -2.0, %v1690_v25 }
 0x18e   :  { %v1650_v21 = vmul.f32 %v1646_v63, %v1370_v34  ;;  %v1698_v58 = vmul.f32 -1.0, %v1771_v18 }
 0x18f   :  { %v1670_v43 = vmul.f32 %v1666_v19, %v1466_v40  ;;  %v1700_v36 = vmul.f32 -1.0, %v1773_v47 }
 0x190   :  { %v1918_v54 = vpop.eup %1917  ;;  %v1706_v23 = vand.u32 2147483647, %v1698_v58  ;;  %v1702_v39 = vmax.f32 %v1698_v58, 0.0 }
 0x191   :  { %v1624_v15 = vmul.f32 0.6931472, %v1918_v54  ;;  %v1708_v24 = vand.u32 2147483647, %v1700_v36  ;;  %v1704_v57 = vmax.f32 %v1700_v36, 0.0 }
 0x192   :  { %v1710_v46 = vsub.f32 0.0, %v1706_v23 }
 0x193   :  { %v1630_v51 = vadd.f32 %v1624_v15, %v1486_v8  ;;  %v1712_v33 = vsub.f32 0.0, %v1708_v24 }
 0x194   :  { %v1714_v13 = vmul.f32 1.442695, %v1710_v46 }
 0x195   :  { %v1642_v28 = vadd.f32 %v1638_v30, %v1630_v51  ;;  %v1718_v59 = vmul.f32 1.442695, %v1712_v33 }
 0x196   :  { %1919 = vpow2.f32 %v1714_v13 }
 0x197   :  { %v1654_v48 = vadd.f32 %v1650_v21, %v1642_v28  ;;  %1921 = vpow2.f32 %v1718_v59 }
 0x199   :  { %v1674_v49 = vadd.f32 %v1670_v43, %v1654_v48 }
 0x19b   :  { %v1678_v1 = vand.u32 2147483647, %v1674_v49 }
 0x19c   :  { %v1920_v22 = vpop.eup %1919 }
 0x19d   :  { %v1685_v62 = vsel %vm1681_vm15, %v1678_v1, 0.0  ;;  %v1922_v0 = vpop.eup %1921  ;;  %v1722_v16 = vadd.f32 1.0, %v1920_v22  ;;  %vm1738_vm15 = vcmask 7168  }
 0x19e   :  { %1686 = vadd.xlane.f32.xlu0 %v1685_v62  ;;  %v1724_v17 = vadd.f32 1.0, %v1922_v0 }
 0x1b5   :  { %v1693_v61 = vpop.xlane.xlu1 %1692 }
 0x1b6   :  { %v1774_v20 = vadd.f32 -2.0, %v1693_v61 }
 0x1b8   :  { %v1701_v35 = vmul.f32 -1.0, %v1774_v20 }
 0x1ba   :  { %v1709_v26 = vand.u32 2147483647, %v1701_v35  ;;  %v1705_v32 = vmax.f32 %v1701_v35, 0.0 }
 0x1bc   :  { %v1713_v50 = vsub.f32 0.0, %v1709_v26 }
 0x1be   :  { %v1720_v41 = vmul.f32 1.442695, %v1713_v50 }
 0x1c0   :  { %1923 = vpow2.f32 %v1720_v41 }
 0x1c1   :  { %1925 = vlog2.f32 %v1722_v16 }
 0x1c2   :  { %1927 = vlog2.f32 %v1724_v17 }
 0x1c6   :  { %v1924_v7 = vpop.eup %1923 }
 0x1c7   :  { %v1926_v38 = vpop.eup %1925  ;;  %v1725_v45 = vadd.f32 1.0, %v1924_v7 }
 0x1c8   :  { %v1928_v52 = vpop.eup %1927  ;;  %v1727_v12 = vmul.f32 0.6931472, %v1926_v38 }
 0x1c9   :  { %v1731_v10 = vmul.f32 0.6931472, %v1928_v52  ;;  %1929 = vlog2.f32 %v1725_v45 }
 0x1ca   :  { %v1734_v31 = vadd.f32 %v1727_v12, %v1702_v39 }
 0x1cb   :  { %v1736_v9 = vadd.f32 %v1731_v10, %v1704_v57 }
 0x1cc   :  { %1739 = vst.msk [vmem:[%s4143_s4] sm:$0xff] %vm1738_vm15, %v1734_v31 }
 0x1cd   :  { %1741 = vst.msk [vmem:[%s4143_s4 + $0x10] sm:$0xff] %vm1738_vm15, %v1736_v9 }
 0x1cf   :  { %v1930_v27 = vpop.eup %1929 }
 0x1d0   :  { %v1733_v55 = vmul.f32 0.6931472, %v1930_v27 }
 0x1d2   :  { %v1737_v14 = vadd.f32 %v1733_v55, %v1705_v32 }
 0x1d4   :  { %1742 = vst.msk [vmem:[%s4143_s4 + $0x18] sm:$0xff] %vm1738_vm15, %v1737_v14 }
 0x211   :  { %v1687_v4 = vpop.xlane.xlu0 %1686 }
 0x212   :  { %v1772_v11 = vadd.f32 -2.0, %v1687_v4 }
 0x214   :  { %v1699_v5 = vmul.f32 -1.0, %v1772_v11 }
 0x216   :  { %v1707_v29 = vand.u32 2147483647, %v1699_v5  ;;  %v1703_v53 = vmax.f32 %v1699_v5, 0.0 }
 0x218   :  { %v1711_v2 = vsub.f32 0.0, %v1707_v29 }
 0x21a   :  { %v1716_v3 = vmul.f32 1.442695, %v1711_v2 }
 0x21c   :  { %1931 = vpow2.f32 %v1716_v3 }
 0x222   :  { %v1932_v6 = vpop.eup %1931 }
 0x223   :  { %v1723_v42 = vadd.f32 1.0, %v1932_v6 }
 0x225   :  { %1933 = vlog2.f32 %v1723_v42 }
 0x22b   :  { %v1934_v60 = vpop.eup %1933 }
 0x22c   :  { %v1729_v37 = vmul.f32 0.6931472, %v1934_v60 }
 0x22e   :  { %v1735_v44 = vadd.f32 %v1729_v37, %v1703_v53 }
 0x230   :  { %1740 = vst.msk [vmem:[%s4143_s4 + $0x8] sm:$0xff] %vm1738_vm15, %v1735_v44 }

</bundles_post_ra>
